<compile_context>
chip_gen: v6e
topology: v6e:2x2x1
jax: 0.10.0
libtpu: 0.0.40
codegen_flags: <defaults>
</compile_context>

<pallas_src>
import math

import jax
import jax.numpy as jnp
from jax.experimental import pallas as pl
from jax.experimental.pallas import tpu as pltpu


# ------------------------------ Parameters ---------------------------------

VOCAB = 128
HIDDEN = 32
NUM_HEADS = 4
NUM_LAYERS = 2
INTERMEDIATE = 64
MAX_POS = 16
TYPE_VOCAB = 2
HEAD_DIM = HIDDEN // NUM_HEADS


def init_params(key):
    std = 0.02
    keys = iter(jax.random.split(key, 64))

    def nrm(shape):
        return std * jax.random.normal(next(keys), shape, dtype=jnp.float32)

    p = {
        "word_emb": nrm((VOCAB, HIDDEN)),
        "pos_emb": nrm((MAX_POS, HIDDEN)),
        "type_emb": nrm((TYPE_VOCAB, HIDDEN)),
        "emb_ln_g": jnp.ones((HIDDEN,), jnp.float32),
        "emb_ln_b": jnp.zeros((HIDDEN,), jnp.float32),
        "layers": [],
        # pooler params (kept for parity with the module; the pooled output is
        # unused by the MLM head, so its compute is intentionally not emitted)
        "pool_w": nrm((HIDDEN, HIDDEN)),
        "pool_b": jnp.zeros((HIDDEN,), jnp.float32),
        # MLM head
        "tr_w": nrm((HIDDEN, HIDDEN)),
        "tr_b": jnp.zeros((HIDDEN,), jnp.float32),
        "tr_ln_g": jnp.ones((HIDDEN,), jnp.float32),
        "tr_ln_b": jnp.zeros((HIDDEN,), jnp.float32),
        "dec_b": jnp.zeros((VOCAB,), jnp.float32),
    }
    for _ in range(NUM_LAYERS):
        p["layers"].append({
            "qkv_w": nrm((HIDDEN, 3 * HIDDEN)),
            "qkv_b": jnp.zeros((3 * HIDDEN,), jnp.float32),
            "ao_w": nrm((HIDDEN, HIDDEN)),
            "ao_b": jnp.zeros((HIDDEN,), jnp.float32),
            "ao_ln_g": jnp.ones((HIDDEN,), jnp.float32),
            "ao_ln_b": jnp.zeros((HIDDEN,), jnp.float32),
            "i_w": nrm((HIDDEN, INTERMEDIATE)),
            "i_b": jnp.zeros((INTERMEDIATE,), jnp.float32),
            "o_w": nrm((INTERMEDIATE, HIDDEN)),
            "o_b": jnp.zeros((HIDDEN,), jnp.float32),
            "o_ln_g": jnp.ones((HIDDEN,), jnp.float32),
            "o_ln_b": jnp.zeros((HIDDEN,), jnp.float32),
        })
    return p


# ----------------------- One-time weight preparation -------------------------
# Runs ONCE at init (outside the jitted forward): stacks per-layer weights,
# pre-splits per-head Q/K/V and attention-output slabs, and folds the
# 1/sqrt(dh) attention scale into the Q weights/bias.

def prepare_weights(params):
    H, I, V = HIDDEN, INTERMEDIATE, VOCAB
    nh, dh = NUM_HEADS, HEAD_DIM
    scale = 1.0 / math.sqrt(dh)

    q_w, k_w, v_w, q_b, k_b, v_b, ao_w = [], [], [], [], [], [], []
    for lp in params["layers"]:
        w = lp["qkv_w"]          # (H, 3H) -> columns [Q | K | V]
        b = lp["qkv_b"]          # (3H,)
        for h in range(nh):
            sl = slice(h * dh, (h + 1) * dh)
            q_w.append(w[:, sl] * scale)
            k_w.append(w[:, H + h * dh:H + (h + 1) * dh])
            v_w.append(w[:, 2 * H + h * dh:2 * H + (h + 1) * dh])
            q_b.append(b[sl].reshape(1, dh) * scale)
            k_b.append(b[H + h * dh:H + (h + 1) * dh].reshape(1, dh))
            v_b.append(b[2 * H + h * dh:2 * H + (h + 1) * dh].reshape(1, dh))
            ao_w.append(lp["ao_w"][sl, :])                  # (dh, H)

    def stack(name, shape):
        return jnp.stack([lp[name].reshape(shape) for lp in params["layers"]])

    return {
        # embedding tables (gathers happen in the XLA wrapper)
        "word_emb": params["word_emb"],
        "pos_emb": params["pos_emb"],
        "type_emb": params["type_emb"],
        # embedding LayerNorm
        "emb_ln_g": params["emb_ln_g"].reshape(1, H),
        "emb_ln_b": params["emb_ln_b"].reshape(1, H),
        # per-head attention weights, leading axis = L * nh
        "q_w": jnp.stack(q_w), "k_w": jnp.stack(k_w), "v_w": jnp.stack(v_w),
        "q_b": jnp.stack(q_b), "k_b": jnp.stack(k_b), "v_b": jnp.stack(v_b),
        "ao_w": jnp.stack(ao_w),                            # (L*nh, dh, H)
        # per-layer tensors, leading axis = L
        "ao_b": stack("ao_b", (1, H)),
        "ao_g": stack("ao_ln_g", (1, H)), "ao_bb": stack("ao_ln_b", (1, H)),
        "i_w": stack("i_w", (H, I)), "i_b": stack("i_b", (1, I)),
        "o_w": stack("o_w", (I, H)), "o_b": stack("o_b", (1, H)),
        "o_g": stack("o_ln_g", (1, H)), "o_bb": stack("o_ln_b", (1, H)),
        # MLM head
        "tr_w": params["tr_w"], "tr_b": params["tr_b"].reshape(1, H),
        "tr_g": params["tr_ln_g"].reshape(1, H),
        "tr_bb": params["tr_ln_b"].reshape(1, H),
        "dec_b": params["dec_b"].reshape(1, V),
    }


# --------------------------- Fused Pallas kernel ----------------------------

def _bert_fused_kernel(
    emb_ref, mask_ref,                        # (BS, H), (BS, BS)
    emb_g_ref, emb_b_ref,                     # embedding LayerNorm
    q_w_ref, k_w_ref, v_w_ref,                # (L*nh, H, dh)
    q_b_ref, k_b_ref, v_b_ref,                # (L*nh, 1, dh)
    ao_w_ref,                                 # (L*nh, dh, H)
    ao_b_ref, ao_g_ref, ao_bb_ref,            # (L, 1, H)
    i_w_ref, i_b_ref,                         # (L, H, I), (L, 1, I)
    o_w_ref, o_b_ref, o_g_ref, o_bb_ref,      # (L, I, H), (L, 1, H) x3
    tr_w_ref, tr_b_ref, tr_g_ref, tr_bb_ref,  # MLM transform + LN
    we_ref, dec_b_ref,                        # tied decoder (V, H) + (1, V)
    out_ref,                                  # (BS, V) logits
):
    inv_sqrt2 = 1.0 / math.sqrt(2.0)

    def ln(x, g, b):
        mu = jnp.mean(x, axis=-1, keepdims=True)
        xc = x - mu
        var = jnp.mean(xc * xc, axis=-1, keepdims=True)
        return xc * jax.lax.rsqrt(var + 1e-12) * g + b

    def gelu(x):  # exact (erf) GELU, matching torch.nn.GELU()
        return 0.5 * x * (1.0 + jax.lax.erf(x * inv_sqrt2))

    mask = mask_ref[...]                                    # (BS, BS) additive
    x = ln(emb_ref[...], emb_g_ref[...], emb_b_ref[...])    # (BS, H)

    for l in range(NUM_LAYERS):                             # static unroll
        # ---- self attention (per-head weights, no activation lane slicing)
        attn = None
        for h in range(NUM_HEADS):                          # static unroll
            i = l * NUM_HEADS + h
            q_h = jnp.dot(x, q_w_ref[i],
                          preferred_element_type=jnp.float32) + q_b_ref[i]
            k_h = jnp.dot(x, k_w_ref[i],
                          preferred_element_type=jnp.float32) + k_b_ref[i]
            v_h = jnp.dot(x, v_w_ref[i],
                          preferred_element_type=jnp.float32) + v_b_ref[i]
            # scores = q @ k^T without materializing a transpose of K;
            # 1/sqrt(dh) is already folded into the Q weights/bias.
            s = jax.lax.dot_general(
                q_h, k_h, (((1,), (1,)), ((), ())),
                preferred_element_type=jnp.float32)          # (BS, BS)
            s = s + mask                                     # block-diag + pad
            s = s - jnp.max(s, axis=-1, keepdims=True)       # stable softmax
            p = jnp.exp(s)
            p = p * pl.reciprocal(jnp.sum(p, axis=-1, keepdims=True),
                                  approx=True)
            ctx_h = jnp.dot(p, v_h, preferred_element_type=jnp.float32)
            # accumulate the output projection per head (no concat/relayout)
            contrib = jnp.dot(ctx_h, ao_w_ref[i],
                              preferred_element_type=jnp.float32)
            attn = contrib if attn is None else attn + contrib
        attn = attn + ao_b_ref[l]
        x = ln(attn + x, ao_g_ref[l], ao_bb_ref[l])

        # ---- feed-forward --------------------------------------------------
        inter = gelu(jnp.dot(x, i_w_ref[l],
                             preferred_element_type=jnp.float32) + i_b_ref[l])
        ffn = (jnp.dot(inter, o_w_ref[l],
                       preferred_element_type=jnp.float32) + o_b_ref[l])
        x = ln(ffn + x, o_g_ref[l], o_bb_ref[l])

    # ---- MLM head: transform (gelu linear + LN) -> tied decoder + bias -----
    h_t = gelu(jnp.dot(x, tr_w_ref[...],
                       preferred_element_type=jnp.float32) + tr_b_ref[...])
    h_t = ln(h_t, tr_g_ref[...], tr_bb_ref[...])
    logits = jax.lax.dot_general(
        h_t, we_ref[...], (((1,), (1,)), ((), ())),
        preferred_element_type=jnp.float32) + dec_b_ref[...]  # (BS, V)
    out_ref[...] = logits


# ------------------------------- Forward ------------------------------------

def bert_mlm_forward(prep, input_ids, token_type_ids, attention_mask):
    B, S = input_ids.shape
    H, V = HIDDEN, VOCAB
    BS = B * S

    # embedding gathers are glue (tiny tables); sum in XLA, LN in the kernel
    pos_ids = jnp.arange(S, dtype=jnp.int32)
    emb = (jnp.take(prep["word_emb"], input_ids, axis=0)
           + jnp.take(prep["pos_emb"], pos_ids, axis=0)[None, :, :]
           + jnp.take(prep["type_emb"], token_type_ids, axis=0))   # (B, S, H)
    emb = emb.reshape(BS, H)

    # Block-diagonal additive mask: the batch is folded into the sublane axis,
    # so cross-batch key positions and padded keys both get -10000 (the same
    # convention the module uses); after max-subtraction they exp-underflow to
    # exactly 0 in f32, matching the per-batch softmax.
    key_keep = attention_mask.astype(jnp.float32).reshape(BS)           # (BS,)
    bidx = jnp.repeat(jnp.arange(B, dtype=jnp.int32), S)                # (BS,)
    same_batch = (bidx[:, None] == bidx[None, :]).astype(jnp.float32)
    ext_mask = (1.0 - same_batch * key_keep[None, :]) * -10000.0        # (BS,BS)

    args = (
        emb, ext_mask,
        prep["emb_ln_g"], prep["emb_ln_b"],
        prep["q_w"], prep["k_w"], prep["v_w"],
        prep["q_b"], prep["k_b"], prep["v_b"],
        prep["ao_w"], prep["ao_b"], prep["ao_g"], prep["ao_bb"],
        prep["i_w"], prep["i_b"],
        prep["o_w"], prep["o_b"], prep["o_g"], prep["o_bb"],
        prep["tr_w"], prep["tr_b"], prep["tr_g"], prep["tr_bb"],
        prep["word_emb"], prep["dec_b"],
    )

    # Grid-less single invocation: the whole (tiny) problem lives in VMEM for
    # one kernel launch — no per-batch pipeline-step overhead, no weight
    # double-buffering (nothing is re-fetched).
    vmem = lambda: pl.BlockSpec(memory_space=pltpu.MemorySpace.VMEM)
    logits = pl.pallas_call(
        _bert_fused_kernel,
        out_shape=jax.ShapeDtypeStruct((BS, V), jnp.float32),
        in_specs=[vmem() for _ in args],
        out_specs=vmem(),
    )(*args)

    # TODO(synk): masked_lm_labels branch (CrossEntropyLoss) not exercised;
    # forward with labels=None returns only the logits, matching the module.
    # The pooler output of BertModel is never consumed by the MLM head, so its
    # compute is intentionally not emitted.
    return (logits.reshape(B, S, V),)


# --------------------------------- Main -------------------------------------

if __name__ == "__main__":
    B, S = 2, 8
    key = jax.random.PRNGKey(0)
    kp, ki, kt, km = jax.random.split(key, 4)

    params = init_params(kp)
    prep = prepare_weights(params)   # once, outside the jitted forward

    input_ids = jax.random.randint(ki, (B, S), 0, VOCAB, dtype=jnp.int32)
    token_type_ids = jax.random.randint(kt, (B, S), 0, TYPE_VOCAB,
                                        dtype=jnp.int32)
    attention_mask = jnp.concatenate(
        [jnp.ones((B, S - 2), jnp.int32), jnp.zeros((B, 2), jnp.int32)], axis=1)

    fwd = jax.jit(bert_mlm_forward)
    (scores,) = fwd(prep, input_ids, token_type_ids, attention_mask)
    jax.block_until_ready(scores)
    assert scores.shape == (B, S, VOCAB) and scores.dtype == jnp.float32
    print("KERNEL_OK")
</pallas_src>

<mosaic_0001>
module attributes {stable_mosaic.version = 11 : i64} {
  func.func @_bert_fused_kernel(%arg0: memref<16x32xf32, #tpu.memory_space<vmem>>, %arg1: memref<16x16xf32, #tpu.memory_space<vmem>>, %arg2: memref<1x32xf32, #tpu.memory_space<vmem>>, %arg3: memref<1x32xf32, #tpu.memory_space<vmem>>, %arg4: memref<8x32x8xf32, #tpu.memory_space<vmem>>, %arg5: memref<8x32x8xf32, #tpu.memory_space<vmem>>, %arg6: memref<8x32x8xf32, #tpu.memory_space<vmem>>, %arg7: memref<8x1x8xf32, #tpu.memory_space<vmem>>, %arg8: memref<8x1x8xf32, #tpu.memory_space<vmem>>, %arg9: memref<8x1x8xf32, #tpu.memory_space<vmem>>, %arg10: memref<8x8x32xf32, #tpu.memory_space<vmem>>, %arg11: memref<2x1x32xf32, #tpu.memory_space<vmem>>, %arg12: memref<2x1x32xf32, #tpu.memory_space<vmem>>, %arg13: memref<2x1x32xf32, #tpu.memory_space<vmem>>, %arg14: memref<2x32x64xf32, #tpu.memory_space<vmem>>, %arg15: memref<2x1x64xf32, #tpu.memory_space<vmem>>, %arg16: memref<2x64x32xf32, #tpu.memory_space<vmem>>, %arg17: memref<2x1x32xf32, #tpu.memory_space<vmem>>, %arg18: memref<2x1x32xf32, #tpu.memory_space<vmem>>, %arg19: memref<2x1x32xf32, #tpu.memory_space<vmem>>, %arg20: memref<32x32xf32, #tpu.memory_space<vmem>>, %arg21: memref<1x32xf32, #tpu.memory_space<vmem>>, %arg22: memref<1x32xf32, #tpu.memory_space<vmem>>, %arg23: memref<1x32xf32, #tpu.memory_space<vmem>>, %arg24: memref<128x32xf32, #tpu.memory_space<vmem>>, %arg25: memref<1x128xf32, #tpu.memory_space<vmem>>, %arg26: memref<16x128xf32, #tpu.memory_space<vmem>>) attributes {dimension_semantics = [], scalar_prefetch = 0 : i64, scratch_operands = 0 : i64, tpu.core_type = #tpu.core_type<tc>} {
    %c0 = arith.constant 0 : index
    %c0_0 = arith.constant 0 : index
    %0 = vector.load %arg1[%c0, %c0_0] : memref<16x16xf32, #tpu.memory_space<vmem>>, vector<16x16xf32>
    %c0_1 = arith.constant 0 : index
    %c0_2 = arith.constant 0 : index
    %1 = vector.load %arg0[%c0_1, %c0_2] : memref<16x32xf32, #tpu.memory_space<vmem>>, vector<16x32xf32>
    %c0_3 = arith.constant 0 : index
    %c0_4 = arith.constant 0 : index
    %2 = vector.load %arg2[%c0_3, %c0_4] : memref<1x32xf32, #tpu.memory_space<vmem>>, vector<1x32xf32>
    %c0_5 = arith.constant 0 : index
    %c0_6 = arith.constant 0 : index
    %3 = vector.load %arg3[%c0_5, %c0_6] : memref<1x32xf32, #tpu.memory_space<vmem>>, vector<1x32xf32>
    %cst = arith.constant dense<0.000000e+00> : vector<16xf32>
    %4 = vector.multi_reduction <add>, %1, %cst [1] : vector<16x32xf32> to vector<16xf32>
    %5 = vector.shape_cast %4 : vector<16xf32> to vector<16x1xf32>
    %cst_7 = arith.constant 3.200000e+01 : f32
    %6 = vector.broadcast %cst_7 : f32 to vector<16x1xf32>
    %7 = arith.divf %5, %6 : vector<16x1xf32>
    %8 = vector.broadcast %7 : vector<16x1xf32> to vector<16x32xf32>
    %9 = arith.subf %1, %8 : vector<16x32xf32>
    %10 = arith.mulf %9, %9 : vector<16x32xf32>
    %cst_8 = arith.constant dense<0.000000e+00> : vector<16xf32>
    %11 = vector.multi_reduction <add>, %10, %cst_8 [1] : vector<16x32xf32> to vector<16xf32>
    %12 = vector.shape_cast %11 : vector<16xf32> to vector<16x1xf32>
    %cst_9 = arith.constant 3.200000e+01 : f32
    %13 = vector.broadcast %cst_9 : f32 to vector<16x1xf32>
    %14 = arith.divf %12, %13 : vector<16x1xf32>
    %cst_10 = arith.constant 9.99999996E-13 : f32
    %15 = vector.broadcast %cst_10 : f32 to vector<16x1xf32>
    %16 = arith.addf %14, %15 : vector<16x1xf32>
    %17 = math.rsqrt %16 : vector<16x1xf32>
    %18 = vector.broadcast %17 : vector<16x1xf32> to vector<16x32xf32>
    %19 = arith.mulf %9, %18 : vector<16x32xf32>
    %20 = vector.broadcast %2 : vector<1x32xf32> to vector<16x32xf32>
    %21 = arith.mulf %19, %20 : vector<16x32xf32>
    %22 = vector.broadcast %3 : vector<1x32xf32> to vector<16x32xf32>
    %23 = arith.addf %21, %22 : vector<16x32xf32>
    %c0_11 = arith.constant 0 : index
    %c0_12 = arith.constant 0 : index
    %c0_13 = arith.constant 0 : index
    %24 = vector.load %arg4[%c0_11, %c0_12, %c0_13] : memref<8x32x8xf32, #tpu.memory_space<vmem>>, vector<1x32x8xf32>
    %25 = vector.shape_cast %24 : vector<1x32x8xf32> to vector<32x8xf32>
    %cst_14 = arith.constant dense<0.000000e+00> : vector<16x8xf32>
    %26 = tpu.matmul %23, %25, %cst_14 {dimension_numbers = #tpu.dot_dimension_numbers<[1], [0], [0], [1], [0, 0, 1, 1], [], []>} : vector<16x32xf32>, vector<32x8xf32>, vector<16x8xf32> -> vector<16x8xf32>
    %c0_15 = arith.constant 0 : index
    %c0_16 = arith.constant 0 : index
    %c0_17 = arith.constant 0 : index
    %27 = vector.load %arg7[%c0_15, %c0_16, %c0_17] : memref<8x1x8xf32, #tpu.memory_space<vmem>>, vector<1x1x8xf32>
    %28 = vector.shape_cast %27 : vector<1x1x8xf32> to vector<1x8xf32>
    %29 = vector.broadcast %28 : vector<1x8xf32> to vector<16x8xf32>
    %30 = arith.addf %26, %29 : vector<16x8xf32>
    %c0_18 = arith.constant 0 : index
    %c0_19 = arith.constant 0 : index
    %c0_20 = arith.constant 0 : index
    %31 = vector.load %arg5[%c0_18, %c0_19, %c0_20] : memref<8x32x8xf32, #tpu.memory_space<vmem>>, vector<1x32x8xf32>
    %32 = vector.shape_cast %31 : vector<1x32x8xf32> to vector<32x8xf32>
    %cst_21 = arith.constant dense<0.000000e+00> : vector<16x8xf32>
    %33 = tpu.matmul %23, %32, %cst_21 {dimension_numbers = #tpu.dot_dimension_numbers<[1], [0], [0], [1], [0, 0, 1, 1], [], []>} : vector<16x32xf32>, vector<32x8xf32>, vector<16x8xf32> -> vector<16x8xf32>
    %c0_22 = arith.constant 0 : index
    %c0_23 = arith.constant 0 : index
    %c0_24 = arith.constant 0 : index
    %34 = vector.load %arg8[%c0_22, %c0_23, %c0_24] : memref<8x1x8xf32, #tpu.memory_space<vmem>>, vector<1x1x8xf32>
    %35 = vector.shape_cast %34 : vector<1x1x8xf32> to vector<1x8xf32>
    %36 = vector.broadcast %35 : vector<1x8xf32> to vector<16x8xf32>
    %37 = arith.addf %33, %36 : vector<16x8xf32>
    %c0_25 = arith.constant 0 : index
    %c0_26 = arith.constant 0 : index
    %c0_27 = arith.constant 0 : index
    %38 = vector.load %arg6[%c0_25, %c0_26, %c0_27] : memref<8x32x8xf32, #tpu.memory_space<vmem>>, vector<1x32x8xf32>
    %39 = vector.shape_cast %38 : vector<1x32x8xf32> to vector<32x8xf32>
    %cst_28 = arith.constant dense<0.000000e+00> : vector<16x8xf32>
    %40 = tpu.matmul %23, %39, %cst_28 {dimension_numbers = #tpu.dot_dimension_numbers<[1], [0], [0], [1], [0, 0, 1, 1], [], []>} : vector<16x32xf32>, vector<32x8xf32>, vector<16x8xf32> -> vector<16x8xf32>
    %c0_29 = arith.constant 0 : index
    %c0_30 = arith.constant 0 : index
    %c0_31 = arith.constant 0 : index
    %41 = vector.load %arg9[%c0_29, %c0_30, %c0_31] : memref<8x1x8xf32, #tpu.memory_space<vmem>>, vector<1x1x8xf32>
    %42 = vector.shape_cast %41 : vector<1x1x8xf32> to vector<1x8xf32>
    %43 = vector.broadcast %42 : vector<1x8xf32> to vector<16x8xf32>
    %44 = arith.addf %40, %43 : vector<16x8xf32>
    %cst_32 = arith.constant dense<0.000000e+00> : vector<16x16xf32>
    %45 = tpu.matmul %30, %37, %cst_32 {dimension_numbers = #tpu.dot_dimension_numbers<[1], [1], [0], [0], [0, 0, 1, 0], [], []>} : vector<16x8xf32>, vector<16x8xf32>, vector<16x16xf32> -> vector<16x16xf32>
    %46 = arith.addf %45, %0 : vector<16x16xf32>
    %cst_33 = arith.constant dense<0xFF800000> : vector<16xf32>
    %47 = vector.multi_reduction <maximumf>, %46, %cst_33 [1] : vector<16x16xf32> to vector<16xf32>
    %48 = vector.shape_cast %47 : vector<16xf32> to vector<16x1xf32>
    %49 = vector.broadcast %48 : vector<16x1xf32> to vector<16x16xf32>
    %50 = arith.subf %46, %49 : vector<16x16xf32>
    %51 = math.exp %50 : vector<16x16xf32>
    %cst_34 = arith.constant dense<0.000000e+00> : vector<16xf32>
    %52 = vector.multi_reduction <add>, %51, %cst_34 [1] : vector<16x16xf32> to vector<16xf32>
    %53 = vector.shape_cast %52 : vector<16xf32> to vector<16x1xf32>
    %54 = tpu.reciprocal %53 {approx = true} : vector<16x1xf32> -> vector<16x1xf32>
    %55 = vector.broadcast %54 : vector<16x1xf32> to vector<16x16xf32>
    %56 = arith.mulf %51, %55 : vector<16x16xf32>
    %cst_35 = arith.constant dense<0.000000e+00> : vector<16x8xf32>
    %57 = tpu.matmul %56, %44, %cst_35 {dimension_numbers = #tpu.dot_dimension_numbers<[1], [0], [0], [1], [0, 0, 1, 1], [], []>} : vector<16x16xf32>, vector<16x8xf32>, vector<16x8xf32> -> vector<16x8xf32>
    %c0_36 = arith.constant 0 : index
    %c0_37 = arith.constant 0 : index
    %c0_38 = arith.constant 0 : index
    %58 = vector.load %arg10[%c0_36, %c0_37, %c0_38] : memref<8x8x32xf32, #tpu.memory_space<vmem>>, vector<1x8x32xf32>
    %59 = vector.shape_cast %58 : vector<1x8x32xf32> to vector<8x32xf32>
    %cst_39 = arith.constant dense<0.000000e+00> : vector<16x32xf32>
    %60 = tpu.matmul %57, %59, %cst_39 {dimension_numbers = #tpu.dot_dimension_numbers<[1], [0], [0], [1], [0, 0, 1, 1], [], []>} : vector<16x8xf32>, vector<8x32xf32>, vector<16x32xf32> -> vector<16x32xf32>
    %c1 = arith.constant 1 : index
    %c0_40 = arith.constant 0 : index
    %c0_41 = arith.constant 0 : index
    %61 = vector.load %arg4[%c1, %c0_40, %c0_41] : memref<8x32x8xf32, #tpu.memory_space<vmem>>, vector<1x32x8xf32>
    %62 = vector.shape_cast %61 : vector<1x32x8xf32> to vector<32x8xf32>
    %cst_42 = arith.constant dense<0.000000e+00> : vector<16x8xf32>
    %63 = tpu.matmul %23, %62, %cst_42 {dimension_numbers = #tpu.dot_dimension_numbers<[1], [0], [0], [1], [0, 0, 1, 1], [], []>} : vector<16x32xf32>, vector<32x8xf32>, vector<16x8xf32> -> vector<16x8xf32>
    %c1_43 = arith.constant 1 : index
    %c0_44 = arith.constant 0 : index
    %c0_45 = arith.constant 0 : index
    %64 = vector.load %arg7[%c1_43, %c0_44, %c0_45] : memref<8x1x8xf32, #tpu.memory_space<vmem>>, vector<1x1x8xf32>
    %65 = vector.shape_cast %64 : vector<1x1x8xf32> to vector<1x8xf32>
    %66 = vector.broadcast %65 : vector<1x8xf32> to vector<16x8xf32>
    %67 = arith.addf %63, %66 : vector<16x8xf32>
    %c1_46 = arith.constant 1 : index
    %c0_47 = arith.constant 0 : index
    %c0_48 = arith.constant 0 : index
    %68 = vector.load %arg5[%c1_46, %c0_47, %c0_48] : memref<8x32x8xf32, #tpu.memory_space<vmem>>, vector<1x32x8xf32>
    %69 = vector.shape_cast %68 : vector<1x32x8xf32> to vector<32x8xf32>
    %cst_49 = arith.constant dense<0.000000e+00> : vector<16x8xf32>
    %70 = tpu.matmul %23, %69, %cst_49 {dimension_numbers = #tpu.dot_dimension_numbers<[1], [0], [0], [1], [0, 0, 1, 1], [], []>} : vector<16x32xf32>, vector<32x8xf32>, vector<16x8xf32> -> vector<16x8xf32>
    %c1_50 = arith.constant 1 : index
    %c0_51 = arith.constant 0 : index
    %c0_52 = arith.constant 0 : index
    %71 = vector.load %arg8[%c1_50, %c0_51, %c0_52] : memref<8x1x8xf32, #tpu.memory_space<vmem>>, vector<1x1x8xf32>
    %72 = vector.shape_cast %71 : vector<1x1x8xf32> to vector<1x8xf32>
    %73 = vector.broadcast %72 : vector<1x8xf32> to vector<16x8xf32>
    %74 = arith.addf %70, %73 : vector<16x8xf32>
    %c1_53 = arith.constant 1 : index
    %c0_54 = arith.constant 0 : index
    %c0_55 = arith.constant 0 : index
    %75 = vector.load %arg6[%c1_53, %c0_54, %c0_55] : memref<8x32x8xf32, #tpu.memory_space<vmem>>, vector<1x32x8xf32>
    %76 = vector.shape_cast %75 : vector<1x32x8xf32> to vector<32x8xf32>
    %cst_56 = arith.constant dense<0.000000e+00> : vector<16x8xf32>
    %77 = tpu.matmul %23, %76, %cst_56 {dimension_numbers = #tpu.dot_dimension_numbers<[1], [0], [0], [1], [0, 0, 1, 1], [], []>} : vector<16x32xf32>, vector<32x8xf32>, vector<16x8xf32> -> vector<16x8xf32>
    %c1_57 = arith.constant 1 : index
    %c0_58 = arith.constant 0 : index
    %c0_59 = arith.constant 0 : index
    %78 = vector.load %arg9[%c1_57, %c0_58, %c0_59] : memref<8x1x8xf32, #tpu.memory_space<vmem>>, vector<1x1x8xf32>
    %79 = vector.shape_cast %78 : vector<1x1x8xf32> to vector<1x8xf32>
    %80 = vector.broadcast %79 : vector<1x8xf32> to vector<16x8xf32>
    %81 = arith.addf %77, %80 : vector<16x8xf32>
    %cst_60 = arith.constant dense<0.000000e+00> : vector<16x16xf32>
    %82 = tpu.matmul %67, %74, %cst_60 {dimension_numbers = #tpu.dot_dimension_numbers<[1], [1], [0], [0], [0, 0, 1, 0], [], []>} : vector<16x8xf32>, vector<16x8xf32>, vector<16x16xf32> -> vector<16x16xf32>
    %83 = arith.addf %82, %0 : vector<16x16xf32>
    %cst_61 = arith.constant dense<0xFF800000> : vector<16xf32>
    %84 = vector.multi_reduction <maximumf>, %83, %cst_61 [1] : vector<16x16xf32> to vector<16xf32>
    %85 = vector.shape_cast %84 : vector<16xf32> to vector<16x1xf32>
    %86 = vector.broadcast %85 : vector<16x1xf32> to vector<16x16xf32>
    %87 = arith.subf %83, %86 : vector<16x16xf32>
    %88 = math.exp %87 : vector<16x16xf32>
    %cst_62 = arith.constant dense<0.000000e+00> : vector<16xf32>
    %89 = vector.multi_reduction <add>, %88, %cst_62 [1] : vector<16x16xf32> to vector<16xf32>
    %90 = vector.shape_cast %89 : vector<16xf32> to vector<16x1xf32>
    %91 = tpu.reciprocal %90 {approx = true} : vector<16x1xf32> -> vector<16x1xf32>
    %92 = vector.broadcast %91 : vector<16x1xf32> to vector<16x16xf32>
    %93 = arith.mulf %88, %92 : vector<16x16xf32>
    %cst_63 = arith.constant dense<0.000000e+00> : vector<16x8xf32>
    %94 = tpu.matmul %93, %81, %cst_63 {dimension_numbers = #tpu.dot_dimension_numbers<[1], [0], [0], [1], [0, 0, 1, 1], [], []>} : vector<16x16xf32>, vector<16x8xf32>, vector<16x8xf32> -> vector<16x8xf32>
    %c1_64 = arith.constant 1 : index
    %c0_65 = arith.constant 0 : index
    %c0_66 = arith.constant 0 : index
    %95 = vector.load %arg10[%c1_64, %c0_65, %c0_66] : memref<8x8x32xf32, #tpu.memory_space<vmem>>, vector<1x8x32xf32>
    %96 = vector.shape_cast %95 : vector<1x8x32xf32> to vector<8x32xf32>
    %cst_67 = arith.constant dense<0.000000e+00> : vector<16x32xf32>
    %97 = tpu.matmul %94, %96, %cst_67 {dimension_numbers = #tpu.dot_dimension_numbers<[1], [0], [0], [1], [0, 0, 1, 1], [], []>} : vector<16x8xf32>, vector<8x32xf32>, vector<16x32xf32> -> vector<16x32xf32>
    %98 = arith.addf %60, %97 : vector<16x32xf32>
    %c2 = arith.constant 2 : index
    %c0_68 = arith.constant 0 : index
    %c0_69 = arith.constant 0 : index
    %99 = vector.load %arg4[%c2, %c0_68, %c0_69] : memref<8x32x8xf32, #tpu.memory_space<vmem>>, vector<1x32x8xf32>
    %100 = vector.shape_cast %99 : vector<1x32x8xf32> to vector<32x8xf32>
    %cst_70 = arith.constant dense<0.000000e+00> : vector<16x8xf32>
    %101 = tpu.matmul %23, %100, %cst_70 {dimension_numbers = #tpu.dot_dimension_numbers<[1], [0], [0], [1], [0, 0, 1, 1], [], []>} : vector<16x32xf32>, vector<32x8xf32>, vector<16x8xf32> -> vector<16x8xf32>
    %c2_71 = arith.constant 2 : index
    %c0_72 = arith.constant 0 : index
    %c0_73 = arith.constant 0 : index
    %102 = vector.load %arg7[%c2_71, %c0_72, %c0_73] : memref<8x1x8xf32, #tpu.memory_space<vmem>>, vector<1x1x8xf32>
    %103 = vector.shape_cast %102 : vector<1x1x8xf32> to vector<1x8xf32>
    %104 = vector.broadcast %103 : vector<1x8xf32> to vector<16x8xf32>
    %105 = arith.addf %101, %104 : vector<16x8xf32>
    %c2_74 = arith.constant 2 : index
    %c0_75 = arith.constant 0 : index
    %c0_76 = arith.constant 0 : index
    %106 = vector.load %arg5[%c2_74, %c0_75, %c0_76] : memref<8x32x8xf32, #tpu.memory_space<vmem>>, vector<1x32x8xf32>
    %107 = vector.shape_cast %106 : vector<1x32x8xf32> to vector<32x8xf32>
    %cst_77 = arith.constant dense<0.000000e+00> : vector<16x8xf32>
    %108 = tpu.matmul %23, %107, %cst_77 {dimension_numbers = #tpu.dot_dimension_numbers<[1], [0], [0], [1], [0, 0, 1, 1], [], []>} : vector<16x32xf32>, vector<32x8xf32>, vector<16x8xf32> -> vector<16x8xf32>
    %c2_78 = arith.constant 2 : index
    %c0_79 = arith.constant 0 : index
    %c0_80 = arith.constant 0 : index
    %109 = vector.load %arg8[%c2_78, %c0_79, %c0_80] : memref<8x1x8xf32, #tpu.memory_space<vmem>>, vector<1x1x8xf32>
    %110 = vector.shape_cast %109 : vector<1x1x8xf32> to vector<1x8xf32>
    %111 = vector.broadcast %110 : vector<1x8xf32> to vector<16x8xf32>
    %112 = arith.addf %108, %111 : vector<16x8xf32>
    %c2_81 = arith.constant 2 : index
    %c0_82 = arith.constant 0 : index
    %c0_83 = arith.constant 0 : index
    %113 = vector.load %arg6[%c2_81, %c0_82, %c0_83] : memref<8x32x8xf32, #tpu.memory_space<vmem>>, vector<1x32x8xf32>
    %114 = vector.shape_cast %113 : vector<1x32x8xf32> to vector<32x8xf32>
    %cst_84 = arith.constant dense<0.000000e+00> : vector<16x8xf32>
    %115 = tpu.matmul %23, %114, %cst_84 {dimension_numbers = #tpu.dot_dimension_numbers<[1], [0], [0], [1], [0, 0, 1, 1], [], []>} : vector<16x32xf32>, vector<32x8xf32>, vector<16x8xf32> -> vector<16x8xf32>
    %c2_85 = arith.constant 2 : index
    %c0_86 = arith.constant 0 : index
    %c0_87 = arith.constant 0 : index
    %116 = vector.load %arg9[%c2_85, %c0_86, %c0_87] : memref<8x1x8xf32, #tpu.memory_space<vmem>>, vector<1x1x8xf32>
    %117 = vector.shape_cast %116 : vector<1x1x8xf32> to vector<1x8xf32>
    %118 = vector.broadcast %117 : vector<1x8xf32> to vector<16x8xf32>
    %119 = arith.addf %115, %118 : vector<16x8xf32>
    %cst_88 = arith.constant dense<0.000000e+00> : vector<16x16xf32>
    %120 = tpu.matmul %105, %112, %cst_88 {dimension_numbers = #tpu.dot_dimension_numbers<[1], [1], [0], [0], [0, 0, 1, 0], [], []>} : vector<16x8xf32>, vector<16x8xf32>, vector<16x16xf32> -> vector<16x16xf32>
    %121 = arith.addf %120, %0 : vector<16x16xf32>
    %cst_89 = arith.constant dense<0xFF800000> : vector<16xf32>
    %122 = vector.multi_reduction <maximumf>, %121, %cst_89 [1] : vector<16x16xf32> to vector<16xf32>
    %123 = vector.shape_cast %122 : vector<16xf32> to vector<16x1xf32>
    %124 = vector.broadcast %123 : vector<16x1xf32> to vector<16x16xf32>
    %125 = arith.subf %121, %124 : vector<16x16xf32>
    %126 = math.exp %125 : vector<16x16xf32>
    %cst_90 = arith.constant dense<0.000000e+00> : vector<16xf32>
    %127 = vector.multi_reduction <add>, %126, %cst_90 [1] : vector<16x16xf32> to vector<16xf32>
    %128 = vector.shape_cast %127 : vector<16xf32> to vector<16x1xf32>
    %129 = tpu.reciprocal %128 {approx = true} : vector<16x1xf32> -> vector<16x1xf32>
    %130 = vector.broadcast %129 : vector<16x1xf32> to vector<16x16xf32>
    %131 = arith.mulf %126, %130 : vector<16x16xf32>
    %cst_91 = arith.constant dense<0.000000e+00> : vector<16x8xf32>
    %132 = tpu.matmul %131, %119, %cst_91 {dimension_numbers = #tpu.dot_dimension_numbers<[1], [0], [0], [1], [0, 0, 1, 1], [], []>} : vector<16x16xf32>, vector<16x8xf32>, vector<16x8xf32> -> vector<16x8xf32>
    %c2_92 = arith.constant 2 : index
    %c0_93 = arith.constant 0 : index
    %c0_94 = arith.constant 0 : index
    %133 = vector.load %arg10[%c2_92, %c0_93, %c0_94] : memref<8x8x32xf32, #tpu.memory_space<vmem>>, vector<1x8x32xf32>
    %134 = vector.shape_cast %133 : vector<1x8x32xf32> to vector<8x32xf32>
    %cst_95 = arith.constant dense<0.000000e+00> : vector<16x32xf32>
    %135 = tpu.matmul %132, %134, %cst_95 {dimension_numbers = #tpu.dot_dimension_numbers<[1], [0], [0], [1], [0, 0, 1, 1], [], []>} : vector<16x8xf32>, vector<8x32xf32>, vector<16x32xf32> -> vector<16x32xf32>
    %136 = arith.addf %98, %135 : vector<16x32xf32>
    %c3 = arith.constant 3 : index
    %c0_96 = arith.constant 0 : index
    %c0_97 = arith.constant 0 : index
    %137 = vector.load %arg4[%c3, %c0_96, %c0_97] : memref<8x32x8xf32, #tpu.memory_space<vmem>>, vector<1x32x8xf32>
    %138 = vector.shape_cast %137 : vector<1x32x8xf32> to vector<32x8xf32>
    %cst_98 = arith.constant dense<0.000000e+00> : vector<16x8xf32>
    %139 = tpu.matmul %23, %138, %cst_98 {dimension_numbers = #tpu.dot_dimension_numbers<[1], [0], [0], [1], [0, 0, 1, 1], [], []>} : vector<16x32xf32>, vector<32x8xf32>, vector<16x8xf32> -> vector<16x8xf32>
    %c3_99 = arith.constant 3 : index
    %c0_100 = arith.constant 0 : index
    %c0_101 = arith.constant 0 : index
    %140 = vector.load %arg7[%c3_99, %c0_100, %c0_101] : memref<8x1x8xf32, #tpu.memory_space<vmem>>, vector<1x1x8xf32>
    %141 = vector.shape_cast %140 : vector<1x1x8xf32> to vector<1x8xf32>
    %142 = vector.broadcast %141 : vector<1x8xf32> to vector<16x8xf32>
    %143 = arith.addf %139, %142 : vector<16x8xf32>
    %c3_102 = arith.constant 3 : index
    %c0_103 = arith.constant 0 : index
    %c0_104 = arith.constant 0 : index
    %144 = vector.load %arg5[%c3_102, %c0_103, %c0_104] : memref<8x32x8xf32, #tpu.memory_space<vmem>>, vector<1x32x8xf32>
    %145 = vector.shape_cast %144 : vector<1x32x8xf32> to vector<32x8xf32>
    %cst_105 = arith.constant dense<0.000000e+00> : vector<16x8xf32>
    %146 = tpu.matmul %23, %145, %cst_105 {dimension_numbers = #tpu.dot_dimension_numbers<[1], [0], [0], [1], [0, 0, 1, 1], [], []>} : vector<16x32xf32>, vector<32x8xf32>, vector<16x8xf32> -> vector<16x8xf32>
    %c3_106 = arith.constant 3 : index
    %c0_107 = arith.constant 0 : index
    %c0_108 = arith.constant 0 : index
    %147 = vector.load %arg8[%c3_106, %c0_107, %c0_108] : memref<8x1x8xf32, #tpu.memory_space<vmem>>, vector<1x1x8xf32>
    %148 = vector.shape_cast %147 : vector<1x1x8xf32> to vector<1x8xf32>
    %149 = vector.broadcast %148 : vector<1x8xf32> to vector<16x8xf32>
    %150 = arith.addf %146, %149 : vector<16x8xf32>
    %c3_109 = arith.constant 3 : index
    %c0_110 = arith.constant 0 : index
    %c0_111 = arith.constant 0 : index
    %151 = vector.load %arg6[%c3_109, %c0_110, %c0_111] : memref<8x32x8xf32, #tpu.memory_space<vmem>>, vector<1x32x8xf32>
    %152 = vector.shape_cast %151 : vector<1x32x8xf32> to vector<32x8xf32>
    %cst_112 = arith.constant dense<0.000000e+00> : vector<16x8xf32>
    %153 = tpu.matmul %23, %152, %cst_112 {dimension_numbers = #tpu.dot_dimension_numbers<[1], [0], [0], [1], [0, 0, 1, 1], [], []>} : vector<16x32xf32>, vector<32x8xf32>, vector<16x8xf32> -> vector<16x8xf32>
    %c3_113 = arith.constant 3 : index
    %c0_114 = arith.constant 0 : index
    %c0_115 = arith.constant 0 : index
    %154 = vector.load %arg9[%c3_113, %c0_114, %c0_115] : memref<8x1x8xf32, #tpu.memory_space<vmem>>, vector<1x1x8xf32>
    %155 = vector.shape_cast %154 : vector<1x1x8xf32> to vector<1x8xf32>
    %156 = vector.broadcast %155 : vector<1x8xf32> to vector<16x8xf32>
    %157 = arith.addf %153, %156 : vector<16x8xf32>
    %cst_116 = arith.constant dense<0.000000e+00> : vector<16x16xf32>
    %158 = tpu.matmul %143, %150, %cst_116 {dimension_numbers = #tpu.dot_dimension_numbers<[1], [1], [0], [0], [0, 0, 1, 0], [], []>} : vector<16x8xf32>, vector<16x8xf32>, vector<16x16xf32> -> vector<16x16xf32>
    %159 = arith.addf %158, %0 : vector<16x16xf32>
    %cst_117 = arith.constant dense<0xFF800000> : vector<16xf32>
    %160 = vector.multi_reduction <maximumf>, %159, %cst_117 [1] : vector<16x16xf32> to vector<16xf32>
    %161 = vector.shape_cast %160 : vector<16xf32> to vector<16x1xf32>
    %162 = vector.broadcast %161 : vector<16x1xf32> to vector<16x16xf32>
    %163 = arith.subf %159, %162 : vector<16x16xf32>
    %164 = math.exp %163 : vector<16x16xf32>
    %cst_118 = arith.constant dense<0.000000e+00> : vector<16xf32>
    %165 = vector.multi_reduction <add>, %164, %cst_118 [1] : vector<16x16xf32> to vector<16xf32>
    %166 = vector.shape_cast %165 : vector<16xf32> to vector<16x1xf32>
    %167 = tpu.reciprocal %166 {approx = true} : vector<16x1xf32> -> vector<16x1xf32>
    %168 = vector.broadcast %167 : vector<16x1xf32> to vector<16x16xf32>
    %169 = arith.mulf %164, %168 : vector<16x16xf32>
    %cst_119 = arith.constant dense<0.000000e+00> : vector<16x8xf32>
    %170 = tpu.matmul %169, %157, %cst_119 {dimension_numbers = #tpu.dot_dimension_numbers<[1], [0], [0], [1], [0, 0, 1, 1], [], []>} : vector<16x16xf32>, vector<16x8xf32>, vector<16x8xf32> -> vector<16x8xf32>
    %c3_120 = arith.constant 3 : index
    %c0_121 = arith.constant 0 : index
    %c0_122 = arith.constant 0 : index
    %171 = vector.load %arg10[%c3_120, %c0_121, %c0_122] : memref<8x8x32xf32, #tpu.memory_space<vmem>>, vector<1x8x32xf32>
    %172 = vector.shape_cast %171 : vector<1x8x32xf32> to vector<8x32xf32>
    %cst_123 = arith.constant dense<0.000000e+00> : vector<16x32xf32>
    %173 = tpu.matmul %170, %172, %cst_123 {dimension_numbers = #tpu.dot_dimension_numbers<[1], [0], [0], [1], [0, 0, 1, 1], [], []>} : vector<16x8xf32>, vector<8x32xf32>, vector<16x32xf32> -> vector<16x32xf32>
    %174 = arith.addf %136, %173 : vector<16x32xf32>
    %c0_124 = arith.constant 0 : index
    %c0_125 = arith.constant 0 : index
    %c0_126 = arith.constant 0 : index
    %175 = vector.load %arg11[%c0_124, %c0_125, %c0_126] : memref<2x1x32xf32, #tpu.memory_space<vmem>>, vector<1x1x32xf32>
    %176 = vector.shape_cast %175 : vector<1x1x32xf32> to vector<1x32xf32>
    %177 = vector.broadcast %176 : vector<1x32xf32> to vector<16x32xf32>
    %178 = arith.addf %174, %177 : vector<16x32xf32>
    %179 = arith.addf %178, %23 : vector<16x32xf32>
    %c0_127 = arith.constant 0 : index
    %c0_128 = arith.constant 0 : index
    %c0_129 = arith.constant 0 : index
    %180 = vector.load %arg12[%c0_127, %c0_128, %c0_129] : memref<2x1x32xf32, #tpu.memory_space<vmem>>, vector<1x1x32xf32>
    %181 = vector.shape_cast %180 : vector<1x1x32xf32> to vector<1x32xf32>
    %c0_130 = arith.constant 0 : index
    %c0_131 = arith.constant 0 : index
    %c0_132 = arith.constant 0 : index
    %182 = vector.load %arg13[%c0_130, %c0_131, %c0_132] : memref<2x1x32xf32, #tpu.memory_space<vmem>>, vector<1x1x32xf32>
    %183 = vector.shape_cast %182 : vector<1x1x32xf32> to vector<1x32xf32>
    %cst_133 = arith.constant dense<0.000000e+00> : vector<16xf32>
    %184 = vector.multi_reduction <add>, %179, %cst_133 [1] : vector<16x32xf32> to vector<16xf32>
    %185 = vector.shape_cast %184 : vector<16xf32> to vector<16x1xf32>
    %cst_134 = arith.constant 3.200000e+01 : f32
    %186 = vector.broadcast %cst_134 : f32 to vector<16x1xf32>
    %187 = arith.divf %185, %186 : vector<16x1xf32>
    %188 = vector.broadcast %187 : vector<16x1xf32> to vector<16x32xf32>
    %189 = arith.subf %179, %188 : vector<16x32xf32>
    %190 = arith.mulf %189, %189 : vector<16x32xf32>
    %cst_135 = arith.constant dense<0.000000e+00> : vector<16xf32>
    %191 = vector.multi_reduction <add>, %190, %cst_135 [1] : vector<16x32xf32> to vector<16xf32>
    %192 = vector.shape_cast %191 : vector<16xf32> to vector<16x1xf32>
    %cst_136 = arith.constant 3.200000e+01 : f32
    %193 = vector.broadcast %cst_136 : f32 to vector<16x1xf32>
    %194 = arith.divf %192, %193 : vector<16x1xf32>
    %cst_137 = arith.constant 9.99999996E-13 : f32
    %195 = vector.broadcast %cst_137 : f32 to vector<16x1xf32>
    %196 = arith.addf %194, %195 : vector<16x1xf32>
    %197 = math.rsqrt %196 : vector<16x1xf32>
    %198 = vector.broadcast %197 : vector<16x1xf32> to vector<16x32xf32>
    %199 = arith.mulf %189, %198 : vector<16x32xf32>
    %200 = vector.broadcast %181 : vector<1x32xf32> to vector<16x32xf32>
    %201 = arith.mulf %199, %200 : vector<16x32xf32>
    %202 = vector.broadcast %183 : vector<1x32xf32> to vector<16x32xf32>
    %203 = arith.addf %201, %202 : vector<16x32xf32>
    %c0_138 = arith.constant 0 : index
    %c0_139 = arith.constant 0 : index
    %c0_140 = arith.constant 0 : index
    %204 = vector.load %arg14[%c0_138, %c0_139, %c0_140] : memref<2x32x64xf32, #tpu.memory_space<vmem>>, vector<1x32x64xf32>
    %205 = vector.shape_cast %204 : vector<1x32x64xf32> to vector<32x64xf32>
    %cst_141 = arith.constant dense<0.000000e+00> : vector<16x64xf32>
    %206 = tpu.matmul %203, %205, %cst_141 {dimension_numbers = #tpu.dot_dimension_numbers<[1], [0], [0], [1], [0, 0, 1, 1], [], []>} : vector<16x32xf32>, vector<32x64xf32>, vector<16x64xf32> -> vector<16x64xf32>
    %c0_142 = arith.constant 0 : index
    %c0_143 = arith.constant 0 : index
    %c0_144 = arith.constant 0 : index
    %207 = vector.load %arg15[%c0_142, %c0_143, %c0_144] : memref<2x1x64xf32, #tpu.memory_space<vmem>>, vector<1x1x64xf32>
    %208 = vector.shape_cast %207 : vector<1x1x64xf32> to vector<1x64xf32>
    %209 = vector.broadcast %208 : vector<1x64xf32> to vector<16x64xf32>
    %210 = arith.addf %206, %209 : vector<16x64xf32>
    %cst_145 = arith.constant 5.000000e-01 : f32
    %211 = vector.broadcast %cst_145 : f32 to vector<16x64xf32>
    %212 = arith.mulf %211, %210 : vector<16x64xf32>
    %cst_146 = arith.constant 0.707106769 : f32
    %213 = vector.broadcast %cst_146 : f32 to vector<16x64xf32>
    %214 = arith.mulf %210, %213 : vector<16x64xf32>
    %215 = math.erf %214 : vector<16x64xf32>
    %cst_147 = arith.constant 1.000000e+00 : f32
    %216 = vector.broadcast %cst_147 : f32 to vector<16x64xf32>
    %217 = arith.addf %216, %215 : vector<16x64xf32>
    %218 = arith.mulf %212, %217 : vector<16x64xf32>
    %c0_148 = arith.constant 0 : index
    %c0_149 = arith.constant 0 : index
    %c0_150 = arith.constant 0 : index
    %219 = vector.load %arg16[%c0_148, %c0_149, %c0_150] : memref<2x64x32xf32, #tpu.memory_space<vmem>>, vector<1x64x32xf32>
    %220 = vector.shape_cast %219 : vector<1x64x32xf32> to vector<64x32xf32>
    %cst_151 = arith.constant dense<0.000000e+00> : vector<16x32xf32>
    %221 = tpu.matmul %218, %220, %cst_151 {dimension_numbers = #tpu.dot_dimension_numbers<[1], [0], [0], [1], [0, 0, 1, 1], [], []>} : vector<16x64xf32>, vector<64x32xf32>, vector<16x32xf32> -> vector<16x32xf32>
    %c0_152 = arith.constant 0 : index
    %c0_153 = arith.constant 0 : index
    %c0_154 = arith.constant 0 : index
    %222 = vector.load %arg17[%c0_152, %c0_153, %c0_154] : memref<2x1x32xf32, #tpu.memory_space<vmem>>, vector<1x1x32xf32>
    %223 = vector.shape_cast %222 : vector<1x1x32xf32> to vector<1x32xf32>
    %224 = vector.broadcast %223 : vector<1x32xf32> to vector<16x32xf32>
    %225 = arith.addf %221, %224 : vector<16x32xf32>
    %226 = arith.addf %225, %203 : vector<16x32xf32>
    %c0_155 = arith.constant 0 : index
    %c0_156 = arith.constant 0 : index
    %c0_157 = arith.constant 0 : index
    %227 = vector.load %arg18[%c0_155, %c0_156, %c0_157] : memref<2x1x32xf32, #tpu.memory_space<vmem>>, vector<1x1x32xf32>
    %228 = vector.shape_cast %227 : vector<1x1x32xf32> to vector<1x32xf32>
    %c0_158 = arith.constant 0 : index
    %c0_159 = arith.constant 0 : index
    %c0_160 = arith.constant 0 : index
    %229 = vector.load %arg19[%c0_158, %c0_159, %c0_160] : memref<2x1x32xf32, #tpu.memory_space<vmem>>, vector<1x1x32xf32>
    %230 = vector.shape_cast %229 : vector<1x1x32xf32> to vector<1x32xf32>
    %cst_161 = arith.constant dense<0.000000e+00> : vector<16xf32>
    %231 = vector.multi_reduction <add>, %226, %cst_161 [1] : vector<16x32xf32> to vector<16xf32>
    %232 = vector.shape_cast %231 : vector<16xf32> to vector<16x1xf32>
    %cst_162 = arith.constant 3.200000e+01 : f32
    %233 = vector.broadcast %cst_162 : f32 to vector<16x1xf32>
    %234 = arith.divf %232, %233 : vector<16x1xf32>
    %235 = vector.broadcast %234 : vector<16x1xf32> to vector<16x32xf32>
    %236 = arith.subf %226, %235 : vector<16x32xf32>
    %237 = arith.mulf %236, %236 : vector<16x32xf32>
    %cst_163 = arith.constant dense<0.000000e+00> : vector<16xf32>
    %238 = vector.multi_reduction <add>, %237, %cst_163 [1] : vector<16x32xf32> to vector<16xf32>
    %239 = vector.shape_cast %238 : vector<16xf32> to vector<16x1xf32>
    %cst_164 = arith.constant 3.200000e+01 : f32
    %240 = vector.broadcast %cst_164 : f32 to vector<16x1xf32>
    %241 = arith.divf %239, %240 : vector<16x1xf32>
    %cst_165 = arith.constant 9.99999996E-13 : f32
    %242 = vector.broadcast %cst_165 : f32 to vector<16x1xf32>
    %243 = arith.addf %241, %242 : vector<16x1xf32>
    %244 = math.rsqrt %243 : vector<16x1xf32>
    %245 = vector.broadcast %244 : vector<16x1xf32> to vector<16x32xf32>
    %246 = arith.mulf %236, %245 : vector<16x32xf32>
    %247 = vector.broadcast %228 : vector<1x32xf32> to vector<16x32xf32>
    %248 = arith.mulf %246, %247 : vector<16x32xf32>
    %249 = vector.broadcast %230 : vector<1x32xf32> to vector<16x32xf32>
    %250 = arith.addf %248, %249 : vector<16x32xf32>
    %c4 = arith.constant 4 : index
    %c0_166 = arith.constant 0 : index
    %c0_167 = arith.constant 0 : index
    %251 = vector.load %arg4[%c4, %c0_166, %c0_167] : memref<8x32x8xf32, #tpu.memory_space<vmem>>, vector<1x32x8xf32>
    %252 = vector.shape_cast %251 : vector<1x32x8xf32> to vector<32x8xf32>
    %cst_168 = arith.constant dense<0.000000e+00> : vector<16x8xf32>
    %253 = tpu.matmul %250, %252, %cst_168 {dimension_numbers = #tpu.dot_dimension_numbers<[1], [0], [0], [1], [0, 0, 1, 1], [], []>} : vector<16x32xf32>, vector<32x8xf32>, vector<16x8xf32> -> vector<16x8xf32>
    %c4_169 = arith.constant 4 : index
    %c0_170 = arith.constant 0 : index
    %c0_171 = arith.constant 0 : index
    %254 = vector.load %arg7[%c4_169, %c0_170, %c0_171] : memref<8x1x8xf32, #tpu.memory_space<vmem>>, vector<1x1x8xf32>
    %255 = vector.shape_cast %254 : vector<1x1x8xf32> to vector<1x8xf32>
    %256 = vector.broadcast %255 : vector<1x8xf32> to vector<16x8xf32>
    %257 = arith.addf %253, %256 : vector<16x8xf32>
    %c4_172 = arith.constant 4 : index
    %c0_173 = arith.constant 0 : index
    %c0_174 = arith.constant 0 : index
    %258 = vector.load %arg5[%c4_172, %c0_173, %c0_174] : memref<8x32x8xf32, #tpu.memory_space<vmem>>, vector<1x32x8xf32>
    %259 = vector.shape_cast %258 : vector<1x32x8xf32> to vector<32x8xf32>
    %cst_175 = arith.constant dense<0.000000e+00> : vector<16x8xf32>
    %260 = tpu.matmul %250, %259, %cst_175 {dimension_numbers = #tpu.dot_dimension_numbers<[1], [0], [0], [1], [0, 0, 1, 1], [], []>} : vector<16x32xf32>, vector<32x8xf32>, vector<16x8xf32> -> vector<16x8xf32>
    %c4_176 = arith.constant 4 : index
    %c0_177 = arith.constant 0 : index
    %c0_178 = arith.constant 0 : index
    %261 = vector.load %arg8[%c4_176, %c0_177, %c0_178] : memref<8x1x8xf32, #tpu.memory_space<vmem>>, vector<1x1x8xf32>
    %262 = vector.shape_cast %261 : vector<1x1x8xf32> to vector<1x8xf32>
    %263 = vector.broadcast %262 : vector<1x8xf32> to vector<16x8xf32>
    %264 = arith.addf %260, %263 : vector<16x8xf32>
    %c4_179 = arith.constant 4 : index
    %c0_180 = arith.constant 0 : index
    %c0_181 = arith.constant 0 : index
    %265 = vector.load %arg6[%c4_179, %c0_180, %c0_181] : memref<8x32x8xf32, #tpu.memory_space<vmem>>, vector<1x32x8xf32>
    %266 = vector.shape_cast %265 : vector<1x32x8xf32> to vector<32x8xf32>
    %cst_182 = arith.constant dense<0.000000e+00> : vector<16x8xf32>
    %267 = tpu.matmul %250, %266, %cst_182 {dimension_numbers = #tpu.dot_dimension_numbers<[1], [0], [0], [1], [0, 0, 1, 1], [], []>} : vector<16x32xf32>, vector<32x8xf32>, vector<16x8xf32> -> vector<16x8xf32>
    %c4_183 = arith.constant 4 : index
    %c0_184 = arith.constant 0 : index
    %c0_185 = arith.constant 0 : index
    %268 = vector.load %arg9[%c4_183, %c0_184, %c0_185] : memref<8x1x8xf32, #tpu.memory_space<vmem>>, vector<1x1x8xf32>
    %269 = vector.shape_cast %268 : vector<1x1x8xf32> to vector<1x8xf32>
    %270 = vector.broadcast %269 : vector<1x8xf32> to vector<16x8xf32>
    %271 = arith.addf %267, %270 : vector<16x8xf32>
    %cst_186 = arith.constant dense<0.000000e+00> : vector<16x16xf32>
    %272 = tpu.matmul %257, %264, %cst_186 {dimension_numbers = #tpu.dot_dimension_numbers<[1], [1], [0], [0], [0, 0, 1, 0], [], []>} : vector<16x8xf32>, vector<16x8xf32>, vector<16x16xf32> -> vector<16x16xf32>
    %273 = arith.addf %272, %0 : vector<16x16xf32>
    %cst_187 = arith.constant dense<0xFF800000> : vector<16xf32>
    %274 = vector.multi_reduction <maximumf>, %273, %cst_187 [1] : vector<16x16xf32> to vector<16xf32>
    %275 = vector.shape_cast %274 : vector<16xf32> to vector<16x1xf32>
    %276 = vector.broadcast %275 : vector<16x1xf32> to vector<16x16xf32>
    %277 = arith.subf %273, %276 : vector<16x16xf32>
    %278 = math.exp %277 : vector<16x16xf32>
    %cst_188 = arith.constant dense<0.000000e+00> : vector<16xf32>
    %279 = vector.multi_reduction <add>, %278, %cst_188 [1] : vector<16x16xf32> to vector<16xf32>
    %280 = vector.shape_cast %279 : vector<16xf32> to vector<16x1xf32>
    %281 = tpu.reciprocal %280 {approx = true} : vector<16x1xf32> -> vector<16x1xf32>
    %282 = vector.broadcast %281 : vector<16x1xf32> to vector<16x16xf32>
    %283 = arith.mulf %278, %282 : vector<16x16xf32>
    %cst_189 = arith.constant dense<0.000000e+00> : vector<16x8xf32>
    %284 = tpu.matmul %283, %271, %cst_189 {dimension_numbers = #tpu.dot_dimension_numbers<[1], [0], [0], [1], [0, 0, 1, 1], [], []>} : vector<16x16xf32>, vector<16x8xf32>, vector<16x8xf32> -> vector<16x8xf32>
    %c4_190 = arith.constant 4 : index
    %c0_191 = arith.constant 0 : index
    %c0_192 = arith.constant 0 : index
    %285 = vector.load %arg10[%c4_190, %c0_191, %c0_192] : memref<8x8x32xf32, #tpu.memory_space<vmem>>, vector<1x8x32xf32>
    %286 = vector.shape_cast %285 : vector<1x8x32xf32> to vector<8x32xf32>
    %cst_193 = arith.constant dense<0.000000e+00> : vector<16x32xf32>
    %287 = tpu.matmul %284, %286, %cst_193 {dimension_numbers = #tpu.dot_dimension_numbers<[1], [0], [0], [1], [0, 0, 1, 1], [], []>} : vector<16x8xf32>, vector<8x32xf32>, vector<16x32xf32> -> vector<16x32xf32>
    %c5 = arith.constant 5 : index
    %c0_194 = arith.constant 0 : index
    %c0_195 = arith.constant 0 : index
    %288 = vector.load %arg4[%c5, %c0_194, %c0_195] : memref<8x32x8xf32, #tpu.memory_space<vmem>>, vector<1x32x8xf32>
    %289 = vector.shape_cast %288 : vector<1x32x8xf32> to vector<32x8xf32>
    %cst_196 = arith.constant dense<0.000000e+00> : vector<16x8xf32>
    %290 = tpu.matmul %250, %289, %cst_196 {dimension_numbers = #tpu.dot_dimension_numbers<[1], [0], [0], [1], [0, 0, 1, 1], [], []>} : vector<16x32xf32>, vector<32x8xf32>, vector<16x8xf32> -> vector<16x8xf32>
    %c5_197 = arith.constant 5 : index
    %c0_198 = arith.constant 0 : index
    %c0_199 = arith.constant 0 : index
    %291 = vector.load %arg7[%c5_197, %c0_198, %c0_199] : memref<8x1x8xf32, #tpu.memory_space<vmem>>, vector<1x1x8xf32>
    %292 = vector.shape_cast %291 : vector<1x1x8xf32> to vector<1x8xf32>
    %293 = vector.broadcast %292 : vector<1x8xf32> to vector<16x8xf32>
    %294 = arith.addf %290, %293 : vector<16x8xf32>
    %c5_200 = arith.constant 5 : index
    %c0_201 = arith.constant 0 : index
    %c0_202 = arith.constant 0 : index
    %295 = vector.load %arg5[%c5_200, %c0_201, %c0_202] : memref<8x32x8xf32, #tpu.memory_space<vmem>>, vector<1x32x8xf32>
    %296 = vector.shape_cast %295 : vector<1x32x8xf32> to vector<32x8xf32>
    %cst_203 = arith.constant dense<0.000000e+00> : vector<16x8xf32>
    %297 = tpu.matmul %250, %296, %cst_203 {dimension_numbers = #tpu.dot_dimension_numbers<[1], [0], [0], [1], [0, 0, 1, 1], [], []>} : vector<16x32xf32>, vector<32x8xf32>, vector<16x8xf32> -> vector<16x8xf32>
    %c5_204 = arith.constant 5 : index
    %c0_205 = arith.constant 0 : index
    %c0_206 = arith.constant 0 : index
    %298 = vector.load %arg8[%c5_204, %c0_205, %c0_206] : memref<8x1x8xf32, #tpu.memory_space<vmem>>, vector<1x1x8xf32>
    %299 = vector.shape_cast %298 : vector<1x1x8xf32> to vector<1x8xf32>
    %300 = vector.broadcast %299 : vector<1x8xf32> to vector<16x8xf32>
    %301 = arith.addf %297, %300 : vector<16x8xf32>
    %c5_207 = arith.constant 5 : index
    %c0_208 = arith.constant 0 : index
    %c0_209 = arith.constant 0 : index
    %302 = vector.load %arg6[%c5_207, %c0_208, %c0_209] : memref<8x32x8xf32, #tpu.memory_space<vmem>>, vector<1x32x8xf32>
    %303 = vector.shape_cast %302 : vector<1x32x8xf32> to vector<32x8xf32>
    %cst_210 = arith.constant dense<0.000000e+00> : vector<16x8xf32>
    %304 = tpu.matmul %250, %303, %cst_210 {dimension_numbers = #tpu.dot_dimension_numbers<[1], [0], [0], [1], [0, 0, 1, 1], [], []>} : vector<16x32xf32>, vector<32x8xf32>, vector<16x8xf32> -> vector<16x8xf32>
    %c5_211 = arith.constant 5 : index
    %c0_212 = arith.constant 0 : index
    %c0_213 = arith.constant 0 : index
    %305 = vector.load %arg9[%c5_211, %c0_212, %c0_213] : memref<8x1x8xf32, #tpu.memory_space<vmem>>, vector<1x1x8xf32>
    %306 = vector.shape_cast %305 : vector<1x1x8xf32> to vector<1x8xf32>
    %307 = vector.broadcast %306 : vector<1x8xf32> to vector<16x8xf32>
    %308 = arith.addf %304, %307 : vector<16x8xf32>
    %cst_214 = arith.constant dense<0.000000e+00> : vector<16x16xf32>
    %309 = tpu.matmul %294, %301, %cst_214 {dimension_numbers = #tpu.dot_dimension_numbers<[1], [1], [0], [0], [0, 0, 1, 0], [], []>} : vector<16x8xf32>, vector<16x8xf32>, vector<16x16xf32> -> vector<16x16xf32>
    %310 = arith.addf %309, %0 : vector<16x16xf32>
    %cst_215 = arith.constant dense<0xFF800000> : vector<16xf32>
    %311 = vector.multi_reduction <maximumf>, %310, %cst_215 [1] : vector<16x16xf32> to vector<16xf32>
    %312 = vector.shape_cast %311 : vector<16xf32> to vector<16x1xf32>
    %313 = vector.broadcast %312 : vector<16x1xf32> to vector<16x16xf32>
    %314 = arith.subf %310, %313 : vector<16x16xf32>
    %315 = math.exp %314 : vector<16x16xf32>
    %cst_216 = arith.constant dense<0.000000e+00> : vector<16xf32>
    %316 = vector.multi_reduction <add>, %315, %cst_216 [1] : vector<16x16xf32> to vector<16xf32>
    %317 = vector.shape_cast %316 : vector<16xf32> to vector<16x1xf32>
    %318 = tpu.reciprocal %317 {approx = true} : vector<16x1xf32> -> vector<16x1xf32>
    %319 = vector.broadcast %318 : vector<16x1xf32> to vector<16x16xf32>
    %320 = arith.mulf %315, %319 : vector<16x16xf32>
    %cst_217 = arith.constant dense<0.000000e+00> : vector<16x8xf32>
    %321 = tpu.matmul %320, %308, %cst_217 {dimension_numbers = #tpu.dot_dimension_numbers<[1], [0], [0], [1], [0, 0, 1, 1], [], []>} : vector<16x16xf32>, vector<16x8xf32>, vector<16x8xf32> -> vector<16x8xf32>
    %c5_218 = arith.constant 5 : index
    %c0_219 = arith.constant 0 : index
    %c0_220 = arith.constant 0 : index
    %322 = vector.load %arg10[%c5_218, %c0_219, %c0_220] : memref<8x8x32xf32, #tpu.memory_space<vmem>>, vector<1x8x32xf32>
    %323 = vector.shape_cast %322 : vector<1x8x32xf32> to vector<8x32xf32>
    %cst_221 = arith.constant dense<0.000000e+00> : vector<16x32xf32>
    %324 = tpu.matmul %321, %323, %cst_221 {dimension_numbers = #tpu.dot_dimension_numbers<[1], [0], [0], [1], [0, 0, 1, 1], [], []>} : vector<16x8xf32>, vector<8x32xf32>, vector<16x32xf32> -> vector<16x32xf32>
    %325 = arith.addf %287, %324 : vector<16x32xf32>
    %c6 = arith.constant 6 : index
    %c0_222 = arith.constant 0 : index
    %c0_223 = arith.constant 0 : index
    %326 = vector.load %arg4[%c6, %c0_222, %c0_223] : memref<8x32x8xf32, #tpu.memory_space<vmem>>, vector<1x32x8xf32>
    %327 = vector.shape_cast %326 : vector<1x32x8xf32> to vector<32x8xf32>
    %cst_224 = arith.constant dense<0.000000e+00> : vector<16x8xf32>
    %328 = tpu.matmul %250, %327, %cst_224 {dimension_numbers = #tpu.dot_dimension_numbers<[1], [0], [0], [1], [0, 0, 1, 1], [], []>} : vector<16x32xf32>, vector<32x8xf32>, vector<16x8xf32> -> vector<16x8xf32>
    %c6_225 = arith.constant 6 : index
    %c0_226 = arith.constant 0 : index
    %c0_227 = arith.constant 0 : index
    %329 = vector.load %arg7[%c6_225, %c0_226, %c0_227] : memref<8x1x8xf32, #tpu.memory_space<vmem>>, vector<1x1x8xf32>
    %330 = vector.shape_cast %329 : vector<1x1x8xf32> to vector<1x8xf32>
    %331 = vector.broadcast %330 : vector<1x8xf32> to vector<16x8xf32>
    %332 = arith.addf %328, %331 : vector<16x8xf32>
    %c6_228 = arith.constant 6 : index
    %c0_229 = arith.constant 0 : index
    %c0_230 = arith.constant 0 : index
    %333 = vector.load %arg5[%c6_228, %c0_229, %c0_230] : memref<8x32x8xf32, #tpu.memory_space<vmem>>, vector<1x32x8xf32>
    %334 = vector.shape_cast %333 : vector<1x32x8xf32> to vector<32x8xf32>
    %cst_231 = arith.constant dense<0.000000e+00> : vector<16x8xf32>
    %335 = tpu.matmul %250, %334, %cst_231 {dimension_numbers = #tpu.dot_dimension_numbers<[1], [0], [0], [1], [0, 0, 1, 1], [], []>} : vector<16x32xf32>, vector<32x8xf32>, vector<16x8xf32> -> vector<16x8xf32>
    %c6_232 = arith.constant 6 : index
    %c0_233 = arith.constant 0 : index
    %c0_234 = arith.constant 0 : index
    %336 = vector.load %arg8[%c6_232, %c0_233, %c0_234] : memref<8x1x8xf32, #tpu.memory_space<vmem>>, vector<1x1x8xf32>
    %337 = vector.shape_cast %336 : vector<1x1x8xf32> to vector<1x8xf32>
    %338 = vector.broadcast %337 : vector<1x8xf32> to vector<16x8xf32>
    %339 = arith.addf %335, %338 : vector<16x8xf32>
    %c6_235 = arith.constant 6 : index
    %c0_236 = arith.constant 0 : index
    %c0_237 = arith.constant 0 : index
    %340 = vector.load %arg6[%c6_235, %c0_236, %c0_237] : memref<8x32x8xf32, #tpu.memory_space<vmem>>, vector<1x32x8xf32>
    %341 = vector.shape_cast %340 : vector<1x32x8xf32> to vector<32x8xf32>
    %cst_238 = arith.constant dense<0.000000e+00> : vector<16x8xf32>
    %342 = tpu.matmul %250, %341, %cst_238 {dimension_numbers = #tpu.dot_dimension_numbers<[1], [0], [0], [1], [0, 0, 1, 1], [], []>} : vector<16x32xf32>, vector<32x8xf32>, vector<16x8xf32> -> vector<16x8xf32>
    %c6_239 = arith.constant 6 : index
    %c0_240 = arith.constant 0 : index
    %c0_241 = arith.constant 0 : index
    %343 = vector.load %arg9[%c6_239, %c0_240, %c0_241] : memref<8x1x8xf32, #tpu.memory_space<vmem>>, vector<1x1x8xf32>
    %344 = vector.shape_cast %343 : vector<1x1x8xf32> to vector<1x8xf32>
    %345 = vector.broadcast %344 : vector<1x8xf32> to vector<16x8xf32>
    %346 = arith.addf %342, %345 : vector<16x8xf32>
    %cst_242 = arith.constant dense<0.000000e+00> : vector<16x16xf32>
    %347 = tpu.matmul %332, %339, %cst_242 {dimension_numbers = #tpu.dot_dimension_numbers<[1], [1], [0], [0], [0, 0, 1, 0], [], []>} : vector<16x8xf32>, vector<16x8xf32>, vector<16x16xf32> -> vector<16x16xf32>
    %348 = arith.addf %347, %0 : vector<16x16xf32>
    %cst_243 = arith.constant dense<0xFF800000> : vector<16xf32>
    %349 = vector.multi_reduction <maximumf>, %348, %cst_243 [1] : vector<16x16xf32> to vector<16xf32>
    %350 = vector.shape_cast %349 : vector<16xf32> to vector<16x1xf32>
    %351 = vector.broadcast %350 : vector<16x1xf32> to vector<16x16xf32>
    %352 = arith.subf %348, %351 : vector<16x16xf32>
    %353 = math.exp %352 : vector<16x16xf32>
    %cst_244 = arith.constant dense<0.000000e+00> : vector<16xf32>
    %354 = vector.multi_reduction <add>, %353, %cst_244 [1] : vector<16x16xf32> to vector<16xf32>
    %355 = vector.shape_cast %354 : vector<16xf32> to vector<16x1xf32>
    %356 = tpu.reciprocal %355 {approx = true} : vector<16x1xf32> -> vector<16x1xf32>
    %357 = vector.broadcast %356 : vector<16x1xf32> to vector<16x16xf32>
    %358 = arith.mulf %353, %357 : vector<16x16xf32>
    %cst_245 = arith.constant dense<0.000000e+00> : vector<16x8xf32>
    %359 = tpu.matmul %358, %346, %cst_245 {dimension_numbers = #tpu.dot_dimension_numbers<[1], [0], [0], [1], [0, 0, 1, 1], [], []>} : vector<16x16xf32>, vector<16x8xf32>, vector<16x8xf32> -> vector<16x8xf32>
    %c6_246 = arith.constant 6 : index
    %c0_247 = arith.constant 0 : index
    %c0_248 = arith.constant 0 : index
    %360 = vector.load %arg10[%c6_246, %c0_247, %c0_248] : memref<8x8x32xf32, #tpu.memory_space<vmem>>, vector<1x8x32xf32>
    %361 = vector.shape_cast %360 : vector<1x8x32xf32> to vector<8x32xf32>
    %cst_249 = arith.constant dense<0.000000e+00> : vector<16x32xf32>
    %362 = tpu.matmul %359, %361, %cst_249 {dimension_numbers = #tpu.dot_dimension_numbers<[1], [0], [0], [1], [0, 0, 1, 1], [], []>} : vector<16x8xf32>, vector<8x32xf32>, vector<16x32xf32> -> vector<16x32xf32>
    %363 = arith.addf %325, %362 : vector<16x32xf32>
    %c7 = arith.constant 7 : index
    %c0_250 = arith.constant 0 : index
    %c0_251 = arith.constant 0 : index
    %364 = vector.load %arg4[%c7, %c0_250, %c0_251] : memref<8x32x8xf32, #tpu.memory_space<vmem>>, vector<1x32x8xf32>
    %365 = vector.shape_cast %364 : vector<1x32x8xf32> to vector<32x8xf32>
    %cst_252 = arith.constant dense<0.000000e+00> : vector<16x8xf32>
    %366 = tpu.matmul %250, %365, %cst_252 {dimension_numbers = #tpu.dot_dimension_numbers<[1], [0], [0], [1], [0, 0, 1, 1], [], []>} : vector<16x32xf32>, vector<32x8xf32>, vector<16x8xf32> -> vector<16x8xf32>
    %c7_253 = arith.constant 7 : index
    %c0_254 = arith.constant 0 : index
    %c0_255 = arith.constant 0 : index
    %367 = vector.load %arg7[%c7_253, %c0_254, %c0_255] : memref<8x1x8xf32, #tpu.memory_space<vmem>>, vector<1x1x8xf32>
    %368 = vector.shape_cast %367 : vector<1x1x8xf32> to vector<1x8xf32>
    %369 = vector.broadcast %368 : vector<1x8xf32> to vector<16x8xf32>
    %370 = arith.addf %366, %369 : vector<16x8xf32>
    %c7_256 = arith.constant 7 : index
    %c0_257 = arith.constant 0 : index
    %c0_258 = arith.constant 0 : index
    %371 = vector.load %arg5[%c7_256, %c0_257, %c0_258] : memref<8x32x8xf32, #tpu.memory_space<vmem>>, vector<1x32x8xf32>
    %372 = vector.shape_cast %371 : vector<1x32x8xf32> to vector<32x8xf32>
    %cst_259 = arith.constant dense<0.000000e+00> : vector<16x8xf32>
    %373 = tpu.matmul %250, %372, %cst_259 {dimension_numbers = #tpu.dot_dimension_numbers<[1], [0], [0], [1], [0, 0, 1, 1], [], []>} : vector<16x32xf32>, vector<32x8xf32>, vector<16x8xf32> -> vector<16x8xf32>
    %c7_260 = arith.constant 7 : index
    %c0_261 = arith.constant 0 : index
    %c0_262 = arith.constant 0 : index
    %374 = vector.load %arg8[%c7_260, %c0_261, %c0_262] : memref<8x1x8xf32, #tpu.memory_space<vmem>>, vector<1x1x8xf32>
    %375 = vector.shape_cast %374 : vector<1x1x8xf32> to vector<1x8xf32>
    %376 = vector.broadcast %375 : vector<1x8xf32> to vector<16x8xf32>
    %377 = arith.addf %373, %376 : vector<16x8xf32>
    %c7_263 = arith.constant 7 : index
    %c0_264 = arith.constant 0 : index
    %c0_265 = arith.constant 0 : index
    %378 = vector.load %arg6[%c7_263, %c0_264, %c0_265] : memref<8x32x8xf32, #tpu.memory_space<vmem>>, vector<1x32x8xf32>
    %379 = vector.shape_cast %378 : vector<1x32x8xf32> to vector<32x8xf32>
    %cst_266 = arith.constant dense<0.000000e+00> : vector<16x8xf32>
    %380 = tpu.matmul %250, %379, %cst_266 {dimension_numbers = #tpu.dot_dimension_numbers<[1], [0], [0], [1], [0, 0, 1, 1], [], []>} : vector<16x32xf32>, vector<32x8xf32>, vector<16x8xf32> -> vector<16x8xf32>
    %c7_267 = arith.constant 7 : index
    %c0_268 = arith.constant 0 : index
    %c0_269 = arith.constant 0 : index
    %381 = vector.load %arg9[%c7_267, %c0_268, %c0_269] : memref<8x1x8xf32, #tpu.memory_space<vmem>>, vector<1x1x8xf32>
    %382 = vector.shape_cast %381 : vector<1x1x8xf32> to vector<1x8xf32>
    %383 = vector.broadcast %382 : vector<1x8xf32> to vector<16x8xf32>
    %384 = arith.addf %380, %383 : vector<16x8xf32>
    %cst_270 = arith.constant dense<0.000000e+00> : vector<16x16xf32>
    %385 = tpu.matmul %370, %377, %cst_270 {dimension_numbers = #tpu.dot_dimension_numbers<[1], [1], [0], [0], [0, 0, 1, 0], [], []>} : vector<16x8xf32>, vector<16x8xf32>, vector<16x16xf32> -> vector<16x16xf32>
    %386 = arith.addf %385, %0 : vector<16x16xf32>
    %cst_271 = arith.constant dense<0xFF800000> : vector<16xf32>
    %387 = vector.multi_reduction <maximumf>, %386, %cst_271 [1] : vector<16x16xf32> to vector<16xf32>
    %388 = vector.shape_cast %387 : vector<16xf32> to vector<16x1xf32>
    %389 = vector.broadcast %388 : vector<16x1xf32> to vector<16x16xf32>
    %390 = arith.subf %386, %389 : vector<16x16xf32>
    %391 = math.exp %390 : vector<16x16xf32>
    %cst_272 = arith.constant dense<0.000000e+00> : vector<16xf32>
    %392 = vector.multi_reduction <add>, %391, %cst_272 [1] : vector<16x16xf32> to vector<16xf32>
    %393 = vector.shape_cast %392 : vector<16xf32> to vector<16x1xf32>
    %394 = tpu.reciprocal %393 {approx = true} : vector<16x1xf32> -> vector<16x1xf32>
    %395 = vector.broadcast %394 : vector<16x1xf32> to vector<16x16xf32>
    %396 = arith.mulf %391, %395 : vector<16x16xf32>
    %cst_273 = arith.constant dense<0.000000e+00> : vector<16x8xf32>
    %397 = tpu.matmul %396, %384, %cst_273 {dimension_numbers = #tpu.dot_dimension_numbers<[1], [0], [0], [1], [0, 0, 1, 1], [], []>} : vector<16x16xf32>, vector<16x8xf32>, vector<16x8xf32> -> vector<16x8xf32>
    %c7_274 = arith.constant 7 : index
    %c0_275 = arith.constant 0 : index
    %c0_276 = arith.constant 0 : index
    %398 = vector.load %arg10[%c7_274, %c0_275, %c0_276] : memref<8x8x32xf32, #tpu.memory_space<vmem>>, vector<1x8x32xf32>
    %399 = vector.shape_cast %398 : vector<1x8x32xf32> to vector<8x32xf32>
    %cst_277 = arith.constant dense<0.000000e+00> : vector<16x32xf32>
    %400 = tpu.matmul %397, %399, %cst_277 {dimension_numbers = #tpu.dot_dimension_numbers<[1], [0], [0], [1], [0, 0, 1, 1], [], []>} : vector<16x8xf32>, vector<8x32xf32>, vector<16x32xf32> -> vector<16x32xf32>
    %401 = arith.addf %363, %400 : vector<16x32xf32>
    %c1_278 = arith.constant 1 : index
    %c0_279 = arith.constant 0 : index
    %c0_280 = arith.constant 0 : index
    %402 = vector.load %arg11[%c1_278, %c0_279, %c0_280] : memref<2x1x32xf32, #tpu.memory_space<vmem>>, vector<1x1x32xf32>
    %403 = vector.shape_cast %402 : vector<1x1x32xf32> to vector<1x32xf32>
    %404 = vector.broadcast %403 : vector<1x32xf32> to vector<16x32xf32>
    %405 = arith.addf %401, %404 : vector<16x32xf32>
    %406 = arith.addf %405, %250 : vector<16x32xf32>
    %c1_281 = arith.constant 1 : index
    %c0_282 = arith.constant 0 : index
    %c0_283 = arith.constant 0 : index
    %407 = vector.load %arg12[%c1_281, %c0_282, %c0_283] : memref<2x1x32xf32, #tpu.memory_space<vmem>>, vector<1x1x32xf32>
    %408 = vector.shape_cast %407 : vector<1x1x32xf32> to vector<1x32xf32>
    %c1_284 = arith.constant 1 : index
    %c0_285 = arith.constant 0 : index
    %c0_286 = arith.constant 0 : index
    %409 = vector.load %arg13[%c1_284, %c0_285, %c0_286] : memref<2x1x32xf32, #tpu.memory_space<vmem>>, vector<1x1x32xf32>
    %410 = vector.shape_cast %409 : vector<1x1x32xf32> to vector<1x32xf32>
    %cst_287 = arith.constant dense<0.000000e+00> : vector<16xf32>
    %411 = vector.multi_reduction <add>, %406, %cst_287 [1] : vector<16x32xf32> to vector<16xf32>
    %412 = vector.shape_cast %411 : vector<16xf32> to vector<16x1xf32>
    %cst_288 = arith.constant 3.200000e+01 : f32
    %413 = vector.broadcast %cst_288 : f32 to vector<16x1xf32>
    %414 = arith.divf %412, %413 : vector<16x1xf32>
    %415 = vector.broadcast %414 : vector<16x1xf32> to vector<16x32xf32>
    %416 = arith.subf %406, %415 : vector<16x32xf32>
    %417 = arith.mulf %416, %416 : vector<16x32xf32>
    %cst_289 = arith.constant dense<0.000000e+00> : vector<16xf32>
    %418 = vector.multi_reduction <add>, %417, %cst_289 [1] : vector<16x32xf32> to vector<16xf32>
    %419 = vector.shape_cast %418 : vector<16xf32> to vector<16x1xf32>
    %cst_290 = arith.constant 3.200000e+01 : f32
    %420 = vector.broadcast %cst_290 : f32 to vector<16x1xf32>
    %421 = arith.divf %419, %420 : vector<16x1xf32>
    %cst_291 = arith.constant 9.99999996E-13 : f32
    %422 = vector.broadcast %cst_291 : f32 to vector<16x1xf32>
    %423 = arith.addf %421, %422 : vector<16x1xf32>
    %424 = math.rsqrt %423 : vector<16x1xf32>
    %425 = vector.broadcast %424 : vector<16x1xf32> to vector<16x32xf32>
    %426 = arith.mulf %416, %425 : vector<16x32xf32>
    %427 = vector.broadcast %408 : vector<1x32xf32> to vector<16x32xf32>
    %428 = arith.mulf %426, %427 : vector<16x32xf32>
    %429 = vector.broadcast %410 : vector<1x32xf32> to vector<16x32xf32>
    %430 = arith.addf %428, %429 : vector<16x32xf32>
    %c1_292 = arith.constant 1 : index
    %c0_293 = arith.constant 0 : index
    %c0_294 = arith.constant 0 : index
    %431 = vector.load %arg14[%c1_292, %c0_293, %c0_294] : memref<2x32x64xf32, #tpu.memory_space<vmem>>, vector<1x32x64xf32>
    %432 = vector.shape_cast %431 : vector<1x32x64xf32> to vector<32x64xf32>
    %cst_295 = arith.constant dense<0.000000e+00> : vector<16x64xf32>
    %433 = tpu.matmul %430, %432, %cst_295 {dimension_numbers = #tpu.dot_dimension_numbers<[1], [0], [0], [1], [0, 0, 1, 1], [], []>} : vector<16x32xf32>, vector<32x64xf32>, vector<16x64xf32> -> vector<16x64xf32>
    %c1_296 = arith.constant 1 : index
    %c0_297 = arith.constant 0 : index
    %c0_298 = arith.constant 0 : index
    %434 = vector.load %arg15[%c1_296, %c0_297, %c0_298] : memref<2x1x64xf32, #tpu.memory_space<vmem>>, vector<1x1x64xf32>
    %435 = vector.shape_cast %434 : vector<1x1x64xf32> to vector<1x64xf32>
    %436 = vector.broadcast %435 : vector<1x64xf32> to vector<16x64xf32>
    %437 = arith.addf %433, %436 : vector<16x64xf32>
    %cst_299 = arith.constant 5.000000e-01 : f32
    %438 = vector.broadcast %cst_299 : f32 to vector<16x64xf32>
    %439 = arith.mulf %438, %437 : vector<16x64xf32>
    %cst_300 = arith.constant 0.707106769 : f32
    %440 = vector.broadcast %cst_300 : f32 to vector<16x64xf32>
    %441 = arith.mulf %437, %440 : vector<16x64xf32>
    %442 = math.erf %441 : vector<16x64xf32>
    %cst_301 = arith.constant 1.000000e+00 : f32
    %443 = vector.broadcast %cst_301 : f32 to vector<16x64xf32>
    %444 = arith.addf %443, %442 : vector<16x64xf32>
    %445 = arith.mulf %439, %444 : vector<16x64xf32>
    %c1_302 = arith.constant 1 : index
    %c0_303 = arith.constant 0 : index
    %c0_304 = arith.constant 0 : index
    %446 = vector.load %arg16[%c1_302, %c0_303, %c0_304] : memref<2x64x32xf32, #tpu.memory_space<vmem>>, vector<1x64x32xf32>
    %447 = vector.shape_cast %446 : vector<1x64x32xf32> to vector<64x32xf32>
    %cst_305 = arith.constant dense<0.000000e+00> : vector<16x32xf32>
    %448 = tpu.matmul %445, %447, %cst_305 {dimension_numbers = #tpu.dot_dimension_numbers<[1], [0], [0], [1], [0, 0, 1, 1], [], []>} : vector<16x64xf32>, vector<64x32xf32>, vector<16x32xf32> -> vector<16x32xf32>
    %c1_306 = arith.constant 1 : index
    %c0_307 = arith.constant 0 : index
    %c0_308 = arith.constant 0 : index
    %449 = vector.load %arg17[%c1_306, %c0_307, %c0_308] : memref<2x1x32xf32, #tpu.memory_space<vmem>>, vector<1x1x32xf32>
    %450 = vector.shape_cast %449 : vector<1x1x32xf32> to vector<1x32xf32>
    %451 = vector.broadcast %450 : vector<1x32xf32> to vector<16x32xf32>
    %452 = arith.addf %448, %451 : vector<16x32xf32>
    %453 = arith.addf %452, %430 : vector<16x32xf32>
    %c1_309 = arith.constant 1 : index
    %c0_310 = arith.constant 0 : index
    %c0_311 = arith.constant 0 : index
    %454 = vector.load %arg18[%c1_309, %c0_310, %c0_311] : memref<2x1x32xf32, #tpu.memory_space<vmem>>, vector<1x1x32xf32>
    %455 = vector.shape_cast %454 : vector<1x1x32xf32> to vector<1x32xf32>
    %c1_312 = arith.constant 1 : index
    %c0_313 = arith.constant 0 : index
    %c0_314 = arith.constant 0 : index
    %456 = vector.load %arg19[%c1_312, %c0_313, %c0_314] : memref<2x1x32xf32, #tpu.memory_space<vmem>>, vector<1x1x32xf32>
    %457 = vector.shape_cast %456 : vector<1x1x32xf32> to vector<1x32xf32>
    %cst_315 = arith.constant dense<0.000000e+00> : vector<16xf32>
    %458 = vector.multi_reduction <add>, %453, %cst_315 [1] : vector<16x32xf32> to vector<16xf32>
    %459 = vector.shape_cast %458 : vector<16xf32> to vector<16x1xf32>
    %cst_316 = arith.constant 3.200000e+01 : f32
    %460 = vector.broadcast %cst_316 : f32 to vector<16x1xf32>
    %461 = arith.divf %459, %460 : vector<16x1xf32>
    %462 = vector.broadcast %461 : vector<16x1xf32> to vector<16x32xf32>
    %463 = arith.subf %453, %462 : vector<16x32xf32>
    %464 = arith.mulf %463, %463 : vector<16x32xf32>
    %cst_317 = arith.constant dense<0.000000e+00> : vector<16xf32>
    %465 = vector.multi_reduction <add>, %464, %cst_317 [1] : vector<16x32xf32> to vector<16xf32>
    %466 = vector.shape_cast %465 : vector<16xf32> to vector<16x1xf32>
    %cst_318 = arith.constant 3.200000e+01 : f32
    %467 = vector.broadcast %cst_318 : f32 to vector<16x1xf32>
    %468 = arith.divf %466, %467 : vector<16x1xf32>
    %cst_319 = arith.constant 9.99999996E-13 : f32
    %469 = vector.broadcast %cst_319 : f32 to vector<16x1xf32>
    %470 = arith.addf %468, %469 : vector<16x1xf32>
    %471 = math.rsqrt %470 : vector<16x1xf32>
    %472 = vector.broadcast %471 : vector<16x1xf32> to vector<16x32xf32>
    %473 = arith.mulf %463, %472 : vector<16x32xf32>
    %474 = vector.broadcast %455 : vector<1x32xf32> to vector<16x32xf32>
    %475 = arith.mulf %473, %474 : vector<16x32xf32>
    %476 = vector.broadcast %457 : vector<1x32xf32> to vector<16x32xf32>
    %477 = arith.addf %475, %476 : vector<16x32xf32>
    %c0_320 = arith.constant 0 : index
    %c0_321 = arith.constant 0 : index
    %478 = vector.load %arg20[%c0_320, %c0_321] : memref<32x32xf32, #tpu.memory_space<vmem>>, vector<32x32xf32>
    %cst_322 = arith.constant dense<0.000000e+00> : vector<16x32xf32>
    %479 = tpu.matmul %477, %478, %cst_322 {dimension_numbers = #tpu.dot_dimension_numbers<[1], [0], [0], [1], [0, 0, 1, 1], [], []>} : vector<16x32xf32>, vector<32x32xf32>, vector<16x32xf32> -> vector<16x32xf32>
    %c0_323 = arith.constant 0 : index
    %c0_324 = arith.constant 0 : index
    %480 = vector.load %arg21[%c0_323, %c0_324] : memref<1x32xf32, #tpu.memory_space<vmem>>, vector<1x32xf32>
    %481 = vector.broadcast %480 : vector<1x32xf32> to vector<16x32xf32>
    %482 = arith.addf %479, %481 : vector<16x32xf32>
    %cst_325 = arith.constant 5.000000e-01 : f32
    %483 = vector.broadcast %cst_325 : f32 to vector<16x32xf32>
    %484 = arith.mulf %483, %482 : vector<16x32xf32>
    %cst_326 = arith.constant 0.707106769 : f32
    %485 = vector.broadcast %cst_326 : f32 to vector<16x32xf32>
    %486 = arith.mulf %482, %485 : vector<16x32xf32>
    %487 = math.erf %486 : vector<16x32xf32>
    %cst_327 = arith.constant 1.000000e+00 : f32
    %488 = vector.broadcast %cst_327 : f32 to vector<16x32xf32>
    %489 = arith.addf %488, %487 : vector<16x32xf32>
    %490 = arith.mulf %484, %489 : vector<16x32xf32>
    %c0_328 = arith.constant 0 : index
    %c0_329 = arith.constant 0 : index
    %491 = vector.load %arg22[%c0_328, %c0_329] : memref<1x32xf32, #tpu.memory_space<vmem>>, vector<1x32xf32>
    %c0_330 = arith.constant 0 : index
    %c0_331 = arith.constant 0 : index
    %492 = vector.load %arg23[%c0_330, %c0_331] : memref<1x32xf32, #tpu.memory_space<vmem>>, vector<1x32xf32>
    %cst_332 = arith.constant dense<0.000000e+00> : vector<16xf32>
    %493 = vector.multi_reduction <add>, %490, %cst_332 [1] : vector<16x32xf32> to vector<16xf32>
    %494 = vector.shape_cast %493 : vector<16xf32> to vector<16x1xf32>
    %cst_333 = arith.constant 3.200000e+01 : f32
    %495 = vector.broadcast %cst_333 : f32 to vector<16x1xf32>
    %496 = arith.divf %494, %495 : vector<16x1xf32>
    %497 = vector.broadcast %496 : vector<16x1xf32> to vector<16x32xf32>
    %498 = arith.subf %490, %497 : vector<16x32xf32>
    %499 = arith.mulf %498, %498 : vector<16x32xf32>
    %cst_334 = arith.constant dense<0.000000e+00> : vector<16xf32>
    %500 = vector.multi_reduction <add>, %499, %cst_334 [1] : vector<16x32xf32> to vector<16xf32>
    %501 = vector.shape_cast %500 : vector<16xf32> to vector<16x1xf32>
    %cst_335 = arith.constant 3.200000e+01 : f32
    %502 = vector.broadcast %cst_335 : f32 to vector<16x1xf32>
    %503 = arith.divf %501, %502 : vector<16x1xf32>
    %cst_336 = arith.constant 9.99999996E-13 : f32
    %504 = vector.broadcast %cst_336 : f32 to vector<16x1xf32>
    %505 = arith.addf %503, %504 : vector<16x1xf32>
    %506 = math.rsqrt %505 : vector<16x1xf32>
    %507 = vector.broadcast %506 : vector<16x1xf32> to vector<16x32xf32>
    %508 = arith.mulf %498, %507 : vector<16x32xf32>
    %509 = vector.broadcast %491 : vector<1x32xf32> to vector<16x32xf32>
    %510 = arith.mulf %508, %509 : vector<16x32xf32>
    %511 = vector.broadcast %492 : vector<1x32xf32> to vector<16x32xf32>
    %512 = arith.addf %510, %511 : vector<16x32xf32>
    %c0_337 = arith.constant 0 : index
    %c0_338 = arith.constant 0 : index
    %513 = vector.load %arg24[%c0_337, %c0_338] : memref<128x32xf32, #tpu.memory_space<vmem>>, vector<128x32xf32>
    %cst_339 = arith.constant dense<0.000000e+00> : vector<16x128xf32>
    %514 = tpu.matmul %512, %513, %cst_339 {dimension_numbers = #tpu.dot_dimension_numbers<[1], [1], [0], [0], [0, 0, 1, 0], [], []>} : vector<16x32xf32>, vector<128x32xf32>, vector<16x128xf32> -> vector<16x128xf32>
    %c0_340 = arith.constant 0 : index
    %c0_341 = arith.constant 0 : index
    %515 = vector.load %arg25[%c0_340, %c0_341] : memref<1x128xf32, #tpu.memory_space<vmem>>, vector<1x128xf32>
    %516 = vector.broadcast %515 : vector<1x128xf32> to vector<16x128xf32>
    %517 = arith.addf %514, %516 : vector<16x128xf32>
    %c0_342 = arith.constant 0 : index
    %c0_343 = arith.constant 0 : index
    %518 = vector.load %arg26[%c0_342, %c0_343] : memref<16x128xf32, #tpu.memory_space<vmem>>, vector<16x128xf32>
    tpu.vector_store %arg26[%c0_342, %c0_343], %517 {strides = array<i32>} : memref<16x128xf32, #tpu.memory_space<vmem>>, vector<16x128xf32>,
    return
  }
}

</mosaic_0001>

<bundles_post_ra>
// kernel: mul.8
= control target key start
LH: loop header
LB: loop body
LE: loop exit
PB: predicated region body
PF: predicated region fallthrough
CT: control target
= control target key end

     0   :  { %vm8_vm0 = vcmask 64512   ;;  %vm14_vm1 = vcmask 130112   ;;  %s42_s0 = inlined_call_operand.vmem [shape: f32[2,8], index: 0, kind: input, shape index: {}]   ;;  %s43_s1 = inlined_call_operand.vmem [shape: f32[16], index: 1, kind: output, shape index: {}]  }
   0x1   :  { %v5_v0 = vld [vmem:[%s42_s0] sm:$0x3]  ;;  %s25_s0 = smov 8  }
   0x2   :  { %6 = vst [vmem:[#allocation1] sm:$0x3] %v5_v0 }
   0x9   :  { %v11_v1 = vld [vmem:[#allocation1 + $0x1] sm:$0x1]   ;;  %v7_v2 = vld [vmem:[#allocation1] sm:$0x1]  }
   0xa   :  { %12 = vrot.lane.b32.xlu0 %v11_v1, %s25_s0  ;;  %9 = vst.msk [vmem:[#allocation0] sm:$0x1] %vm8_vm0, %v7_v2  }
  0x7c   :  { %v13_v3 = vpop.permute.xlu0 %12  }
  0x7d   :  { %15 = vst.msk [vmem:[#allocation0] sm:$0x1] %vm14_vm1, %v13_v3  }
  0x84   :  { %v20_v4 = vld [vmem:[#allocation0] sm:$0x1] }
  0x85   :  { %23 = vst [vmem:[%s43_s1] sm:$0x1] %v20_v4 }

// kernel: bert_mlm_forward.1
= control target key start
LH: loop header
LB: loop body
LE: loop exit
PB: predicated region body
PF: predicated region fallthrough
CT: control target
= control target key end

     0   :  { %s7692_s0 = inlined_call_operand.vmem [shape: f32[16,32], index: 0, kind: input, shape index: {}]   ;;  %s7693_s1 = inlined_call_operand.vmem [shape: f32[16,16], index: 1, kind: input, shape index: {}]   ;;  %s7694_s2 = inlined_call_operand.vmem [shape: f32[1,32], index: 2, kind: input, shape index: {}]   ;;  %s7695_s3 = inlined_call_operand.vmem [shape: f32[1,32], index: 3, kind: input, shape index: {}]   ;;  %s7696_s4 = inlined_call_operand.vmem [shape: f32[8,32,8], index: 4, kind: input, shape index: {}]   ;;  %s7697_s5 = inlined_call_operand.vmem [shape: f32[8,32,8], index: 5, kind: input, shape index: {}]   ;;  %s7698_s6 = inlined_call_operand.vmem [shape: f32[8,32,8], index: 6, kind: input, shape index: {}]   ;;  %s7699_s7 = inlined_call_operand.vmem [shape: f32[8,1,8], index: 7, kind: input, shape index: {}]   ;;  %s7700_s8 = inlined_call_operand.vmem [shape: f32[8,1,8], index: 8, kind: input, shape index: {}]   ;;  %s7701_s9 = inlined_call_operand.vmem [shape: f32[8,1,8], index: 9, kind: input, shape index: {}]   ;;  %s7702_s10 = inlined_call_operand.vmem [shape: f32[8,8,32], index: 10, kind: input, shape index: {}]   ;;  %s7703_s11 = inlined_call_operand.vmem [shape: f32[2,1,32], index: 11, kind: input, shape index: {}]   ;;  %s7704_s12 = inlined_call_operand.vmem [shape: f32[2,1,32], index: 12, kind: input, shape index: {}]   ;;  %s7705_s13 = inlined_call_operand.vmem [shape: f32[2,1,32], index: 13, kind: input, shape index: {}]   ;;  %s7706_s14 = inlined_call_operand.vmem [shape: f32[2,32,64], index: 14, kind: input, shape index: {}]   ;;  %s7707_s15 = inlined_call_operand.vmem [shape: f32[2,1,64], index: 15, kind: input, shape index: {}]   ;;  %s7708_s16 = inlined_call_operand.vmem [shape: f32[2,64,32], index: 16, kind: input, shape index: {}]   ;;  %s7709_s17 = inlined_call_operand.vmem [shape: f32[2,1,32], index: 17, kind: input, shape index: {}]   ;;  %s7710_s18 = inlined_call_operand.vmem [shape: f32[2,1,32], index: 18, kind: input, shape index: {}]   ;;  %s7711_s19 = inlined_call_operand.vmem [shape: f32[2,1,32], index: 19, kind: input, shape index: {}]   ;;  %s7712_s20 = inlined_call_operand.vmem [shape: f32[32,32], index: 20, kind: input, shape index: {}]   ;;  %s7713_s21 = inlined_call_operand.vmem [shape: f32[1,32], index: 21, kind: input, shape index: {}]   ;;  %s7714_s22 = inlined_call_operand.vmem [shape: f32[1,32], index: 22, kind: input, shape index: {}]   ;;  %s7715_s23 = inlined_call_operand.vmem [shape: f32[1,32], index: 23, kind: input, shape index: {}]   ;;  %s7716_s24 = inlined_call_operand.vmem [shape: f32[128,32], index: 24, kind: input, shape index: {}]   ;;  %s7717_s25 = inlined_call_operand.vmem [shape: f32[1,128], index: 25, kind: input, shape index: {}]   ;;  %s7718_s26 = inlined_call_operand.hbm [shape: f32[16,128], index: 26, kind: output, shape index: {}]  }
   0x1   :  { %7728 = sst [smem:[#allocation5_spill]] %s7692_s0 }
   0x2   :  { %7729 = sst [smem:[#allocation6_spill]] %s7693_s1 }
   0x3   :  { %7730 = sst [smem:[#allocation7_spill]] %s7694_s2 }
   0x4   :  { %7731 = sst [smem:[#allocation8_spill]] %s7695_s3 }
   0x5   :  { %7732 = sst [smem:[#allocation9_spill]] %s7696_s4 }
   0x6   :  { %7733 = sst [smem:[#allocation10_spill]] %s7697_s5 }
   0x7   :  { %7734 = sst [smem:[#allocation11_spill]] %s7698_s6 }
   0x8   :  { %7735 = sst [smem:[#allocation12_spill]] %s7699_s7 }
   0x9   :  { %7736 = sst [smem:[#allocation13_spill]] %s7700_s8 }
   0xa   :  { %7737 = sst [smem:[#allocation14_spill]] %s7701_s9 }
   0xb   :  { %7738 = sst [smem:[#allocation15_spill]] %s7702_s10 }
   0xc   :  { %7739 = sst [smem:[#allocation16_spill]] %s7718_s26 }
   0xd   :  { %s7740_s7 = sld [smem:[#allocation5_spill]]  ;;  %vm90_vm0 = vcmask 261120  }
  0x13   :  { %v86_v0 = vld [vmem:[%s7740_s7] sm:$0xff]  ;;  %v87_v1 = vld [vmem:[%s7740_s7 + $0x8] sm:$0xff] }
  0x14   :  { %31 = vsyncpa [#allocation3], 0  ;;  %v91_v2 = vsel %vm90_vm0, %v86_v0, 0.0  ;;  %v94_v3 = vsel %vm90_vm0, %v87_v1, 0.0  ;;  %s7741_s0 = sld [smem:[#allocation9_spill]]  ;;  %vm398_vm1 = vcmask 64512  }
  0x15   :  { %92 = vadd.xlane.f32.xlu0 %v91_v2  ;;  %s7742_s3 = sld [smem:[#allocation10_spill]]  ;;  %vm486_vm2 = vcmask 130048   ;;  %vm2459_vm3 = vcmask 523264  }
  0x16   :  { %s7743_s8 = sld [smem:[#allocation7_spill]] }
  0x17   :  { %s7744_s9 = sld [smem:[#allocation8_spill]] }
  0x18   :  { %s7745_s28 = sld [smem:[#allocation11_spill]] }
  0x19   :  { %95 = vadd.xlane.f32.xlu0 %v94_v3  ;;  %s7746_s6 = sld [smem:[#allocation12_spill]] }
  0x1a   :  { %v137_v14 = vld [vmem:[%s7741_s0 + $0x18] sm:$0xff]  ;;  %v136_v15 = vld [vmem:[%s7741_s0 + $0x10] sm:$0xff]  ;;  %v135_v16 = vld [vmem:[%s7741_s0 + $0x8] sm:$0xff]  ;;  %s7747_s7 = sld [smem:[#allocation13_spill]] }
  0x1b   :  { %5972 = vmatprep.subr.mxu1 %v137_v14  ;;  %v134_v17 = vld [vmem:[%s7741_s0] sm:$0xff]  ;;  %v229_v18 = vld [vmem:[%s7742_s3 + $0x18] sm:$0xff]  ;;  %v228_v35 = vld [vmem:[%s7742_s3 + $0x10] sm:$0xff]  ;;  %s7748_s29 = sld [smem:[#allocation14_spill]] }
  0x1c   :  { %5973 = vmatpush3.msra.mxu1 %v137_v14  ;;  %v5369_v26 = vld [vmem:[%s7743_s8] ss:$0 sm:$0xff]  ;;  %v227_v36 = vld [vmem:[%s7742_s3 + $0x8] sm:$0xff]  ;;  %v5389_v52 = vld [vmem:[%s7741_s0 + $0x38] sm:$0xff]  ;;  %s7749_s4 = sld [smem:[#allocation6_spill]] }
  0x1d   :  { %5974 = vmatprep.subr.mxu1 %v136_v15  ;;  %v5370_v28 = vld [vmem:[%s7744_s9] ss:$0 sm:$0xff]  ;;  %v5388_v58 = vld [vmem:[%s7741_s0 + $0x30] sm:$0xff]  ;;  %v5387_v59 = vld [vmem:[%s7741_s0 + $0x28] sm:$0xff]  ;;  %s7750_s2 = sld [smem:[#allocation15_spill]] }
  0x1e   :  { %5975 = vmatpush3.msra.mxu1 %v136_v15  ;;  %v226_v37 = vld [vmem:[%s7742_s3] sm:$0xff]  ;;  %v315_v38 = vld [vmem:[%s7745_s28 + $0x18] sm:$0xff]  ;;  %v314_v39 = vld [vmem:[%s7745_s28 + $0x10] sm:$0xff] }
  0x1f   :  { %5976 = vmatprep.subr.mxu1 %v135_v16  ;;  %v313_v40 = vld [vmem:[%s7745_s28 + $0x8] sm:$0xff]  ;;  %v312_v41 = vld [vmem:[%s7745_s28] sm:$0xff]  ;;  %v5397_v61 = vld [vmem:[%s7742_s3 + $0x38] sm:$0xff] }
  0x20   :  { %5977 = vmatpush3.msra.mxu1 %v135_v16  ;;  %v5371_v43 = vld [vmem:[%s7746_s6] ss:$0 sm:$0xff]  ;;  %v5396_v62 = vld [vmem:[%s7742_s3 + $0x30] sm:$0xff]  ;;  %v5395_v63 = vld [vmem:[%s7742_s3 + $0x28] sm:$0xff] }
  0x21   :  { %5978 = vmatprep.subr.mxu1 %v134_v17  ;;  %v5374_v46 = vld [vmem:[%s7747_s7] ss:$0 sm:$0xff]  ;;  %v5404_v2 = vld [vmem:[%s7745_s28 + $0x30] sm:$0xff]  ;;  %v5403_v3 = vld [vmem:[%s7745_s28 + $0x28] sm:$0xff] }
  0x22   :  { %5979 = vmatpush3.msra.mxu1 %v134_v17  ;;  %v5377_v51 = vld [vmem:[%s7748_s29] ss:$0 sm:$0xff]  ;;  %v5391_v14 = vld [vmem:[%s7746_s6 + $0x1] ss:$0 sm:$0xff] }
  0x23   :  { %5983 = vmatprep.subr.mxu1 %v229_v18  ;;  %v5386_v60 = vld [vmem:[%s7741_s0 + $0x20] sm:$0xff] }
  0x24   :  { %v5399_v17 = vld [vmem:[%s7747_s7 + $0x1] ss:$0 sm:$0xff] }
  0x9e   :  { %v93_v4 = vpop.xlane.xlu0 %92 }
  0x9f   :  { %v98_v5 = vmul.f32 0.03125, %v93_v4  ;;  %v5402_v4 = vld [vmem:[%s7745_s28 + $0x20] sm:$0xff] }
  0xa1   :  { %v100_v6 = vsub.f32 %v86_v0, %v98_v5  ;;  %v5394_v0 = vld [vmem:[%s7742_s3 + $0x20] sm:$0xff]  ;;  %v6893_v5 = vld [vmem:[%s7749_s4 + $0x8] sm:$0xff] }
  0xa2   :  { %v96_v7 = vpop.xlane.xlu0 %95 }
  0xa3   :  { %v99_v8 = vmul.f32 0.03125, %v96_v7  ;;  %v102_v9 = vmul.f32 %v100_v6, %v100_v6  ;;  %v6898_v7 = vld [vmem:[%s7749_s4] sm:$0xff] }
  0xa5   :  { %v101_v10 = vsub.f32 %v87_v1, %v99_v8  ;;  %v104_v11 = vsel %vm90_vm0, %v102_v9, 0.0  ;;  %v5405_v1 = vld [vmem:[%s7745_s28 + $0x38] sm:$0xff] }
  0xa6   :  { %105 = vadd.xlane.f32.xlu1 %v104_v11 }
  0xa7   :  { %v103_v12 = vmul.f32 %v101_v10, %v101_v10 }
  0xa9   :  { %v107_v13 = vsel %vm90_vm0, %v103_v12, 0.0 }
  0xaa   :  { %108 = vadd.xlane.f32.xlu1 %v107_v13 }
 0x12f   :  { %v106_v19 = vpop.xlane.xlu1 %105 }
 0x130   :  { %v110_v20 = vmul.f32 0.03125, %v106_v19 }
 0x132   :  { %v112_v21 = vadd.f32 1e-12, %v110_v20 }
 0x133   :  { %v109_v22 = vpop.xlane.xlu1 %108 }
 0x134   :  { %6497 = vrsqrt.f32 %v112_v21  ;;  %v111_v23 = vmul.f32 0.03125, %v109_v22  ;;  %v5407_v22 = vld [vmem:[%s7748_s29 + $0x1] ss:$0 sm:$0xff] }
 0x136   :  { %v113_v24 = vadd.f32 1e-12, %v111_v23 }
 0x138   :  { %6499 = vrsqrt.f32 %v113_v24 }
 0x141   :  { %v6498_v25 = vpop.eup %6497 }
 0x142   :  { %v116_v27 = vmul.f32 %v6498_v25, %v100_v6 }
 0x144   :  { %v124_v29 = vmul.f32 %v5369_v26, %v116_v27 }
 0x145   :  { %v6500_v30 = vpop.eup %6499 }
 0x146   :  { %v6790_v31 = vadd.f32 %v5370_v28, %v124_v29  ;;  %v117_v32 = vmul.f32 %v6500_v30, %v101_v10 }
 0x148   :  { %v125_v33 = vmul.f32 %v5369_v26, %v117_v32  ;;  %5980 = vmatprep.mubr.msk.f32.mxu1 %vm90_vm0, %v6790_v31 }
 0x14a   :  { %v6794_v34 = vadd.f32 %v5370_v28, %v125_v33 }
 0x14c   :  { %5981 = vmatmul.mubr.msk.f32.vlgmr.msra.gmra.mxu1 %vm90_vm0, %v6794_v34 }
 0x14d   :  { %5984 = vmatpush3.msra.mxu1 %v229_v18  ;;  %5991 = vmatprep.mubr.msk.f32.mxu1 %vm90_vm0, %v6790_v31 }
 0x14e   :  { %5985 = vmatprep.subr.mxu1 %v228_v35 }
 0x14f   :  { %5986 = vmatpush3.msra.mxu1 %v228_v35 }
 0x150   :  { %5987 = vmatprep.subr.mxu1 %v227_v36 }
 0x151   :  { %5988 = vmatpush3.msra.mxu1 %v227_v36 }
 0x152   :  { %5989 = vmatprep.subr.mxu1 %v226_v37 }
 0x153   :  { %5990 = vmatpush3.msra.mxu1 %v226_v37 }
 0x154   :  { %5992 = vmatmul.mubr.msk.f32.vlgmr.msra.gmra.mxu1 %vm90_vm0, %v6794_v34  ;;  %5994 = vmatprep.subr.mxu1 %v315_v38 }
 0x155   :  { %5995 = vmatpush3.msra.mxu1 %v315_v38  ;;  %6002 = vmatprep.mubr.msk.f32.mxu1 %vm90_vm0, %v6790_v31 }
 0x156   :  { %5996 = vmatprep.subr.mxu1 %v314_v39 }
 0x157   :  { %5997 = vmatpush3.msra.mxu1 %v314_v39 }
 0x158   :  { %5998 = vmatprep.subr.mxu1 %v313_v40 }
 0x159   :  { %5999 = vmatpush3.msra.mxu1 %v313_v40 }
 0x15a   :  { %6000 = vmatprep.subr.mxu1 %v312_v41 }
 0x15b   :  { %6001 = vmatpush3.msra.mxu1 %v312_v41 }
 0x15c   :  { %6003 = vmatmul.mubr.msk.f32.vlgmr.msra.gmra.mxu1 %vm90_vm0, %v6794_v34 }
 0x20c   :  { %v5982_v42 = vpop.f32.mrf.mxu1 }
 0x20d   :  { %v223_v54 = vadd.f32 %v5982_v42, %v5371_v43 }
 0x20e   :  { %v217_v44 = vpop.f32.mrf.mxu1 }
 0x20f   :  { %v218_v45 = vadd.f32 %v5371_v43, %v217_v44 }
 0x211   :  { %6009 = vmatprep.mubr.msk.f32.mxu1 %vm398_vm1, %v218_v45 }
 0x214   :  { %v5993_v47 = vpop.f32.mrf.mxu1 }
 0x215   :  { %v309_v48 = vadd.f32 %v5993_v47, %v5374_v46 }
 0x216   :  { %v303_v49 = vpop.f32.mrf.mxu1 }
 0x217   :  { %v304_v50 = vadd.f32 %v5374_v46, %v303_v49  ;;  %6005 = vmatprep.subr.msk.mxu1 %vm398_vm1, %v309_v48 }
 0x218   :  { %6006 = vmatpush3.xpose.msk.msra.mxu1 %vm398_vm1, %v309_v48 }
 0x219   :  { %6007 = vmatprep.subr.msk.mxu1 %vm398_vm1, %v304_v50 }
 0x21c   :  { %v6004_v53 = vpop.f32.mrf.mxu1  ;;  %6008 = vmatpush3.xpose.msk.msra.mxu1 %vm398_vm1, %v304_v50 }
 0x21d   :  { %v395_v55 = vadd.f32 %v6004_v53, %v5377_v51  ;;  %6019 = vmatprep.subr.mxu1 %v5389_v52 }
 0x21e   :  { %v389_v56 = vpop.f32.mrf.mxu1 }
 0x21f   :  { %v390_v57 = vadd.f32 %v5377_v51, %v389_v56  ;;  %6010 = vmatmul.mubr.msk.f32.vlgmr.msra.gmra.mxu1 %vm398_vm1, %v223_v54  ;;  %6012 = vmatprep.subr.mxu0 %v395_v55 }
 0x220   :  { %6013 = vmatpush3.msra.mxu0 %v395_v55  ;;  %6020 = vmatpush3.msra.mxu1 %v5389_v52 }
 0x221   :  { %6027 = vmatprep.mubr.msk.f32.mxu1 %vm90_vm0, %v6790_v31  ;;  %6014 = vmatprep.subr.mxu0 %v390_v57 }
 0x222   :  { %6021 = vmatprep.subr.mxu1 %v5388_v58  ;;  %6015 = vmatpush3.msra.mxu0 %v390_v57 }
 0x223   :  { %6022 = vmatpush3.msra.mxu1 %v5388_v58 }
 0x224   :  { %6023 = vmatprep.subr.mxu1 %v5387_v59 }
 0x225   :  { %6024 = vmatpush3.msra.mxu1 %v5387_v59 }
 0x226   :  { %6025 = vmatprep.subr.mxu1 %v5386_v60 }
 0x227   :  { %6026 = vmatpush3.msra.mxu1 %v5386_v60 }
 0x228   :  { %6028 = vmatmul.mubr.msk.f32.vlgmr.msra.gmra.mxu1 %vm90_vm0, %v6794_v34  ;;  %6030 = vmatprep.subr.mxu1 %v5397_v61 }
 0x229   :  { %6031 = vmatpush3.msra.mxu1 %v5397_v61  ;;  %6038 = vmatprep.mubr.msk.f32.mxu1 %vm90_vm0, %v6790_v31 }
 0x22a   :  { %6032 = vmatprep.subr.mxu1 %v5396_v62 }
 0x22b   :  { %6033 = vmatpush3.msra.mxu1 %v5396_v62  ;;  %v590_v62 = vld [vmem:[%s7750_s2] sm:$0xff] }
 0x22c   :  { %6034 = vmatprep.subr.mxu1 %v5395_v63 }
 0x22d   :  { %6035 = vmatpush3.msra.mxu1 %v5395_v63  ;;  %v5416_v63 = vld [vmem:[%s7750_s2 + $0x8] sm:$0xff] }
 0x22e   :  { %6036 = vmatprep.subr.mxu1 %v5394_v0  ;;  %6066 = vmatprep.subr.mxu0 %v5416_v63 }
 0x22f   :  { %6037 = vmatpush3.msra.mxu1 %v5394_v0 }
 0x230   :  { %6039 = vmatmul.mubr.msk.f32.vlgmr.msra.gmra.mxu1 %vm90_vm0, %v6794_v34  ;;  %6041 = vmatprep.subr.mxu1 %v5405_v1 }
 0x231   :  { %6042 = vmatpush3.msra.mxu1 %v5405_v1  ;;  %6049 = vmatprep.mubr.msk.f32.mxu1 %vm90_vm0, %v6790_v31 }
 0x232   :  { %6043 = vmatprep.subr.mxu1 %v5404_v2 }
 0x233   :  { %6044 = vmatpush3.msra.mxu1 %v5404_v2 }
 0x234   :  { %6045 = vmatprep.subr.mxu1 %v5403_v3 }
 0x235   :  { %6046 = vmatpush3.msra.mxu1 %v5403_v3 }
 0x236   :  { %6047 = vmatprep.subr.mxu1 %v5402_v4 }
 0x237   :  { %6048 = vmatpush3.msra.mxu1 %v5402_v4 }
 0x238   :  { %6050 = vmatmul.mubr.msk.f32.vlgmr.msra.gmra.mxu1 %vm90_vm0, %v6794_v34 }
 0x2df   :  { %v6011_v6 = vpop.f32.mrf.mxu1 }
 0x2e0   :  { %v483_v8 = vadd.f32 %v6011_v6, %v6893_v5 }
 0x2e1   :  { %v477_v9 = vpop.f32.mrf.mxu1 }
 0x2e2   :  { %v478_v10 = vadd.f32 %v477_v9, %v6898_v7  ;;  %v490_v11 = vsel %vm486_vm2, %v483_v8, -inf }
 0x2e3   :  { %491 = vmax.xlane.f32.xlu1 %v490_v11  ;;  %v5431_v11 = vld [vmem:[%s7742_s3 + $0x50] sm:$0xff] }
 0x2e4   :  { %v487_v12 = vsel %vm486_vm2, %v478_v10, -inf }
 0x2e5   :  { %488 = vmax.xlane.f32.xlu0 %v487_v12  ;;  %v5430_v12 = vld [vmem:[%s7742_s3 + $0x48] sm:$0xff] }
 0x2e8   :  { %v6029_v13 = vpop.f32.mrf.mxu1 }
 0x2e9   :  { %v676_v24 = vadd.f32 %v6029_v13, %v5391_v14  ;;  %v5429_v13 = vld [vmem:[%s7742_s3 + $0x40] sm:$0xff] }
 0x2ea   :  { %v670_v15 = vpop.f32.mrf.mxu1 }
 0x2eb   :  { %v671_v16 = vadd.f32 %v5391_v14, %v670_v15  ;;  %v5424_v14 = vld [vmem:[%s7741_s0 + $0x58] sm:$0xff] }
 0x2ed   :  { %6056 = vmatprep.mubr.msk.f32.mxu1 %vm398_vm1, %v671_v16 }
 0x2f0   :  { %v6040_v18 = vpop.f32.mrf.mxu1 }
 0x2f1   :  { %v764_v19 = vadd.f32 %v6040_v18, %v5399_v17  ;;  %v5422_v18 = vld [vmem:[%s7741_s0 + $0x48] sm:$0xff] }
 0x2f2   :  { %v758_v20 = vpop.f32.mrf.mxu1 }
 0x2f3   :  { %v759_v21 = vadd.f32 %v5399_v17, %v758_v20  ;;  %6052 = vmatprep.subr.msk.mxu1 %vm398_vm1, %v764_v19  ;;  %v5423_v17 = vld [vmem:[%s7741_s0 + $0x50] sm:$0xff]  ;;  %v5440_v20 = vld [vmem:[%s7745_s28 + $0x58] sm:$0xff] }
 0x2f4   :  { %6053 = vmatpush3.xpose.msk.msra.mxu1 %vm398_vm1, %v764_v19  ;;  %v5421_v19 = vld [vmem:[%s7741_s0 + $0x40] sm:$0xff] }
 0x2f5   :  { %6054 = vmatprep.subr.msk.mxu1 %vm398_vm1, %v759_v21 }
 0x2f8   :  { %v6051_v23 = vpop.f32.mrf.mxu1  ;;  %6055 = vmatpush3.xpose.msk.msra.mxu1 %vm398_vm1, %v759_v21  ;;  %v5439_v21 = vld [vmem:[%s7745_s28 + $0x50] sm:$0xff] }
 0x2f9   :  { %v852_v25 = vadd.f32 %v6051_v23, %v5407_v22  ;;  %v5437_v23 = vld [vmem:[%s7745_s28 + $0x40] sm:$0xff] }
 0x2fa   :  { %v846_v26 = vpop.f32.mrf.mxu1 }
 0x2fb   :  { %v847_v27 = vadd.f32 %v5407_v22, %v846_v26  ;;  %6057 = vmatmul.mubr.msk.f32.vlgmr.msra.gmra.mxu1 %vm398_vm1, %v676_v24  ;;  %6059 = vmatprep.subr.mxu1 %v852_v25  ;;  %v5438_v22 = vld [vmem:[%s7745_s28 + $0x48] sm:$0xff]  ;;  %v5434_v26 = vld [vmem:[%s7747_s7 + $0x2] ss:$0 sm:$0xff] }
 0x2fc   :  { %6060 = vmatpush3.msra.mxu1 %v852_v25 }
 0x2fd   :  { %6061 = vmatprep.subr.mxu1 %v847_v27 }
 0x2fe   :  { %6062 = vmatpush3.msra.mxu1 %v847_v27 }
 0x2ff   :  { %6071 = vmatprep.subr.mxu1 %v590_v62 }
 0x36c   :  { %v492_v28 = vpop.xlane.xlu1 %491 }
 0x36d   :  { %v494_v30 = vsub.f32 %v483_v8, %v492_v28  ;;  %v5432_v8 = vld [vmem:[%s7742_s3 + $0x58] sm:$0xff] }
 0x36e   :  { %v489_v29 = vpop.xlane.xlu0 %488 }
 0x36f   :  { %v493_v32 = vsub.f32 %v478_v10, %v489_v29  ;;  %v497_v33 = vmul.f32 1.442695, %v494_v30 }
 0x371   :  { %v495_v35 = vmul.f32 1.442695, %v493_v32  ;;  %6501 = vpow2.f32 %v497_v33 }
 0x373   :  { %6503 = vpow2.f32 %v495_v35 }
 0x37e   :  { %v6502_v41 = vpop.eup %6501 }
 0x37f   :  { %v502_v44 = vsel %vm486_vm2, %v6502_v41, 0.0 }
 0x380   :  { %v6504_v43 = vpop.eup %6503 }
 0x381   :  { %v499_v45 = vsel %vm486_vm2, %v6504_v43, 0.0 }
 0x3bb   :  { %v6058_v36 = vpop.f32.mrf.mxu1 }
 0x3bc   :  { %v939_v37 = vadd.f32 %v6058_v36, %v6893_v5  ;;  %v5426_v36 = vld [vmem:[%s7746_s6 + $0x2] ss:$0 sm:$0xff] }
 0x3bd   :  { %v933_v38 = vpop.f32.mrf.mxu1 }
 0x3be   :  { %v934_v39 = vadd.f32 %v933_v38, %v6898_v7  ;;  %v945_v40 = vsel %vm486_vm2, %v939_v37, -inf }
 0x3bf   :  { %946 = vmax.xlane.f32.xlu1 %v945_v40  ;;  %v5442_v40 = vld [vmem:[%s7748_s29 + $0x2] ss:$0 sm:$0xff] }
 0x3c0   :  { %v942_v42 = vsel %vm486_vm2, %v934_v39, -inf }
 0x3c1   :  { %943 = vmax.xlane.f32.xlu0 %v942_v42 }
 0x3c3   :  { %503 = vadd.xlane.f32.xlu1 %v502_v44 }
 0x3c5   :  { %500 = vadd.xlane.f32.xlu0 %v499_v45 }
 0x448   :  { %v947_v46 = vpop.xlane.xlu1 %946 }
 0x449   :  { %v949_v47 = vsub.f32 %v939_v37, %v947_v46 }
 0x44a   :  { %v944_v48 = vpop.xlane.xlu0 %943 }
 0x44b   :  { %v952_v49 = vmul.f32 1.442695, %v949_v47  ;;  %v948_v50 = vsub.f32 %v934_v39, %v944_v48 }
 0x44c   :  { %v504_v51 = vpop.xlane.xlu1 %503 }
 0x44d   :  { %6505 = vpow2.f32 %v952_v49  ;;  %v950_v52 = vmul.f32 1.442695, %v948_v50 }
 0x44e   :  { %6507 = vrcp.f32 %v504_v51  ;;  %v501_v53 = vpop.xlane.xlu0 %500 }
 0x44f   :  { %6509 = vpow2.f32 %v950_v52 }
 0x450   :  { %6511 = vrcp.f32 %v501_v53 }
 0x45a   :  { %v6506_v54 = vpop.eup %6505 }
 0x45b   :  { %v6508_v55 = vpop.eup %6507  ;;  %v957_v56 = vsel %vm486_vm2, %v6506_v54, 0.0 }
 0x45c   :  { %v6510_v57 = vpop.eup %6509  ;;  %958 = vadd.xlane.f32.xlu1 %v957_v56  ;;  %v508_v61 = vmul.f32 %v6508_v55, %v6502_v41 }
 0x45d   :  { %v6512_v58 = vpop.eup %6511  ;;  %v954_v59 = vsel %vm486_vm2, %v6510_v57, 0.0 }
 0x45e   :  { %955 = vadd.xlane.f32.xlu0 %v954_v59  ;;  %v507_v60 = vmul.f32 %v6512_v58, %v6504_v43 }
 0x460   :  { %6016 = vmatprep.mubr.msk.f32.mxu0 %vm486_vm2, %v507_v60 }
 0x461   :  { %6017 = vmatmul.mubr.msk.f32.vlgmr.msra.gmra.mxu0 %vm486_vm2, %v508_v61  ;;  %v5457_v61 = vld [vmem:[%s7741_s0 + $0x78] sm:$0xff] }
 0x462   :  { %6067 = vmatpush3.msra.mxu0 %v5416_v63 }
 0x463   :  { %6076 = vmatprep.subr.mxu0 %v5424_v14 }
 0x4e5   :  { %v959_v0 = vpop.xlane.xlu1 %958 }
 0x4e6   :  { %6513 = vrcp.f32 %v959_v0 }
 0x4e7   :  { %v956_v1 = vpop.xlane.xlu0 %955 }
 0x4e8   :  { %6515 = vrcp.f32 %v956_v1 }
 0x4f3   :  { %v6514_v2 = vpop.eup %6513 }
 0x4f4   :  { %v963_v6 = vmul.f32 %v6514_v2, %v6506_v54 }
 0x4f5   :  { %v6516_v3 = vpop.eup %6515 }
 0x4f6   :  { %v962_v4 = vmul.f32 %v6516_v3, %v6510_v57 }
 0x4f8   :  { %6063 = vmatprep.mubr.msk.f32.mxu1 %vm486_vm2, %v962_v4 }
 0x4f9   :  { %6064 = vmatmul.mubr.msk.f32.vlgmr.msra.gmra.mxu1 %vm486_vm2, %v963_v6  ;;  %v5456_v6 = vld [vmem:[%s7741_s0 + $0x70] sm:$0xff] }
 0x4fa   :  { %6072 = vmatpush3.msra.mxu1 %v590_v62  ;;  %v5451_v62 = vld [vmem:[%s7750_s2 + $0x10] sm:$0xff] }
 0x4fb   :  { %6087 = vmatprep.subr.mxu1 %v5432_v8 }
 0x521   :  { %v6018_v9 = vpop.f32.mrf.mxu0 }
 0x523   :  { %v581_v10 = vpop.f32.mrf.mxu0 }
 0x524   :  { %6073 = vmatprep.mubr.msk.f32.mxu1 %vm398_vm1, %v581_v10  ;;  %v5473_v10 = vld [vmem:[%s7745_s28 + $0x78] sm:$0xff] }
 0x525   :  { %6074 = vmatmul.mubr.msk.f32.vlgmr.msra.gmra.mxu1 %vm398_vm1, %v6018_v9  ;;  %v5454_v9 = vld [vmem:[%s7741_s0 + $0x60] sm:$0xff] }
 0x526   :  { %6088 = vmatpush3.msra.mxu1 %v5432_v8  ;;  %6095 = vmatprep.mubr.msk.f32.mxu1 %vm90_vm0, %v6790_v31  ;;  %v5455_v8 = vld [vmem:[%s7741_s0 + $0x68] sm:$0xff] }
 0x527   :  { %6089 = vmatprep.subr.mxu1 %v5431_v11 }
 0x528   :  { %6090 = vmatpush3.msra.mxu1 %v5431_v11  ;;  %v5472_v11 = vld [vmem:[%s7745_s28 + $0x70] sm:$0xff] }
 0x529   :  { %6091 = vmatprep.subr.mxu1 %v5430_v12 }
 0x52a   :  { %6092 = vmatpush3.msra.mxu1 %v5430_v12  ;;  %v5471_v12 = vld [vmem:[%s7745_s28 + $0x68] sm:$0xff] }
 0x52b   :  { %6093 = vmatprep.subr.mxu1 %v5429_v13 }
 0x52c   :  { %6094 = vmatpush3.msra.mxu1 %v5429_v13  ;;  %v5470_v13 = vld [vmem:[%s7745_s28 + $0x60] sm:$0xff] }
 0x52d   :  { %6096 = vmatmul.mubr.msk.f32.vlgmr.msra.gmra.mxu1 %vm90_vm0, %v6794_v34 }
 0x5b9   :  { %v6065_v15 = vpop.f32.mrf.mxu1 }
 0x5bb   :  { %v1036_v16 = vpop.f32.mrf.mxu1 }
 0x5bc   :  { %6068 = vmatprep.mubr.msk.f32.mxu0 %vm398_vm1, %v1036_v16 }
 0x5bd   :  { %6069 = vmatmul.mubr.msk.f32.vlgmr.msra.gmra.mxu0 %vm398_vm1, %v6065_v15 }
 0x5be   :  { %6077 = vmatpush3.msra.mxu0 %v5424_v14  ;;  %6084 = vmatprep.mubr.msk.f32.mxu0 %vm90_vm0, %v6790_v31  ;;  %v5465_v14 = vld [vmem:[%s7742_s3 + $0x78] sm:$0xff] }
 0x5bf   :  { %6078 = vmatprep.subr.mxu0 %v5423_v17 }
 0x5c0   :  { %6079 = vmatpush3.msra.mxu0 %v5423_v17  ;;  %v5464_v17 = vld [vmem:[%s7742_s3 + $0x70] sm:$0xff] }
 0x5c1   :  { %6080 = vmatprep.subr.mxu0 %v5422_v18 }
 0x5c2   :  { %6081 = vmatpush3.msra.mxu0 %v5422_v18  ;;  %v5463_v18 = vld [vmem:[%s7742_s3 + $0x68] sm:$0xff] }
 0x5c3   :  { %6082 = vmatprep.subr.mxu0 %v5421_v19 }
 0x5c4   :  { %6083 = vmatpush3.msra.mxu0 %v5421_v19  ;;  %v5459_v19 = vld [vmem:[%s7746_s6 + $0x3] ss:$0 sm:$0xff] }
 0x5c5   :  { %6085 = vmatmul.mubr.msk.f32.vlgmr.msra.gmra.mxu0 %vm90_vm0, %v6794_v34  ;;  %6098 = vmatprep.subr.mxu0 %v5440_v20 }
 0x5c6   :  { %6099 = vmatpush3.msra.mxu0 %v5440_v20  ;;  %6106 = vmatprep.mubr.msk.f32.mxu0 %vm90_vm0, %v6790_v31  ;;  %v5462_v20 = vld [vmem:[%s7742_s3 + $0x60] sm:$0xff] }
 0x5c7   :  { %6100 = vmatprep.subr.mxu0 %v5439_v21 }
 0x5c8   :  { %6101 = vmatpush3.msra.mxu0 %v5439_v21 }
 0x5c9   :  { %6102 = vmatprep.subr.mxu0 %v5438_v22 }
 0x5ca   :  { %6103 = vmatpush3.msra.mxu0 %v5438_v22 }
 0x5cb   :  { %6104 = vmatprep.subr.mxu0 %v5437_v23 }
 0x5cc   :  { %6105 = vmatpush3.msra.mxu0 %v5437_v23 }
 0x5cd   :  { %6107 = vmatmul.mubr.msk.f32.vlgmr.msra.gmra.mxu0 %vm90_vm0, %v6794_v34 }
 0x5e5   :  { %v6989_v24 = vpop.f32.mrf.mxu1 }
 0x5e7   :  { %v6991_v25 = vpop.f32.mrf.mxu1 }
 0x5ed   :  { %v6097_v27 = vpop.f32.mrf.mxu1 }
 0x5ee   :  { %v1382_v28 = vadd.f32 %v6097_v27, %v5434_v26  ;;  %v5475_v27 = vld [vmem:[%s7748_s29 + $0x3] ss:$0 sm:$0xff] }
 0x5ef   :  { %v1376_v29 = vpop.f32.mrf.mxu1 }
 0x5f0   :  { %v1377_v30 = vadd.f32 %v5434_v26, %v1376_v29  ;;  %6109 = vmatprep.subr.msk.mxu1 %vm398_vm1, %v1382_v28 }
 0x5f1   :  { %6110 = vmatpush3.xpose.msk.msra.mxu1 %vm398_vm1, %v1382_v28 }
 0x5f2   :  { %6111 = vmatprep.subr.msk.mxu1 %vm398_vm1, %v1377_v30 }
 0x5f5   :  { %6112 = vmatpush3.xpose.msk.msra.mxu1 %vm398_vm1, %v1377_v30 }
 0x5f6   :  { %6123 = vmatprep.subr.mxu1 %v5451_v62 }
 0x67d   :  { %v7000_v32 = vpop.f32.mrf.mxu0 }
 0x67f   :  { %v7002_v33 = vpop.f32.mrf.mxu0 }
 0x685   :  { %v6086_v35 = vpop.f32.mrf.mxu0 }
 0x686   :  { %v1294_v39 = vadd.f32 %v6086_v35, %v5426_v36 }
 0x687   :  { %v1288_v37 = vpop.f32.mrf.mxu0 }
 0x688   :  { %v1289_v38 = vadd.f32 %v5426_v36, %v1288_v37  ;;  %v1206_v36 = vadd.f32 %v6989_v24, %v7000_v32 }
 0x68a   :  { %6113 = vmatprep.mubr.msk.f32.mxu1 %vm398_vm1, %v1289_v38  ;;  %v1201_v38 = vadd.f32 %v6991_v25, %v7002_v33 }
 0x68b   :  { %6114 = vmatmul.mubr.msk.f32.vlgmr.msra.gmra.mxu1 %vm398_vm1, %v1294_v39 }
 0x68c   :  { %6124 = vmatpush3.msra.mxu1 %v5451_v62 }
 0x68d   :  { %v6108_v41 = vpop.f32.mrf.mxu0  ;;  %6139 = vmatprep.subr.mxu1 %v5465_v14 }
 0x68e   :  { %v1470_v42 = vadd.f32 %v6108_v41, %v5442_v40 }
 0x68f   :  { %v1464_v43 = vpop.f32.mrf.mxu0 }
 0x690   :  { %v1465_v44 = vadd.f32 %v5442_v40, %v1464_v43  ;;  %6116 = vmatprep.subr.mxu0 %v1470_v42 }
 0x691   :  { %6117 = vmatpush3.msra.mxu0 %v1470_v42  ;;  %v5467_v42 = vld [vmem:[%s7747_s7 + $0x3] ss:$0 sm:$0xff] }
 0x692   :  { %6118 = vmatprep.subr.mxu0 %v1465_v44 }
 0x693   :  { %6119 = vmatpush3.msra.mxu0 %v1465_v44 }
 0x694   :  { %6128 = vmatprep.subr.mxu0 %v5457_v61 }
 0x74b   :  { %v6115_v45 = vpop.f32.mrf.mxu1 }
 0x74c   :  { %v1557_v46 = vadd.f32 %v6115_v45, %v6893_v5 }
 0x74d   :  { %v1551_v47 = vpop.f32.mrf.mxu1 }
 0x74e   :  { %v1552_v48 = vadd.f32 %v1551_v47, %v6898_v7  ;;  %v1563_v49 = vsel %vm486_vm2, %v1557_v46, -inf }
 0x74f   :  { %1564 = vmax.xlane.f32.xlu1 %v1563_v49 }
 0x750   :  { %v1560_v50 = vsel %vm486_vm2, %v1552_v48, -inf }
 0x751   :  { %1561 = vmax.xlane.f32.xlu0 %v1560_v50 }
 0x7d8   :  { %v1565_v51 = vpop.xlane.xlu1 %1564 }
 0x7d9   :  { %v1567_v52 = vsub.f32 %v1557_v46, %v1565_v51 }
 0x7da   :  { %v1562_v53 = vpop.xlane.xlu0 %1561 }
 0x7db   :  { %v1570_v54 = vmul.f32 1.442695, %v1567_v52  ;;  %v1566_v55 = vsub.f32 %v1552_v48, %v1562_v53 }
 0x7dd   :  { %6517 = vpow2.f32 %v1570_v54  ;;  %v1568_v56 = vmul.f32 1.442695, %v1566_v55 }
 0x7df   :  { %6519 = vpow2.f32 %v1568_v56 }
 0x7ea   :  { %v6518_v57 = vpop.eup %6517 }
 0x7eb   :  { %v1575_v58 = vsel %vm486_vm2, %v6518_v57, 0.0 }
 0x7ec   :  { %v6520_v59 = vpop.eup %6519  ;;  %1576 = vadd.xlane.f32.xlu1 %v1575_v58 }
 0x7ed   :  { %v1572_v60 = vsel %vm486_vm2, %v6520_v59, 0.0 }
 0x7ee   :  { %1573 = vadd.xlane.f32.xlu0 %v1572_v60 }
 0x875   :  { %v1577_v63 = vpop.xlane.xlu1 %1576 }
 0x876   :  { %6521 = vrcp.f32 %v1577_v63 }
 0x877   :  { %v1574_v0 = vpop.xlane.xlu0 %1573 }
 0x878   :  { %6523 = vrcp.f32 %v1574_v0 }
 0x883   :  { %v6522_v1 = vpop.eup %6521 }
 0x884   :  { %v1581_v4 = vmul.f32 %v6522_v1, %v6518_v57  ;;  %v5484_v57 = vld [vmem:[%s7750_s2 + $0x18] sm:$0xff] }
 0x885   :  { %v6524_v2 = vpop.eup %6523 }
 0x886   :  { %v1580_v3 = vmul.f32 %v6524_v2, %v6520_v59 }
 0x888   :  { %6120 = vmatprep.mubr.msk.f32.mxu0 %vm486_vm2, %v1580_v3  ;;  %v5487_v3 = vld [vmem:[%s7703_s11] ss:$0 sm:$0xff] }
 0x889   :  { %6121 = vmatmul.mubr.msk.f32.vlgmr.msra.gmra.mxu0 %vm486_vm2, %v1581_v4 }
 0x88a   :  { %6129 = vmatpush3.msra.mxu0 %v5457_v61  ;;  %6136 = vmatprep.mubr.msk.f32.mxu0 %vm90_vm0, %v6790_v31 }
 0x88b   :  { %6130 = vmatprep.subr.mxu0 %v5456_v6 }
 0x88c   :  { %6131 = vmatpush3.msra.mxu0 %v5456_v6 }
 0x88d   :  { %6132 = vmatprep.subr.mxu0 %v5455_v8 }
 0x88e   :  { %6133 = vmatpush3.msra.mxu0 %v5455_v8 }
 0x88f   :  { %6134 = vmatprep.subr.mxu0 %v5454_v9 }
 0x890   :  { %6135 = vmatpush3.msra.mxu0 %v5454_v9 }
 0x891   :  { %6137 = vmatmul.mubr.msk.f32.vlgmr.msra.gmra.mxu0 %vm90_vm0, %v6794_v34  ;;  %6150 = vmatprep.subr.mxu0 %v5473_v10 }
 0x892   :  { %6151 = vmatpush3.msra.mxu0 %v5473_v10  ;;  %6158 = vmatprep.mubr.msk.f32.mxu0 %vm90_vm0, %v6790_v31 }
 0x893   :  { %6152 = vmatprep.subr.mxu0 %v5472_v11 }
 0x894   :  { %6153 = vmatpush3.msra.mxu0 %v5472_v11 }
 0x895   :  { %6154 = vmatprep.subr.mxu0 %v5471_v12 }
 0x896   :  { %6155 = vmatpush3.msra.mxu0 %v5471_v12 }
 0x897   :  { %6156 = vmatprep.subr.mxu0 %v5470_v13 }
 0x898   :  { %6157 = vmatpush3.msra.mxu0 %v5470_v13 }
 0x899   :  { %6159 = vmatmul.mubr.msk.f32.vlgmr.msra.gmra.mxu0 %vm90_vm0, %v6794_v34 }
 0x949   :  { %v6122_v15 = vpop.f32.mrf.mxu0 }
 0x94b   :  { %v1654_v16 = vpop.f32.mrf.mxu0 }
 0x94c   :  { %6125 = vmatprep.mubr.msk.f32.mxu1 %vm398_vm1, %v1654_v16 }
 0x94d   :  { %6126 = vmatmul.mubr.msk.f32.vlgmr.msra.gmra.mxu1 %vm398_vm1, %v6122_v15 }
 0x94e   :  { %6140 = vmatpush3.msra.mxu1 %v5465_v14  ;;  %6147 = vmatprep.mubr.msk.f32.mxu1 %vm90_vm0, %v6790_v31 }
 0x94f   :  { %6141 = vmatprep.subr.mxu1 %v5464_v17 }
 0x950   :  { %6142 = vmatpush3.msra.mxu1 %v5464_v17 }
 0x951   :  { %v6138_v21 = vpop.f32.mrf.mxu0  ;;  %6143 = vmatprep.subr.mxu1 %v5463_v18 }
 0x952   :  { %v1833_v22 = vadd.f32 %v6138_v21, %v5459_v19  ;;  %6144 = vmatpush3.msra.mxu1 %v5463_v18 }
 0x953   :  { %v1827_v23 = vpop.f32.mrf.mxu0  ;;  %6145 = vmatprep.subr.mxu1 %v5462_v20 }
 0x954   :  { %v1828_v26 = vadd.f32 %v5459_v19, %v1827_v23  ;;  %6146 = vmatpush3.msra.mxu1 %v5462_v20 }
 0x955   :  { %6148 = vmatmul.mubr.msk.f32.vlgmr.msra.gmra.mxu1 %vm90_vm0, %v6794_v34 }
 0x956   :  { %6165 = vmatprep.mubr.msk.f32.mxu1 %vm398_vm1, %v1828_v26  ;;  %v2344_v26 = vld [vmem:[%s7706_s14 + $0x10] sm:$0xff] }
 0x959   :  { %v6160_v28 = vpop.f32.mrf.mxu0 }
 0x95a   :  { %v2009_v29 = vadd.f32 %v6160_v28, %v5475_v27  ;;  %v2342_v28 = vld [vmem:[%s7706_s14] sm:$0xff] }
 0x95b   :  { %v2003_v30 = vpop.f32.mrf.mxu0 }
 0x95c   :  { %v2004_v35 = vadd.f32 %v5475_v27, %v2003_v30  ;;  %6168 = vmatprep.subr.mxu0 %v2009_v29  ;;  %v2343_v27 = vld [vmem:[%s7706_s14 + $0x8] sm:$0xff] }
 0x95d   :  { %6169 = vmatpush3.msra.mxu0 %v2009_v29 }
 0x95e   :  { %6170 = vmatprep.subr.mxu0 %v2004_v35 }
 0x95f   :  { %6171 = vmatpush3.msra.mxu0 %v2004_v35 }
 0xa0d   :  { %v6127_v37 = vpop.f32.mrf.mxu1 }
 0xa0e   :  { %v1747_v39 = vadd.f32 %v6127_v37, %v1206_v36 }
 0xa0f   :  { %v1737_v40 = vpop.f32.mrf.mxu1 }
 0xa10   :  { %v1746_v41 = vadd.f32 %v1737_v40, %v1201_v38  ;;  %v5488_v40 = vld [vmem:[%s7704_s12] ss:$0 sm:$0xff] }
 0xa15   :  { %v6149_v43 = vpop.f32.mrf.mxu1 }
 0xa16   :  { %v1921_v44 = vadd.f32 %v6149_v43, %v5467_v42 }
 0xa17   :  { %v1915_v45 = vpop.f32.mrf.mxu1 }
 0xa18   :  { %v1916_v46 = vadd.f32 %v5467_v42, %v1915_v45  ;;  %6161 = vmatprep.subr.msk.mxu1 %vm398_vm1, %v1921_v44  ;;  %v5489_v45 = vld [vmem:[%s7705_s13] ss:$0 sm:$0xff] }
 0xa19   :  { %6162 = vmatpush3.xpose.msk.msra.mxu1 %vm398_vm1, %v1921_v44 }
 0xa1a   :  { %6163 = vmatprep.subr.msk.mxu1 %vm398_vm1, %v1916_v46 }
 0xa1d   :  { %6164 = vmatpush3.xpose.msk.msra.mxu1 %vm398_vm1, %v1916_v46 }
 0xa1e   :  { %6175 = vmatprep.subr.mxu1 %v5484_v57 }
 0xa20   :  { %6166 = vmatmul.mubr.msk.f32.vlgmr.msra.gmra.mxu1 %vm398_vm1, %v1833_v22 }
 0xa21   :  { %6176 = vmatpush3.msra.mxu1 %v5484_v57 }
 0xae0   :  { %v6167_v24 = vpop.f32.mrf.mxu1 }
 0xae1   :  { %v2096_v25 = vadd.f32 %v6167_v24, %v6893_v5 }
 0xae2   :  { %v2090_v32 = vpop.f32.mrf.mxu1 }
 0xae3   :  { %v2091_v33 = vadd.f32 %v2090_v32, %v6898_v7  ;;  %v2102_v47 = vsel %vm486_vm2, %v2096_v25, -inf  ;;  %v2451_v32 = vld [vmem:[%s7708_s16 + $0x38] sm:$0xff] }
 0xae4   :  { %2103 = vmax.xlane.f32.xlu1 %v2102_v47  ;;  %6191 = vmatprep.subr.mxu1 %v2451_v32  ;;  %v2449_v47 = vld [vmem:[%s7708_s16 + $0x28] sm:$0xff] }
 0xae5   :  { %v2099_v48 = vsel %vm486_vm2, %v2091_v33, -inf }
 0xae6   :  { %2100 = vmax.xlane.f32.xlu0 %v2099_v48  ;;  %v2448_v48 = vld [vmem:[%s7708_s16 + $0x20] sm:$0xff] }
 0xb6d   :  { %v2104_v49 = vpop.xlane.xlu1 %2103 }
 0xb6e   :  { %v2106_v50 = vsub.f32 %v2096_v25, %v2104_v49  ;;  %v2447_v49 = vld [vmem:[%s7708_s16 + $0x18] sm:$0xff] }
 0xb6f   :  { %v2101_v51 = vpop.xlane.xlu0 %2100 }
 0xb70   :  { %v2109_v52 = vmul.f32 1.442695, %v2106_v50  ;;  %v2105_v53 = vsub.f32 %v2091_v33, %v2101_v51  ;;  %v2450_v33 = vld [vmem:[%s7708_s16 + $0x30] sm:$0xff]  ;;  %v2445_v51 = vld [vmem:[%s7708_s16 + $0x8] sm:$0xff] }
 0xb71   :  { %v2446_v50 = vld [vmem:[%s7708_s16 + $0x10] sm:$0xff] }
 0xb72   :  { %6525 = vpow2.f32 %v2109_v52  ;;  %v2107_v54 = vmul.f32 1.442695, %v2105_v53  ;;  %v2444_v52 = vld [vmem:[%s7708_s16] sm:$0xff] }
 0xb73   :  { %v5490_v53 = vld [vmem:[%s7707_s15] ss:$0 sm:$0xff] }
 0xb74   :  { %6527 = vpow2.f32 %v2107_v54 }
 0xb7f   :  { %v6526_v55 = vpop.eup %6525 }
 0xb80   :  { %v2114_v5 = vsel %vm486_vm2, %v6526_v55, 0.0 }
 0xb81   :  { %v6528_v56 = vpop.eup %6527  ;;  %2115 = vadd.xlane.f32.xlu1 %v2114_v5 }
 0xb82   :  { %v2111_v7 = vsel %vm486_vm2, %v6528_v56, 0.0 }
 0xb83   :  { %2112 = vadd.xlane.f32.xlu0 %v2111_v7 }
 0xc0a   :  { %v2116_v58 = vpop.xlane.xlu1 %2115 }
 0xc0b   :  { %6529 = vrcp.f32 %v2116_v58 }
 0xc0c   :  { %v2113_v59 = vpop.xlane.xlu0 %2112 }
 0xc0d   :  { %6531 = vrcp.f32 %v2113_v59 }
 0xc18   :  { %v6530_v60 = vpop.eup %6529 }
 0xc19   :  { %v2120_v63 = vmul.f32 %v6530_v60, %v6526_v55 }
 0xc1a   :  { %v6532_v61 = vpop.eup %6531 }
 0xc1b   :  { %v2119_v62 = vmul.f32 %v6532_v61, %v6528_v56 }
 0xc1d   :  { %6172 = vmatprep.mubr.msk.f32.mxu0 %vm486_vm2, %v2119_v62 }
 0xc1e   :  { %6173 = vmatmul.mubr.msk.f32.vlgmr.msra.gmra.mxu0 %vm486_vm2, %v2120_v63 }
 0xcde   :  { %v6174_v0 = vpop.f32.mrf.mxu0 }
 0xce0   :  { %v2193_v1 = vpop.f32.mrf.mxu0 }
 0xce1   :  { %6177 = vmatprep.mubr.msk.f32.mxu1 %vm398_vm1, %v2193_v1 }
 0xce2   :  { %6178 = vmatmul.mubr.msk.f32.vlgmr.msra.gmra.mxu1 %vm398_vm1, %v6174_v0 }
 0xce3   :  { %6192 = vmatpush3.msra.mxu1 %v2451_v32 }
 0xce4   :  { %6193 = vmatprep.subr.mxu1 %v2450_v33 }
 0xce5   :  { %6194 = vmatpush3.msra.mxu1 %v2450_v33 }
 0xce6   :  { %6195 = vmatprep.subr.mxu1 %v2449_v47 }
 0xce7   :  { %6196 = vmatpush3.msra.mxu1 %v2449_v47 }
 0xce8   :  { %6197 = vmatprep.subr.mxu1 %v2448_v48 }
 0xce9   :  { %6198 = vmatpush3.msra.mxu1 %v2448_v48  ;;  %v5508_v48 = vld [vmem:[%s7742_s3 + $0x90] sm:$0xff] }
 0xcea   :  { %6199 = vmatprep.subr.mxu1 %v2447_v49 }
 0xceb   :  { %6200 = vmatpush3.msra.mxu1 %v2447_v49  ;;  %v5507_v49 = vld [vmem:[%s7742_s3 + $0x88] sm:$0xff] }
 0xcec   :  { %6201 = vmatprep.subr.mxu1 %v2446_v50 }
 0xced   :  { %6202 = vmatpush3.msra.mxu1 %v2446_v50  ;;  %v5506_v50 = vld [vmem:[%s7742_s3 + $0x80] sm:$0xff] }
 0xcee   :  { %6203 = vmatprep.subr.mxu1 %v2445_v51 }
 0xcef   :  { %6204 = vmatpush3.msra.mxu1 %v2445_v51  ;;  %v5519_v51 = vld [vmem:[%s7748_s29 + $0x4] ss:$0 sm:$0xff] }
 0xcf0   :  { %6205 = vmatprep.subr.mxu1 %v2444_v52 }
 0xcf1   :  { %6206 = vmatpush3.msra.mxu1 %v2444_v52 }
 0xda2   :  { %v6179_v2 = vpop.f32.mrf.mxu1 }
 0xda3   :  { %v2286_v4 = vadd.f32 %v6179_v2, %v1747_v39  ;;  %v5493_v2 = vld [vmem:[%s7709_s17] ss:$0 sm:$0xff] }
 0xda4   :  { %v2276_v6 = vpop.f32.mrf.mxu1 }
 0xda5   :  { %v2295_v8 = vadd.f32 %v5487_v3, %v2286_v4  ;;  %v2285_v9 = vadd.f32 %v2276_v6, %v1746_v41 }
 0xda7   :  { %v2294_v10 = vadd.f32 %v5487_v3, %v2285_v9  ;;  %v2297_v11 = vadd.f32 %v2295_v8, %v6794_v34 }
 0xda9   :  { %v2303_v12 = vsel %vm90_vm0, %v2297_v11, 0.0  ;;  %v2296_v13 = vadd.f32 %v2294_v10, %v6790_v31  ;;  %v2345_v31 = vld [vmem:[%s7706_s14 + $0x18] sm:$0xff] }
 0xdaa   :  { %2304 = vadd.xlane.f32.xlu1 %v2303_v12  ;;  %6180 = vmatprep.subr.mxu0 %v2345_v31 }
 0xdab   :  { %v2300_v14 = vsel %vm90_vm0, %v2296_v13, 0.0  ;;  %6181 = vmatpush3.msra.mxu0 %v2345_v31  ;;  %v5500_v31 = vld [vmem:[%s7741_s0 + $0x90] sm:$0xff] }
 0xdac   :  { %2301 = vadd.xlane.f32.xlu0 %v2300_v14  ;;  %6182 = vmatprep.subr.mxu0 %v2344_v26 }
 0xdad   :  { %6183 = vmatpush3.msra.mxu0 %v2344_v26  ;;  %v5516_v26 = vld [vmem:[%s7745_s28 + $0x90] sm:$0xff] }
 0xdae   :  { %6184 = vmatprep.subr.mxu0 %v2343_v27 }
 0xdaf   :  { %6185 = vmatpush3.msra.mxu0 %v2343_v27  ;;  %v5499_v27 = vld [vmem:[%s7741_s0 + $0x88] sm:$0xff] }
 0xdb0   :  { %6186 = vmatprep.subr.mxu0 %v2342_v28 }
 0xdb1   :  { %6187 = vmatpush3.msra.mxu0 %v2342_v28  ;;  %v5515_v28 = vld [vmem:[%s7745_s28 + $0x88] sm:$0xff] }
 0xe33   :  { %v2305_v15 = vpop.xlane.xlu1 %2304 }
 0xe34   :  { %v2307_v16 = vmul.f32 0.03125, %v2305_v15 }
 0xe35   :  { %v2302_v17 = vpop.xlane.xlu0 %2301 }
 0xe36   :  { %v2309_v18 = vsub.f32 %v2297_v11, %v2307_v16  ;;  %v2306_v19 = vmul.f32 0.03125, %v2302_v17 }
 0xe38   :  { %v2308_v20 = vsub.f32 %v2296_v13, %v2306_v19  ;;  %v2311_v21 = vmul.f32 %v2309_v18, %v2309_v18 }
 0xe3a   :  { %v2315_v22 = vsel %vm90_vm0, %v2311_v21, 0.0  ;;  %v2310_v23 = vmul.f32 %v2308_v20, %v2308_v20 }
 0xe3b   :  { %2316 = vadd.xlane.f32.xlu1 %v2315_v22 }
 0xe3c   :  { %v2312_v34 = vsel %vm90_vm0, %v2310_v23, 0.0  ;;  %v5501_v23 = vld [vmem:[%s7741_s0 + $0x98] sm:$0xff] }
 0xe3d   :  { %2313 = vadd.xlane.f32.xlu0 %v2312_v34  ;;  %6210 = vmatprep.subr.mxu0 %v5501_v23  ;;  %v5517_v34 = vld [vmem:[%s7745_s28 + $0x98] sm:$0xff] }
 0xe3e   :  { %6232 = vmatprep.subr.mxu1 %v5517_v34 }
 0xec4   :  { %v2317_v29 = vpop.xlane.xlu1 %2316 }
 0xec5   :  { %v2319_v30 = vmul.f32 0.03125, %v2317_v29  ;;  %v5498_v29 = vld [vmem:[%s7741_s0 + $0x80] sm:$0xff] }
 0xec6   :  { %v2314_v35 = vpop.xlane.xlu0 %2313 }
 0xec7   :  { %v2321_v36 = vadd.f32 1e-12, %v2319_v30  ;;  %v2318_v37 = vmul.f32 0.03125, %v2314_v35  ;;  %v5514_v30 = vld [vmem:[%s7745_s28 + $0x80] sm:$0xff]  ;;  %v5509_v35 = vld [vmem:[%s7742_s3 + $0x98] sm:$0xff] }
 0xec9   :  { %6533 = vrsqrt.f32 %v2321_v36  ;;  %v2320_v38 = vadd.f32 1e-12, %v2318_v37 }
 0xecb   :  { %6535 = vrsqrt.f32 %v2320_v38 }
 0xed6   :  { %v6534_v39 = vpop.eup %6533 }
 0xed7   :  { %v2325_v41 = vmul.f32 %v6534_v39, %v2309_v18 }
 0xed8   :  { %v6536_v42 = vpop.eup %6535 }
 0xed9   :  { %v2324_v43 = vmul.f32 %v6536_v42, %v2308_v20  ;;  %v2333_v44 = vmul.f32 %v5488_v40, %v2325_v41 }
 0xedb   :  { %v2332_v46 = vmul.f32 %v5488_v40, %v2324_v43  ;;  %v2341_v25 = vadd.f32 %v5489_v45, %v2333_v44  ;;  %v5496_v43 = vld [vmem:[%s7710_s18] ss:$0 sm:$0xff] }
 0xedd   :  { %v2340_v24 = vadd.f32 %v5489_v45, %v2332_v46 }
 0xedf   :  { %6188 = vmatprep.mubr.msk.f32.mxu0 %vm90_vm0, %v2340_v24 }
 0xee0   :  { %6189 = vmatmul.mubr.msk.f32.vlgmr.msra.gmra.mxu0 %vm90_vm0, %v2341_v25 }
 0xee1   :  { %6211 = vmatpush3.msra.mxu0 %v5501_v23 }
 0xee2   :  { %6212 = vmatprep.subr.mxu0 %v5500_v31 }
 0xee3   :  { %6213 = vmatpush3.msra.mxu0 %v5500_v31 }
 0xee4   :  { %6214 = vmatprep.subr.mxu0 %v5499_v27 }
 0xee5   :  { %6215 = vmatpush3.msra.mxu0 %v5499_v27 }
 0xee6   :  { %6216 = vmatprep.subr.mxu0 %v5498_v29 }
 0xee7   :  { %6217 = vmatpush3.msra.mxu0 %v5498_v29  ;;  %v5532_v29 = vld [vmem:[%s7741_s0 + $0xb8] sm:$0xff] }
 0xee8   :  { %6221 = vmatprep.subr.mxu0 %v5509_v35 }
 0xfa0   :  { %v6190_v54 = vpop.f32.mrf.mxu0 }
 0xfa1   :  { %v2431_v55 = vadd.f32 %v6190_v54, %v5490_v53 }
 0xfa2   :  { %v2425_v5 = vpop.f32.mrf.mxu0 }
 0xfa3   :  { %v2437_v56 = vmul.f32 0.70710677, %v2431_v55  ;;  %v2426_v7 = vadd.f32 %v5490_v53, %v2425_v5  ;;  %v2435_v63 = vmul.f32 0.5, %v2431_v55  ;;  %v5503_v55 = vld [vmem:[%s7746_s6 + $0x4] ss:$0 sm:$0xff] }
 0xfa5   :  { %6537 = verf.f32 %v2437_v56  ;;  %v2436_v57 = vmul.f32 0.70710677, %v2426_v7  ;;  %v2434_v61 = vmul.f32 0.5, %v2426_v7 }
 0xfa7   :  { %6539 = verf.f32 %v2436_v57 }
 0xfb2   :  { %v6538_v58 = vpop.eup %6537 }
 0xfb3   :  { %v2441_v60 = vadd.f32 1.0, %v6538_v58  ;;  %v5511_v58 = vld [vmem:[%s7747_s7 + $0x4] ss:$0 sm:$0xff] }
 0xfb4   :  { %v6540_v59 = vpop.eup %6539 }
 0xfb5   :  { %v2440_v62 = vadd.f32 1.0, %v6540_v59  ;;  %v2443_v1 = vmul.f32 %v2441_v60, %v2435_v63  ;;  %v5540_v63 = vld [vmem:[%s7742_s3 + $0xb8] sm:$0xff] }
 0xfb7   :  { %v2442_v0 = vmul.f32 %v2440_v62, %v2434_v61 }
 0xfb9   :  { %6207 = vmatprep.mubr.msk.f32.mxu1 %vm2459_vm3, %v2442_v0 }
 0xfba   :  { %6208 = vmatmul.mubr.msk.f32.vlgmr.msra.gmra.mxu1 %vm2459_vm3, %v2443_v1  ;;  %v5539_v1 = vld [vmem:[%s7742_s3 + $0xb0] sm:$0xff] }
 0xfbb   :  { %6233 = vmatpush3.msra.mxu1 %v5517_v34 }
 0xfbc   :  { %6234 = vmatprep.subr.mxu1 %v5516_v26 }
 0xfbd   :  { %6235 = vmatpush3.msra.mxu1 %v5516_v26 }
 0xfbe   :  { %6236 = vmatprep.subr.mxu1 %v5515_v28 }
 0xfbf   :  { %6237 = vmatpush3.msra.mxu1 %v5515_v28 }
 0xfc0   :  { %6238 = vmatprep.subr.mxu1 %v5514_v30 }
 0xfc1   :  { %6239 = vmatpush3.msra.mxu1 %v5514_v30 }
0x107a   :  { %v6209_v3 = vpop.f32.mrf.mxu1 }
0x107b   :  { %v2538_v4 = vadd.f32 %v6209_v3, %v5493_v2  ;;  %v5537_v3 = vld [vmem:[%s7742_s3 + $0xa0] sm:$0xff] }
0x107c   :  { %v2532_v6 = vpop.f32.mrf.mxu1 }
0x107d   :  { %v2533_v8 = vadd.f32 %v5493_v2, %v2532_v6  ;;  %v2542_v9 = vadd.f32 %v2538_v4, %v2341_v25  ;;  %v5497_v25 = vld [vmem:[%s7711_s19] ss:$0 sm:$0xff]  ;;  %v5538_v2 = vld [vmem:[%s7742_s3 + $0xa8] sm:$0xff] }
0x107e   :  { %v7262_v6 = vld [vmem:[%s7749_s4 + $0x8] sm:$0xff] }
0x107f   :  { %v2548_v10 = vsel %vm90_vm0, %v2542_v9, 0.0  ;;  %v2541_v11 = vadd.f32 %v2533_v8, %v2340_v24 }
0x1080   :  { %2549 = vadd.xlane.f32.xlu1 %v2548_v10  ;;  %v7268_v10 = vld [vmem:[%s7749_s4] sm:$0xff] }
0x1081   :  { %v2545_v12 = vsel %vm90_vm0, %v2541_v11, 0.0 }
0x1082   :  { %2546 = vadd.xlane.f32.xlu0 %v2545_v12 }
0x1109   :  { %v2550_v13 = vpop.xlane.xlu1 %2549 }
0x110a   :  { %v2552_v14 = vmul.f32 0.03125, %v2550_v13 }
0x110b   :  { %v2547_v15 = vpop.xlane.xlu0 %2546 }
0x110c   :  { %v2554_v16 = vsub.f32 %v2542_v9, %v2552_v14  ;;  %v2551_v17 = vmul.f32 0.03125, %v2547_v15  ;;  %v5542_v14 = vld [vmem:[%s7747_s7 + $0x5] ss:$0 sm:$0xff] }
0x110e   :  { %v2553_v18 = vsub.f32 %v2541_v11, %v2551_v17  ;;  %v2556_v19 = vmul.f32 %v2554_v16, %v2554_v16 }
0x1110   :  { %v2560_v20 = vsel %vm90_vm0, %v2556_v19, 0.0  ;;  %v2555_v21 = vmul.f32 %v2553_v18, %v2553_v18 }
0x1111   :  { %2561 = vadd.xlane.f32.xlu1 %v2560_v20 }
0x1112   :  { %v2557_v22 = vsel %vm90_vm0, %v2555_v21, 0.0 }
0x1113   :  { %2558 = vadd.xlane.f32.xlu0 %v2557_v22 }
0x119a   :  { %v2562_v36 = vpop.xlane.xlu1 %2561 }
0x119b   :  { %v2564_v37 = vmul.f32 0.03125, %v2562_v36 }
0x119c   :  { %v2559_v38 = vpop.xlane.xlu0 %2558 }
0x119d   :  { %v2566_v39 = vadd.f32 1e-12, %v2564_v37  ;;  %v2563_v40 = vmul.f32 0.03125, %v2559_v38 }
0x119f   :  { %6541 = vrsqrt.f32 %v2566_v39  ;;  %v2565_v41 = vadd.f32 1e-12, %v2563_v40  ;;  %v5531_v40 = vld [vmem:[%s7741_s0 + $0xb0] sm:$0xff] }
0x11a1   :  { %6543 = vrsqrt.f32 %v2565_v41  ;;  %v5530_v41 = vld [vmem:[%s7741_s0 + $0xa8] sm:$0xff] }
0x11ac   :  { %v6542_v42 = vpop.eup %6541 }
0x11ad   :  { %v2570_v44 = vmul.f32 %v6542_v42, %v2554_v16  ;;  %v5529_v42 = vld [vmem:[%s7741_s0 + $0xa0] sm:$0xff] }
0x11ae   :  { %v6544_v45 = vpop.eup %6543 }
0x11af   :  { %v2569_v46 = vmul.f32 %v6544_v45, %v2553_v18  ;;  %v2578_v24 = vmul.f32 %v5496_v43, %v2570_v44  ;;  %v5547_v44 = vld [vmem:[%s7745_s28 + $0xb0] sm:$0xff]  ;;  %v5546_v45 = vld [vmem:[%s7745_s28 + $0xa8] sm:$0xff] }
0x11b1   :  { %v2577_v32 = vmul.f32 %v5496_v43, %v2569_v46  ;;  %v7205_v47 = vadd.f32 %v5497_v25, %v2578_v24  ;;  %v5548_v43 = vld [vmem:[%s7745_s28 + $0xb8] sm:$0xff]  ;;  %v5545_v46 = vld [vmem:[%s7745_s28 + $0xa0] sm:$0xff] }
0x11b3   :  { %v7203_v33 = vadd.f32 %v5497_v25, %v2577_v32 }
0x11b5   :  { %6218 = vmatprep.mubr.msk.f32.mxu0 %vm90_vm0, %v7203_v33  ;;  %6240 = vmatprep.mubr.msk.f32.mxu1 %vm90_vm0, %v7203_v33 }
0x11b6   :  { %6219 = vmatmul.mubr.msk.f32.vlgmr.msra.gmra.mxu0 %vm90_vm0, %v7205_v47  ;;  %6241 = vmatmul.mubr.msk.f32.vlgmr.msra.gmra.mxu1 %vm90_vm0, %v7205_v47 }
0x11b7   :  { %6222 = vmatpush3.msra.mxu0 %v5509_v35  ;;  %6229 = vmatprep.mubr.msk.f32.mxu0 %vm90_vm0, %v7203_v33 }
0x11b8   :  { %6223 = vmatprep.subr.mxu0 %v5508_v48 }
0x11b9   :  { %6224 = vmatpush3.msra.mxu0 %v5508_v48  ;;  %v5534_v48 = vld [vmem:[%s7746_s6 + $0x5] ss:$0 sm:$0xff] }
0x11ba   :  { %6225 = vmatprep.subr.mxu0 %v5507_v49 }
0x11bb   :  { %6226 = vmatpush3.msra.mxu0 %v5507_v49 }
0x11bc   :  { %6227 = vmatprep.subr.mxu0 %v5506_v50 }
0x11bd   :  { %6228 = vmatpush3.msra.mxu0 %v5506_v50 }
0x11be   :  { %6230 = vmatmul.mubr.msk.f32.vlgmr.msra.gmra.mxu0 %vm90_vm0, %v7205_v47 }
0x1276   :  { %v6220_v52 = vpop.f32.mrf.mxu0  ;;  %v6242_v53 = vpop.f32.mrf.mxu1 }
0x1277   :  { %v2854_v54 = vadd.f32 %v6242_v53, %v5519_v51  ;;  %v2678_v0 = vadd.f32 %v6220_v52, %v5503_v55  ;;  %v5550_v52 = vld [vmem:[%s7748_s29 + $0x5] ss:$0 sm:$0xff] }
0x1278   :  { %v2672_v5 = vpop.f32.mrf.mxu0  ;;  %v2848_v56 = vpop.f32.mrf.mxu1 }
0x1279   :  { %v2673_v7 = vadd.f32 %v5503_v55, %v2672_v5  ;;  %v2849_v57 = vadd.f32 %v5519_v51, %v2848_v56  ;;  %6250 = vmatprep.subr.mxu1 %v2854_v54 }
0x127a   :  { %6251 = vmatpush3.msra.mxu1 %v2854_v54 }
0x127b   :  { %6247 = vmatprep.mubr.msk.f32.mxu0 %vm398_vm1, %v2673_v7  ;;  %6252 = vmatprep.subr.mxu1 %v2849_v57 }
0x127c   :  { %6253 = vmatpush3.msra.mxu1 %v2849_v57 }
0x127d   :  { %6257 = vmatprep.subr.mxu1 %v5532_v29 }
0x127e   :  { %v6231_v59 = vpop.f32.mrf.mxu0 }
0x127f   :  { %v2766_v60 = vadd.f32 %v6231_v59, %v5511_v58 }
0x1280   :  { %v2760_v61 = vpop.f32.mrf.mxu0 }
0x1281   :  { %v2761_v62 = vadd.f32 %v5511_v58, %v2760_v61  ;;  %6243 = vmatprep.subr.msk.mxu0 %vm398_vm1, %v2766_v60 }
0x1282   :  { %6244 = vmatpush3.xpose.msk.msra.mxu0 %vm398_vm1, %v2766_v60 }
0x1283   :  { %6245 = vmatprep.subr.msk.mxu0 %vm398_vm1, %v2761_v62 }
0x1286   :  { %6246 = vmatpush3.xpose.msk.msra.mxu0 %vm398_vm1, %v2761_v62 }
0x1287   :  { %6268 = vmatprep.subr.mxu0 %v5540_v63 }
0x1289   :  { %6248 = vmatmul.mubr.msk.f32.vlgmr.msra.gmra.mxu0 %vm398_vm1, %v2678_v0 }
0x128a   :  { %6269 = vmatpush3.msra.mxu0 %v5540_v63  ;;  %6276 = vmatprep.mubr.msk.f32.mxu0 %vm90_vm0, %v7203_v33 }
0x128b   :  { %6270 = vmatprep.subr.mxu0 %v5539_v1 }
0x128c   :  { %6271 = vmatpush3.msra.mxu0 %v5539_v1 }
0x128d   :  { %6272 = vmatprep.subr.mxu0 %v5538_v2 }
0x128e   :  { %6273 = vmatpush3.msra.mxu0 %v5538_v2 }
0x128f   :  { %6274 = vmatprep.subr.mxu0 %v5537_v3 }
0x1290   :  { %6275 = vmatpush3.msra.mxu0 %v5537_v3 }
0x1291   :  { %6277 = vmatmul.mubr.msk.f32.vlgmr.msra.gmra.mxu0 %vm90_vm0, %v7205_v47 }
0x1349   :  { %v6249_v4 = vpop.f32.mrf.mxu0 }
0x134a   :  { %v2941_v8 = vadd.f32 %v7262_v6, %v6249_v4 }
0x134b   :  { %v2935_v9 = vpop.f32.mrf.mxu0 }
0x134c   :  { %v2936_v11 = vadd.f32 %v7268_v10, %v2935_v9  ;;  %v2947_v12 = vsel %vm486_vm2, %v2941_v8, -inf }
0x134d   :  { %2948 = vmax.xlane.f32.xlu1 %v2947_v12  ;;  %v5559_v12 = vld [vmem:[%s7750_s2 + $0x28] sm:$0xff] }
0x134e   :  { %v2944_v13 = vsel %vm486_vm2, %v2936_v11, -inf }
0x134f   :  { %2945 = vmax.xlane.f32.xlu0 %v2944_v13 }
0x1351   :  { %v6278_v15 = vpop.f32.mrf.mxu0 }
0x1352   :  { %v3222_v16 = vadd.f32 %v6278_v15, %v5542_v14 }
0x1353   :  { %v3216_v17 = vpop.f32.mrf.mxu0 }
0x1354   :  { %v3217_v18 = vadd.f32 %v5542_v14, %v3216_v17  ;;  %6290 = vmatprep.subr.msk.mxu0 %vm398_vm1, %v3222_v16 }
0x1355   :  { %6291 = vmatpush3.xpose.msk.msra.mxu0 %vm398_vm1, %v3222_v16 }
0x1356   :  { %6292 = vmatprep.subr.msk.mxu0 %vm398_vm1, %v3217_v18 }
0x1359   :  { %6293 = vmatpush3.xpose.msk.msra.mxu0 %vm398_vm1, %v3217_v18 }
0x135a   :  { %6304 = vmatprep.subr.mxu0 %v5559_v12 }
0x13d6   :  { %v2949_v19 = vpop.xlane.xlu1 %2948 }
0x13d7   :  { %v2951_v20 = vsub.f32 %v2941_v8, %v2949_v19  ;;  %v5575_v19 = vld [vmem:[%s7742_s3 + $0xd8] sm:$0xff] }
0x13d8   :  { %v2946_v21 = vpop.xlane.xlu0 %2945 }
0x13d9   :  { %v2954_v22 = vmul.f32 1.442695, %v2951_v20  ;;  %v2950_v23 = vsub.f32 %v2936_v11, %v2946_v21  ;;  %v5528_v11 = vld [vmem:[%s7750_s2 + $0x20] sm:$0xff]  ;;  %v5574_v20 = vld [vmem:[%s7742_s3 + $0xd0] sm:$0xff]  ;;  %v5573_v21 = vld [vmem:[%s7742_s3 + $0xc8] sm:$0xff] }
0x13db   :  { %6545 = vpow2.f32 %v2954_v22  ;;  %v2952_v34 = vmul.f32 1.442695, %v2950_v23  ;;  %v5572_v22 = vld [vmem:[%s7742_s3 + $0xc0] sm:$0xff]  ;;  %v5567_v23 = vld [vmem:[%s7741_s0 + $0xd8] sm:$0xff] }
0x13dd   :  { %6547 = vpow2.f32 %v2952_v34 }
0x13e8   :  { %v6546_v31 = vpop.eup %6545 }
0x13e9   :  { %v2959_v26 = vsel %vm486_vm2, %v6546_v31, 0.0 }
0x13ea   :  { %v6548_v27 = vpop.eup %6547  ;;  %2960 = vadd.xlane.f32.xlu1 %v2959_v26  ;;  %v5566_v26 = vld [vmem:[%s7741_s0 + $0xd0] sm:$0xff] }
0x13eb   :  { %v2956_v28 = vsel %vm486_vm2, %v6548_v27, 0.0 }
0x13ec   :  { %2957 = vadd.xlane.f32.xlu0 %v2956_v28 }
0x1473   :  { %v2961_v30 = vpop.xlane.xlu1 %2960 }
0x1474   :  { %6549 = vrcp.f32 %v2961_v30  ;;  %v5583_v30 = vld [vmem:[%s7745_s28 + $0xd8] sm:$0xff] }
0x1475   :  { %v2958_v35 = vpop.xlane.xlu0 %2957 }
0x1476   :  { %6551 = vrcp.f32 %v2958_v35 }
0x1481   :  { %v6550_v36 = vpop.eup %6549 }
0x1482   :  { %v2965_v39 = vmul.f32 %v6550_v36, %v6546_v31  ;;  %v5577_v36 = vld [vmem:[%s7747_s7 + $0x6] ss:$0 sm:$0xff] }
0x1483   :  { %v6552_v37 = vpop.eup %6551 }
0x1484   :  { %v2964_v38 = vmul.f32 %v6552_v37, %v6548_v27  ;;  %v5565_v27 = vld [vmem:[%s7741_s0 + $0xc8] sm:$0xff]  ;;  %v5582_v37 = vld [vmem:[%s7745_s28 + $0xd0] sm:$0xff] }
0x1486   :  { %6254 = vmatprep.mubr.msk.f32.mxu1 %vm486_vm2, %v2964_v38 }
0x1487   :  { %6255 = vmatmul.mubr.msk.f32.vlgmr.msra.gmra.mxu1 %vm486_vm2, %v2965_v39 }
0x1488   :  { %6258 = vmatpush3.msra.mxu1 %v5532_v29  ;;  %6265 = vmatprep.mubr.msk.f32.mxu1 %vm90_vm0, %v7203_v33  ;;  %v5564_v29 = vld [vmem:[%s7741_s0 + $0xc0] sm:$0xff] }
0x1489   :  { %6259 = vmatprep.subr.mxu1 %v5531_v40 }
0x148a   :  { %6260 = vmatpush3.msra.mxu1 %v5531_v40  ;;  %v5581_v40 = vld [vmem:[%s7745_s28 + $0xc8] sm:$0xff] }
0x148b   :  { %6261 = vmatprep.subr.mxu1 %v5530_v41 }
0x148c   :  { %6262 = vmatpush3.msra.mxu1 %v5530_v41 }
0x148d   :  { %6263 = vmatprep.subr.mxu1 %v5529_v42 }
0x148e   :  { %6264 = vmatpush3.msra.mxu1 %v5529_v42 }
0x148f   :  { %6266 = vmatmul.mubr.msk.f32.vlgmr.msra.gmra.mxu1 %vm90_vm0, %v7205_v47  ;;  %6279 = vmatprep.subr.mxu1 %v5548_v43 }
0x1490   :  { %6280 = vmatpush3.msra.mxu1 %v5548_v43  ;;  %6287 = vmatprep.mubr.msk.f32.mxu1 %vm90_vm0, %v7203_v33  ;;  %v5580_v43 = vld [vmem:[%s7745_s28 + $0xc0] sm:$0xff] }
0x1491   :  { %6281 = vmatprep.subr.mxu1 %v5547_v44 }
0x1492   :  { %6282 = vmatpush3.msra.mxu1 %v5547_v44 }
0x1493   :  { %6283 = vmatprep.subr.mxu1 %v5546_v45 }
0x1494   :  { %6284 = vmatpush3.msra.mxu1 %v5546_v45 }
0x1495   :  { %6285 = vmatprep.subr.mxu1 %v5545_v46 }
0x1496   :  { %6286 = vmatpush3.msra.mxu1 %v5545_v46 }
0x1497   :  { %6288 = vmatmul.mubr.msk.f32.vlgmr.msra.gmra.mxu1 %vm90_vm0, %v7205_v47 }
0x1547   :  { %v6256_v24 = vpop.f32.mrf.mxu1 }
0x1549   :  { %v3038_v25 = vpop.f32.mrf.mxu1 }
0x154f   :  { %v6267_v32 = vpop.f32.mrf.mxu1 }
0x1550   :  { %v3134_v51 = vadd.f32 %v6267_v32, %v5534_v48 }
0x1551   :  { %v3128_v49 = vpop.f32.mrf.mxu1 }
0x1552   :  { %v3129_v50 = vadd.f32 %v5534_v48, %v3128_v49  ;;  %v5585_v49 = vld [vmem:[%s7748_s29 + $0x6] ss:$0 sm:$0xff] }
0x1554   :  { %6294 = vmatprep.mubr.msk.f32.mxu0 %vm398_vm1, %v3129_v50 }
0x1555   :  { %6295 = vmatmul.mubr.msk.f32.vlgmr.msra.gmra.mxu0 %vm398_vm1, %v3134_v51 }
0x1556   :  { %6305 = vmatpush3.msra.mxu0 %v5559_v12 }
0x1557   :  { %v6289_v53 = vpop.f32.mrf.mxu1  ;;  %6314 = vmatprep.subr.mxu0 %v5567_v23 }
0x1558   :  { %v3310_v54 = vadd.f32 %v6289_v53, %v5550_v52 }
0x1559   :  { %v3304_v55 = vpop.f32.mrf.mxu1 }
0x155a   :  { %v3305_v5 = vadd.f32 %v5550_v52, %v3304_v55  ;;  %6297 = vmatprep.subr.mxu1 %v3310_v54 }
0x155b   :  { %6298 = vmatpush3.msra.mxu1 %v3310_v54 }
0x155c   :  { %6299 = vmatprep.subr.mxu1 %v3305_v5 }
0x155d   :  { %6300 = vmatpush3.msra.mxu1 %v3305_v5 }
0x155e   :  { %6309 = vmatprep.subr.mxu1 %v5528_v11 }
0x1615   :  { %v6296_v56 = vpop.f32.mrf.mxu0 }
0x1616   :  { %v3397_v7 = vadd.f32 %v7262_v6, %v6296_v56 }
0x1617   :  { %v3391_v57 = vpop.f32.mrf.mxu0 }
0x1618   :  { %v3392_v58 = vadd.f32 %v7268_v10, %v3391_v57  ;;  %v3403_v59 = vsel %vm486_vm2, %v3397_v7, -inf }
0x1619   :  { %3404 = vmax.xlane.f32.xlu1 %v3403_v59 }
0x161a   :  { %v3400_v60 = vsel %vm486_vm2, %v3392_v58, -inf }
0x161b   :  { %3401 = vmax.xlane.f32.xlu0 %v3400_v60 }
0x16a2   :  { %v3405_v61 = vpop.xlane.xlu1 %3404 }
0x16a3   :  { %v3407_v62 = vsub.f32 %v3397_v7, %v3405_v61 }
0x16a4   :  { %v3402_v63 = vpop.xlane.xlu0 %3401 }
0x16a5   :  { %v3410_v0 = vmul.f32 1.442695, %v3407_v62  ;;  %v3406_v1 = vsub.f32 %v3392_v58, %v3402_v63 }
0x16a7   :  { %6553 = vpow2.f32 %v3410_v0  ;;  %v3408_v2 = vmul.f32 1.442695, %v3406_v1 }
0x16a9   :  { %6555 = vpow2.f32 %v3408_v2 }
0x16b4   :  { %v6554_v3 = vpop.eup %6553 }
0x16b5   :  { %v3415_v4 = vsel %vm486_vm2, %v6554_v3, 0.0 }
0x16b6   :  { %v6556_v8 = vpop.eup %6555  ;;  %3416 = vadd.xlane.f32.xlu1 %v3415_v4  ;;  %v5600_v4 = vld [vmem:[%s7741_s0 + $0xf8] sm:$0xff] }
0x16b7   :  { %v3412_v9 = vsel %vm486_vm2, %v6556_v8, 0.0 }
0x16b8   :  { %3413 = vadd.xlane.f32.xlu0 %v3412_v9 }
0x173f   :  { %v3417_v13 = vpop.xlane.xlu1 %3416 }
0x1740   :  { %6557 = vrcp.f32 %v3417_v13 }
0x1741   :  { %v3414_v14 = vpop.xlane.xlu0 %3413 }
0x1742   :  { %6559 = vrcp.f32 %v3414_v14 }
0x174d   :  { %v6558_v15 = vpop.eup %6557 }
0x174e   :  { %v3421_v18 = vmul.f32 %v6558_v15, %v6554_v3 }
0x174f   :  { %v6560_v16 = vpop.eup %6559 }
0x1750   :  { %v3420_v17 = vmul.f32 %v6560_v16, %v6556_v8  ;;  %v5594_v8 = vld [vmem:[%s7750_s2 + $0x30] sm:$0xff] }
0x1751   :  { %v5599_v16 = vld [vmem:[%s7741_s0 + $0xf0] sm:$0xff] }
0x1752   :  { %6301 = vmatprep.mubr.msk.f32.mxu1 %vm486_vm2, %v3420_v17  ;;  %v5598_v17 = vld [vmem:[%s7741_s0 + $0xe8] sm:$0xff] }
0x1753   :  { %6302 = vmatmul.mubr.msk.f32.vlgmr.msra.gmra.mxu1 %vm486_vm2, %v3421_v18  ;;  %v5597_v18 = vld [vmem:[%s7741_s0 + $0xe0] sm:$0xff] }
0x1754   :  { %6311 = vmatprep.mubr.msk.f32.mxu1 %vm398_vm1, %v3038_v25  ;;  %6310 = vmatpush3.msra.mxu1 %v5528_v11 }
0x1755   :  { %6325 = vmatprep.subr.mxu1 %v5575_v19 }
0x1757   :  { %6312 = vmatmul.mubr.msk.f32.vlgmr.msra.gmra.mxu1 %vm398_vm1, %v6256_v24  ;;  %v5569_v24 = vld [vmem:[%s7746_s6 + $0x6] ss:$0 sm:$0xff] }
0x1758   :  { %6326 = vmatpush3.msra.mxu1 %v5575_v19  ;;  %6333 = vmatprep.mubr.msk.f32.mxu1 %vm90_vm0, %v7203_v33  ;;  %v5616_v19 = vld [vmem:[%s7745_s28 + $0xf8] sm:$0xff] }
0x1759   :  { %6327 = vmatprep.subr.mxu1 %v5574_v20 }
0x175a   :  { %6328 = vmatpush3.msra.mxu1 %v5574_v20  ;;  %v5615_v20 = vld [vmem:[%s7745_s28 + $0xf0] sm:$0xff] }
0x175b   :  { %6329 = vmatprep.subr.mxu1 %v5573_v21 }
0x175c   :  { %6330 = vmatpush3.msra.mxu1 %v5573_v21  ;;  %v5614_v21 = vld [vmem:[%s7745_s28 + $0xe8] sm:$0xff] }
0x175d   :  { %6331 = vmatprep.subr.mxu1 %v5572_v22 }
0x175e   :  { %6332 = vmatpush3.msra.mxu1 %v5572_v22  ;;  %v5613_v22 = vld [vmem:[%s7745_s28 + $0xe0] sm:$0xff] }
0x175f   :  { %6334 = vmatmul.mubr.msk.f32.vlgmr.msra.gmra.mxu1 %vm90_vm0, %v7205_v47 }
0x1813   :  { %v6303_v34 = vpop.f32.mrf.mxu1 }
0x1815   :  { %v3494_v31 = vpop.f32.mrf.mxu1 }
0x1816   :  { %6306 = vmatprep.mubr.msk.f32.mxu0 %vm398_vm1, %v3494_v31 }
0x1817   :  { %6307 = vmatmul.mubr.msk.f32.vlgmr.msra.gmra.mxu0 %vm398_vm1, %v6303_v34  ;;  %v7369_v28 = vpop.f32.mrf.mxu1 }
0x1818   :  { %6315 = vmatpush3.msra.mxu0 %v5567_v23  ;;  %6322 = vmatprep.mubr.msk.f32.mxu0 %vm90_vm0, %v7203_v33  ;;  %v5608_v23 = vld [vmem:[%s7742_s3 + $0xf8] sm:$0xff] }
0x1819   :  { %6316 = vmatprep.subr.mxu0 %v5566_v26  ;;  %v7377_v35 = vpop.f32.mrf.mxu1 }
0x181a   :  { %6317 = vmatpush3.msra.mxu0 %v5566_v26  ;;  %v5607_v26 = vld [vmem:[%s7742_s3 + $0xf0] sm:$0xff] }
0x181b   :  { %6318 = vmatprep.subr.mxu0 %v5565_v27 }
0x181c   :  { %6319 = vmatpush3.msra.mxu0 %v5565_v27  ;;  %v5606_v27 = vld [vmem:[%s7742_s3 + $0xe8] sm:$0xff] }
0x181d   :  { %6320 = vmatprep.subr.mxu0 %v5564_v29 }
0x181e   :  { %6321 = vmatpush3.msra.mxu0 %v5564_v29  ;;  %v5602_v29 = vld [vmem:[%s7746_s6 + $0x7] ss:$0 sm:$0xff] }
0x181f   :  { %6323 = vmatmul.mubr.msk.f32.vlgmr.msra.gmra.mxu0 %vm90_vm0, %v7205_v47  ;;  %v6335_v38 = vpop.f32.mrf.mxu1  ;;  %6336 = vmatprep.subr.mxu0 %v5583_v30 }
0x1820   :  { %v3840_v39 = vadd.f32 %v6335_v38, %v5577_v36  ;;  %6337 = vmatpush3.msra.mxu0 %v5583_v30  ;;  %6344 = vmatprep.mubr.msk.f32.mxu0 %vm90_vm0, %v7203_v33  ;;  %v5605_v30 = vld [vmem:[%s7742_s3 + $0xe0] sm:$0xff] }
0x1821   :  { %v3834_v41 = vpop.f32.mrf.mxu1  ;;  %6338 = vmatprep.subr.mxu0 %v5582_v37 }
0x1822   :  { %v3835_v42 = vadd.f32 %v5577_v36, %v3834_v41  ;;  %6339 = vmatpush3.msra.mxu0 %v5582_v37  ;;  %6347 = vmatprep.subr.msk.mxu1 %vm398_vm1, %v3840_v39 }
0x1823   :  { %6340 = vmatprep.subr.mxu0 %v5581_v40  ;;  %6348 = vmatpush3.xpose.msk.msra.mxu1 %vm398_vm1, %v3840_v39 }
0x1824   :  { %6341 = vmatpush3.msra.mxu0 %v5581_v40  ;;  %6349 = vmatprep.subr.msk.mxu1 %vm398_vm1, %v3835_v42  ;;  %v5618_v40 = vld [vmem:[%s7748_s29 + $0x7] ss:$0 sm:$0xff] }
0x1825   :  { %6342 = vmatprep.subr.mxu0 %v5580_v43 }
0x1826   :  { %6343 = vmatpush3.msra.mxu0 %v5580_v43 }
0x1827   :  { %6345 = vmatmul.mubr.msk.f32.vlgmr.msra.gmra.mxu0 %vm90_vm0, %v7205_v47  ;;  %6350 = vmatpush3.xpose.msk.msra.mxu1 %vm398_vm1, %v3835_v42 }
0x1828   :  { %6361 = vmatprep.subr.mxu1 %v5594_v8 }
0x18d7   :  { %v7401_v44 = vpop.f32.mrf.mxu0 }
0x18d9   :  { %v7403_v45 = vpop.f32.mrf.mxu0 }
0x18df   :  { %v6324_v46 = vpop.f32.mrf.mxu0 }
0x18e0   :  { %v3752_v48 = vadd.f32 %v6324_v46, %v5569_v24 }
0x18e1   :  { %v3746_v25 = vpop.f32.mrf.mxu0 }
0x18e2   :  { %v3747_v32 = vadd.f32 %v5569_v24, %v3746_v25  ;;  %v3664_v24 = vadd.f32 %v7369_v28, %v7401_v44 }
0x18e4   :  { %6351 = vmatprep.mubr.msk.f32.mxu1 %vm398_vm1, %v3747_v32  ;;  %v3659_v32 = vadd.f32 %v7377_v35, %v7403_v45 }
0x18e5   :  { %6352 = vmatmul.mubr.msk.f32.vlgmr.msra.gmra.mxu1 %vm398_vm1, %v3752_v48 }
0x18e6   :  { %6362 = vmatpush3.msra.mxu1 %v5594_v8 }
0x18e7   :  { %v6346_v50 = vpop.f32.mrf.mxu0  ;;  %6377 = vmatprep.subr.mxu1 %v5608_v23 }
0x18e8   :  { %v3928_v51 = vadd.f32 %v6346_v50, %v5585_v49 }
0x18e9   :  { %v3922_v52 = vpop.f32.mrf.mxu0 }
0x18ea   :  { %v3923_v53 = vadd.f32 %v5585_v49, %v3922_v52  ;;  %6354 = vmatprep.subr.mxu0 %v3928_v51 }
0x18eb   :  { %6355 = vmatpush3.msra.mxu0 %v3928_v51  ;;  %v5610_v51 = vld [vmem:[%s7747_s7 + $0x7] ss:$0 sm:$0xff] }
0x18ec   :  { %6356 = vmatprep.subr.mxu0 %v3923_v53 }
0x18ed   :  { %6357 = vmatpush3.msra.mxu0 %v3923_v53 }
0x18ee   :  { %6366 = vmatprep.subr.mxu0 %v5600_v4 }
0x19a5   :  { %v6353_v54 = vpop.f32.mrf.mxu1 }
0x19a6   :  { %v4015_v55 = vadd.f32 %v7262_v6, %v6353_v54 }
0x19a7   :  { %v4009_v5 = vpop.f32.mrf.mxu1 }
0x19a8   :  { %v4010_v56 = vadd.f32 %v7268_v10, %v4009_v5  ;;  %v4021_v7 = vsel %vm486_vm2, %v4015_v55, -inf }
0x19a9   :  { %4022 = vmax.xlane.f32.xlu1 %v4021_v7 }
0x19aa   :  { %v4018_v57 = vsel %vm486_vm2, %v4010_v56, -inf }
0x19ab   :  { %4019 = vmax.xlane.f32.xlu0 %v4018_v57 }
0x1a32   :  { %v4023_v58 = vpop.xlane.xlu1 %4022 }
0x1a33   :  { %v4025_v59 = vsub.f32 %v4015_v55, %v4023_v58 }
0x1a34   :  { %v4020_v60 = vpop.xlane.xlu0 %4019 }
0x1a35   :  { %v4028_v61 = vmul.f32 1.442695, %v4025_v59  ;;  %v4024_v62 = vsub.f32 %v4010_v56, %v4020_v60 }
0x1a37   :  { %6561 = vpow2.f32 %v4028_v61  ;;  %v4026_v63 = vmul.f32 1.442695, %v4024_v62 }
0x1a39   :  { %6563 = vpow2.f32 %v4026_v63 }
0x1a44   :  { %v6562_v0 = vpop.eup %6561 }
0x1a45   :  { %v4033_v1 = vsel %vm486_vm2, %v6562_v0, 0.0 }
0x1a46   :  { %v6564_v2 = vpop.eup %6563  ;;  %4034 = vadd.xlane.f32.xlu1 %v4033_v1 }
0x1a47   :  { %v4030_v3 = vsel %vm486_vm2, %v6564_v2, 0.0 }
0x1a48   :  { %4031 = vadd.xlane.f32.xlu0 %v4030_v3 }
0x1acf   :  { %v4035_v9 = vpop.xlane.xlu1 %4034 }
0x1ad0   :  { %6565 = vrcp.f32 %v4035_v9 }
0x1ad1   :  { %v4032_v11 = vpop.xlane.xlu0 %4031 }
0x1ad2   :  { %6567 = vrcp.f32 %v4032_v11 }
0x1add   :  { %v6566_v12 = vpop.eup %6565 }
0x1ade   :  { %v4039_v15 = vmul.f32 %v6566_v12, %v6562_v0  ;;  %v5627_v0 = vld [vmem:[%s7750_s2 + $0x38] sm:$0xff] }
0x1adf   :  { %v6568_v13 = vpop.eup %6567 }
0x1ae0   :  { %v4038_v14 = vmul.f32 %v6568_v13, %v6564_v2 }
0x1ae2   :  { %6358 = vmatprep.mubr.msk.f32.mxu0 %vm486_vm2, %v4038_v14  ;;  %v5631_v14 = vld [vmem:[%s7703_s11 + $0x1] ss:$0 sm:$0xff] }
0x1ae3   :  { %6359 = vmatmul.mubr.msk.f32.vlgmr.msra.gmra.mxu0 %vm486_vm2, %v4039_v15 }
0x1ae4   :  { %6367 = vmatpush3.msra.mxu0 %v5600_v4  ;;  %6374 = vmatprep.mubr.msk.f32.mxu0 %vm90_vm0, %v7203_v33 }
0x1ae5   :  { %6368 = vmatprep.subr.mxu0 %v5599_v16 }
0x1ae6   :  { %6369 = vmatpush3.msra.mxu0 %v5599_v16 }
0x1ae7   :  { %6370 = vmatprep.subr.mxu0 %v5598_v17 }
0x1ae8   :  { %6371 = vmatpush3.msra.mxu0 %v5598_v17 }
0x1ae9   :  { %6372 = vmatprep.subr.mxu0 %v5597_v18 }
0x1aea   :  { %6373 = vmatpush3.msra.mxu0 %v5597_v18 }
0x1aeb   :  { %6375 = vmatmul.mubr.msk.f32.vlgmr.msra.gmra.mxu0 %vm90_vm0, %v7205_v47  ;;  %6388 = vmatprep.subr.mxu0 %v5616_v19 }
0x1aec   :  { %6389 = vmatpush3.msra.mxu0 %v5616_v19  ;;  %6396 = vmatprep.mubr.msk.f32.mxu0 %vm90_vm0, %v7203_v33 }
0x1aed   :  { %6390 = vmatprep.subr.mxu0 %v5615_v20 }
0x1aee   :  { %6391 = vmatpush3.msra.mxu0 %v5615_v20 }
0x1aef   :  { %6392 = vmatprep.subr.mxu0 %v5614_v21 }
0x1af0   :  { %6393 = vmatpush3.msra.mxu0 %v5614_v21 }
0x1af1   :  { %6394 = vmatprep.subr.mxu0 %v5613_v22 }
0x1af2   :  { %6395 = vmatpush3.msra.mxu0 %v5613_v22 }
0x1af3   :  { %6397 = vmatmul.mubr.msk.f32.vlgmr.msra.gmra.mxu0 %vm90_vm0, %v7205_v47 }
0x1ba3   :  { %v6360_v34 = vpop.f32.mrf.mxu0 }
0x1ba5   :  { %v4112_v31 = vpop.f32.mrf.mxu0 }
0x1ba6   :  { %6363 = vmatprep.mubr.msk.f32.mxu1 %vm398_vm1, %v4112_v31 }
0x1ba7   :  { %6364 = vmatmul.mubr.msk.f32.vlgmr.msra.gmra.mxu1 %vm398_vm1, %v6360_v34 }
0x1ba8   :  { %6378 = vmatpush3.msra.mxu1 %v5608_v23  ;;  %6385 = vmatprep.mubr.msk.f32.mxu1 %vm90_vm0, %v7203_v33 }
0x1ba9   :  { %6379 = vmatprep.subr.mxu1 %v5607_v26 }
0x1baa   :  { %6380 = vmatpush3.msra.mxu1 %v5607_v26 }
0x1bab   :  { %v6376_v36 = vpop.f32.mrf.mxu0  ;;  %6381 = vmatprep.subr.mxu1 %v5606_v27 }
0x1bac   :  { %v4291_v37 = vadd.f32 %v6376_v36, %v5602_v29  ;;  %6382 = vmatpush3.msra.mxu1 %v5606_v27 }
0x1bad   :  { %v4285_v38 = vpop.f32.mrf.mxu0  ;;  %6383 = vmatprep.subr.mxu1 %v5605_v30 }
0x1bae   :  { %v4286_v39 = vadd.f32 %v5602_v29, %v4285_v38  ;;  %6384 = vmatpush3.msra.mxu1 %v5605_v30 }
0x1baf   :  { %6386 = vmatmul.mubr.msk.f32.vlgmr.msra.gmra.mxu1 %vm90_vm0, %v7205_v47 }
0x1bb0   :  { %6403 = vmatprep.mubr.msk.f32.mxu1 %vm398_vm1, %v4286_v39  ;;  %v5638_v39 = vld [vmem:[%s7706_s14 + $0x30] sm:$0xff] }
0x1bb3   :  { %v6398_v41 = vpop.f32.mrf.mxu0 }
0x1bb4   :  { %v4467_v42 = vadd.f32 %v6398_v41, %v5618_v40  ;;  %v5636_v41 = vld [vmem:[%s7706_s14 + $0x20] sm:$0xff] }
0x1bb5   :  { %v4461_v43 = vpop.f32.mrf.mxu0 }
0x1bb6   :  { %v4462_v46 = vadd.f32 %v5618_v40, %v4461_v43  ;;  %6406 = vmatprep.subr.mxu0 %v4467_v42  ;;  %v5637_v40 = vld [vmem:[%s7706_s14 + $0x28] sm:$0xff] }
0x1bb7   :  { %6407 = vmatpush3.msra.mxu0 %v4467_v42 }
0x1bb8   :  { %6408 = vmatprep.subr.mxu0 %v4462_v46 }
0x1bb9   :  { %6409 = vmatpush3.msra.mxu0 %v4462_v46 }
0x1c67   :  { %v6365_v25 = vpop.f32.mrf.mxu1 }
0x1c68   :  { %v4205_v48 = vadd.f32 %v6365_v25, %v3664_v24 }
0x1c69   :  { %v4195_v49 = vpop.f32.mrf.mxu1 }
0x1c6a   :  { %v4204_v50 = vadd.f32 %v4195_v49, %v3659_v32  ;;  %v5634_v49 = vld [vmem:[%s7704_s12 + $0x1] ss:$0 sm:$0xff] }
0x1c6f   :  { %v6387_v52 = vpop.f32.mrf.mxu1 }
0x1c70   :  { %v4379_v53 = vadd.f32 %v6387_v52, %v5610_v51 }
0x1c71   :  { %v4373_v54 = vpop.f32.mrf.mxu1 }
0x1c72   :  { %v4374_v55 = vadd.f32 %v5610_v51, %v4373_v54  ;;  %6399 = vmatprep.subr.msk.mxu1 %vm398_vm1, %v4379_v53  ;;  %v5635_v54 = vld [vmem:[%s7705_s13 + $0x1] ss:$0 sm:$0xff] }
0x1c73   :  { %6400 = vmatpush3.xpose.msk.msra.mxu1 %vm398_vm1, %v4379_v53 }
0x1c74   :  { %6401 = vmatprep.subr.msk.mxu1 %vm398_vm1, %v4374_v55 }
0x1c77   :  { %6402 = vmatpush3.xpose.msk.msra.mxu1 %vm398_vm1, %v4374_v55 }
0x1c78   :  { %6413 = vmatprep.subr.mxu1 %v5627_v0 }
0x1c7a   :  { %6404 = vmatmul.mubr.msk.f32.vlgmr.msra.gmra.mxu1 %vm398_vm1, %v4291_v37 }
0x1c7b   :  { %6414 = vmatpush3.msra.mxu1 %v5627_v0 }
0x1d3a   :  { %v6405_v28 = vpop.f32.mrf.mxu1 }
0x1d3b   :  { %v4554_v35 = vadd.f32 %v7262_v6, %v6405_v28 }
0x1d3c   :  { %v4548_v44 = vpop.f32.mrf.mxu1 }
0x1d3d   :  { %v4549_v45 = vadd.f32 %v7268_v10, %v4548_v44  ;;  %v4560_v5 = vsel %vm486_vm2, %v4554_v35, -inf  ;;  %v5651_v44 = vld [vmem:[%s7708_s16 + $0x78] sm:$0xff] }
0x1d3e   :  { %4561 = vmax.xlane.f32.xlu1 %v4560_v5  ;;  %6429 = vmatprep.subr.mxu1 %v5651_v44  ;;  %v5649_v5 = vld [vmem:[%s7708_s16 + $0x68] sm:$0xff] }
0x1d3f   :  { %v4557_v56 = vsel %vm486_vm2, %v4549_v45, -inf }
0x1d40   :  { %4558 = vmax.xlane.f32.xlu0 %v4557_v56  ;;  %v5648_v56 = vld [vmem:[%s7708_s16 + $0x60] sm:$0xff] }
0x1dc7   :  { %v4562_v7 = vpop.xlane.xlu1 %4561 }
0x1dc8   :  { %v4564_v57 = vsub.f32 %v4554_v35, %v4562_v7  ;;  %v5647_v7 = vld [vmem:[%s7708_s16 + $0x58] sm:$0xff] }
0x1dc9   :  { %v4559_v58 = vpop.xlane.xlu0 %4558 }
0x1dca   :  { %v4567_v59 = vmul.f32 1.442695, %v4564_v57  ;;  %v4563_v60 = vsub.f32 %v4549_v45, %v4559_v58  ;;  %v5650_v45 = vld [vmem:[%s7708_s16 + $0x70] sm:$0xff]  ;;  %v5645_v58 = vld [vmem:[%s7708_s16 + $0x48] sm:$0xff] }
0x1dcb   :  { %v5646_v57 = vld [vmem:[%s7708_s16 + $0x50] sm:$0xff] }
0x1dcc   :  { %6569 = vpow2.f32 %v4567_v59  ;;  %v4565_v61 = vmul.f32 1.442695, %v4563_v60  ;;  %v5644_v59 = vld [vmem:[%s7708_s16 + $0x40] sm:$0xff] }
0x1dcd   :  { %v5641_v60 = vld [vmem:[%s7707_s15 + $0x1] ss:$0 sm:$0xff] }
0x1dce   :  { %6571 = vpow2.f32 %v4565_v61 }
0x1dd9   :  { %v6570_v62 = vpop.eup %6569 }
0x1dda   :  { %v4572_v6 = vsel %vm486_vm2, %v6570_v62, 0.0 }
0x1ddb   :  { %v6572_v63 = vpop.eup %6571  ;;  %4573 = vadd.xlane.f32.xlu1 %v4572_v6 }
0x1ddc   :  { %v4569_v10 = vsel %vm486_vm2, %v6572_v63, 0.0 }
0x1ddd   :  { %4570 = vadd.xlane.f32.xlu0 %v4569_v10 }
0x1e64   :  { %v4574_v1 = vpop.xlane.xlu1 %4573 }
0x1e65   :  { %6573 = vrcp.f32 %v4574_v1 }
0x1e66   :  { %v4571_v2 = vpop.xlane.xlu0 %4570 }
0x1e67   :  { %6575 = vrcp.f32 %v4571_v2 }
0x1e72   :  { %v6574_v3 = vpop.eup %6573 }
0x1e73   :  { %v4578_v9 = vmul.f32 %v6574_v3, %v6570_v62 }
0x1e74   :  { %v6576_v4 = vpop.eup %6575 }
0x1e75   :  { %v4577_v8 = vmul.f32 %v6576_v4, %v6572_v63 }
0x1e77   :  { %6410 = vmatprep.mubr.msk.f32.mxu0 %vm486_vm2, %v4577_v8 }
0x1e78   :  { %6411 = vmatmul.mubr.msk.f32.vlgmr.msra.gmra.mxu0 %vm486_vm2, %v4578_v9 }
0x1f38   :  { %v6412_v11 = vpop.f32.mrf.mxu0 }
0x1f3a   :  { %v4651_v12 = vpop.f32.mrf.mxu0 }
0x1f3b   :  { %6415 = vmatprep.mubr.msk.f32.mxu1 %vm398_vm1, %v4651_v12 }
0x1f3c   :  { %6416 = vmatmul.mubr.msk.f32.vlgmr.msra.gmra.mxu1 %vm398_vm1, %v6412_v11 }
0x1f3d   :  { %6430 = vmatpush3.msra.mxu1 %v5651_v44 }
0x1f3e   :  { %6431 = vmatprep.subr.mxu1 %v5650_v45 }
0x1f3f   :  { %6432 = vmatpush3.msra.mxu1 %v5650_v45 }
0x1f40   :  { %6433 = vmatprep.subr.mxu1 %v5649_v5 }
0x1f41   :  { %6434 = vmatpush3.msra.mxu1 %v5649_v5 }
0x1f42   :  { %6435 = vmatprep.subr.mxu1 %v5648_v56 }
0x1f43   :  { %6436 = vmatpush3.msra.mxu1 %v5648_v56 }
0x1f44   :  { %6437 = vmatprep.subr.mxu1 %v5647_v7 }
0x1f45   :  { %6438 = vmatpush3.msra.mxu1 %v5647_v7 }
0x1f46   :  { %6439 = vmatprep.subr.mxu1 %v5646_v57 }
0x1f47   :  { %6440 = vmatpush3.msra.mxu1 %v5646_v57 }
0x1f48   :  { %6441 = vmatprep.subr.mxu1 %v5645_v58 }
0x1f49   :  { %6442 = vmatpush3.msra.mxu1 %v5645_v58 }
0x1f4a   :  { %6443 = vmatprep.subr.mxu1 %v5644_v59 }
0x1f4b   :  { %6444 = vmatpush3.msra.mxu1 %v5644_v59 }
0x1ffc   :  { %v6417_v13 = vpop.f32.mrf.mxu1 }
0x1ffd   :  { %v4744_v15 = vadd.f32 %v6417_v13, %v4205_v48  ;;  %v5653_v13 = vld [vmem:[%s7709_s17 + $0x1] ss:$0 sm:$0xff] }
0x1ffe   :  { %v4734_v16 = vpop.f32.mrf.mxu1 }
0x1fff   :  { %v4754_v17 = vadd.f32 %v5631_v14, %v4744_v15  ;;  %v4743_v18 = vadd.f32 %v4734_v16, %v4204_v50 }
0x2001   :  { %v4753_v19 = vadd.f32 %v5631_v14, %v4743_v18  ;;  %v4756_v20 = vadd.f32 %v4754_v17, %v7205_v47 }
0x2003   :  { %v4764_v21 = vsel %vm90_vm0, %v4756_v20, 0.0  ;;  %v4755_v22 = vadd.f32 %v4753_v19, %v7203_v33  ;;  %v5639_v33 = vld [vmem:[%s7706_s14 + $0x38] sm:$0xff] }
0x2004   :  { %4765 = vadd.xlane.f32.xlu1 %v4764_v21  ;;  %6418 = vmatprep.subr.mxu0 %v5639_v33 }
0x2005   :  { %v4761_v23 = vsel %vm90_vm0, %v4755_v22, 0.0  ;;  %6419 = vmatpush3.msra.mxu0 %v5639_v33  ;;  %v5054_v33 = vld [vmem:[%s7712_s20 + $0x8] sm:$0xff] }
0x2006   :  { %4762 = vadd.xlane.f32.xlu0 %v4761_v23  ;;  %6420 = vmatprep.subr.mxu0 %v5638_v39 }
0x2007   :  { %6421 = vmatpush3.msra.mxu0 %v5638_v39  ;;  %v5053_v39 = vld [vmem:[%s7712_s20] sm:$0xff] }
0x2008   :  { %6422 = vmatprep.subr.mxu0 %v5637_v40 }
0x2009   :  { %6423 = vmatpush3.msra.mxu0 %v5637_v40 }
0x200a   :  { %6424 = vmatprep.subr.mxu0 %v5636_v41 }
0x200b   :  { %6425 = vmatpush3.msra.mxu0 %v5636_v41 }
0x208d   :  { %v4766_v34 = vpop.xlane.xlu1 %4765 }
0x208e   :  { %v4768_v31 = vmul.f32 0.03125, %v4766_v34 }
0x208f   :  { %v4763_v26 = vpop.xlane.xlu0 %4762 }
0x2090   :  { %v4770_v27 = vsub.f32 %v4756_v20, %v4768_v31  ;;  %v4767_v29 = vmul.f32 0.03125, %v4763_v26 }
0x2092   :  { %v4769_v30 = vsub.f32 %v4755_v22, %v4767_v29  ;;  %v4772_v36 = vmul.f32 %v4770_v27, %v4770_v27 }
0x2094   :  { %v4776_v37 = vsel %vm90_vm0, %v4772_v36, 0.0  ;;  %v4771_v38 = vmul.f32 %v4769_v30, %v4769_v30 }
0x2095   :  { %4777 = vadd.xlane.f32.xlu1 %v4776_v37 }
0x2096   :  { %v4773_v47 = vsel %vm90_vm0, %v4771_v38, 0.0  ;;  %v5056_v38 = vld [vmem:[%s7712_s20 + $0x18] sm:$0xff] }
0x2097   :  { %4774 = vadd.xlane.f32.xlu0 %v4773_v47  ;;  %v5055_v47 = vld [vmem:[%s7712_s20 + $0x10] sm:$0xff]  ;;  %6448 = vmatprep.subr.mxu0 %v5056_v38 }
0x211e   :  { %v4778_v42 = vpop.xlane.xlu1 %4777 }
0x211f   :  { %v4780_v43 = vmul.f32 0.03125, %v4778_v42 }
0x2120   :  { %v4775_v46 = vpop.xlane.xlu0 %4774 }
0x2121   :  { %v4782_v24 = vadd.f32 1e-12, %v4780_v43  ;;  %v4779_v25 = vmul.f32 0.03125, %v4775_v46 }
0x2123   :  { %6577 = vrsqrt.f32 %v4782_v24  ;;  %v4781_v32 = vadd.f32 1e-12, %v4779_v25 }
0x2125   :  { %6579 = vrsqrt.f32 %v4781_v32  ;;  %v5658_v32 = vld [vmem:[%s7710_s18 + $0x1] ss:$0 sm:$0xff] }
0x2130   :  { %v6578_v48 = vpop.eup %6577 }
0x2131   :  { %v4786_v50 = vmul.f32 %v6578_v48, %v4770_v27 }
0x2132   :  { %v6580_v51 = vpop.eup %6579 }
0x2133   :  { %v4785_v52 = vmul.f32 %v6580_v51, %v4769_v30  ;;  %v4794_v53 = vmul.f32 %v5634_v49, %v4786_v50 }
0x2135   :  { %v4793_v55 = vmul.f32 %v5634_v49, %v4785_v52  ;;  %v4802_v35 = vadd.f32 %v5635_v54, %v4794_v53  ;;  %v5659_v52 = vld [vmem:[%s7711_s19 + $0x1] ss:$0 sm:$0xff] }
0x2137   :  { %v4801_v28 = vadd.f32 %v5635_v54, %v4793_v55 }
0x2139   :  { %6426 = vmatprep.mubr.msk.f32.mxu0 %vm90_vm0, %v4801_v28 }
0x213a   :  { %6427 = vmatmul.mubr.msk.f32.vlgmr.msra.gmra.mxu0 %vm90_vm0, %v4802_v35 }
0x213b   :  { %6449 = vmatpush3.msra.mxu0 %v5056_v38 }
0x213c   :  { %6450 = vmatprep.subr.mxu0 %v5055_v47 }
0x213d   :  { %6451 = vmatpush3.msra.mxu0 %v5055_v47 }
0x213e   :  { %6452 = vmatprep.subr.mxu0 %v5054_v33 }
0x213f   :  { %6453 = vmatpush3.msra.mxu0 %v5054_v33 }
0x2140   :  { %6454 = vmatprep.subr.mxu0 %v5053_v39 }
0x2141   :  { %6455 = vmatpush3.msra.mxu0 %v5053_v39 }
0x21fa   :  { %v6428_v61 = vpop.f32.mrf.mxu0 }
0x21fb   :  { %v4894_v62 = vadd.f32 %v6428_v61, %v5641_v60 }
0x21fc   :  { %v4888_v6 = vpop.f32.mrf.mxu0 }
0x21fd   :  { %v4900_v63 = vmul.f32 0.70710677, %v4894_v62  ;;  %v4889_v10 = vadd.f32 %v5641_v60, %v4888_v6  ;;  %v4898_v9 = vmul.f32 0.5, %v4894_v62 }
0x21ff   :  { %6581 = verf.f32 %v4900_v63  ;;  %v4899_v0 = vmul.f32 0.70710677, %v4889_v10  ;;  %v4897_v4 = vmul.f32 0.5, %v4889_v10 }
0x2201   :  { %6583 = verf.f32 %v4899_v0 }
0x220c   :  { %v6582_v1 = vpop.eup %6581 }
0x220d   :  { %v4904_v3 = vadd.f32 1.0, %v6582_v1  ;;  %v5214_v1 = vld [vmem:[%s7716_s24 + $0x78] sm:$0xff] }
0x220e   :  { %v6584_v2 = vpop.eup %6583  ;;  %6459 = vmatprep.subr.msk.mxu0 %vm90_vm0, %v5214_v1 }
0x220f   :  { %v4903_v8 = vadd.f32 1.0, %v6584_v2  ;;  %v4906_v12 = vmul.f32 %v4904_v3, %v4898_v9  ;;  %v5213_v2 = vld [vmem:[%s7716_s24 + $0x70] sm:$0xff]  ;;  %v5212_v3 = vld [vmem:[%s7716_s24 + $0x68] sm:$0xff] }
0x2210   :  { %v5209_v9 = vld [vmem:[%s7716_s24 + $0x50] sm:$0xff] }
0x2211   :  { %v4905_v11 = vmul.f32 %v4903_v8, %v4897_v4  ;;  %v5211_v4 = vld [vmem:[%s7716_s24 + $0x60] sm:$0xff]  ;;  %v5210_v8 = vld [vmem:[%s7716_s24 + $0x58] sm:$0xff] }
0x2213   :  { %6445 = vmatprep.mubr.msk.f32.mxu1 %vm2459_vm3, %v4905_v11  ;;  %v5208_v11 = vld [vmem:[%s7716_s24 + $0x48] sm:$0xff] }
0x2214   :  { %6446 = vmatmul.mubr.msk.f32.vlgmr.msra.gmra.mxu1 %vm2459_vm3, %v4906_v12  ;;  %v5207_v12 = vld [vmem:[%s7716_s24 + $0x40] sm:$0xff] }
0x22d4   :  { %v6447_v14 = vpop.f32.mrf.mxu1 }
0x22d5   :  { %v5002_v15 = vadd.f32 %v6447_v14, %v5653_v13  ;;  %v5205_v14 = vld [vmem:[%s7716_s24 + $0x30] sm:$0xff] }
0x22d6   :  { %v4996_v16 = vpop.f32.mrf.mxu1 }
0x22d7   :  { %v4997_v17 = vadd.f32 %v5653_v13, %v4996_v16  ;;  %v5006_v18 = vadd.f32 %v5002_v15, %v4802_v35  ;;  %v5206_v13 = vld [vmem:[%s7716_s24 + $0x38] sm:$0xff] }
0x22d9   :  { %v5014_v19 = vsel %vm90_vm0, %v5006_v18, 0.0  ;;  %v5005_v20 = vadd.f32 %v4997_v17, %v4801_v28  ;;  %v5660_v28 = vld [vmem:[%s7713_s21] ss:$0 sm:$0xff] }
0x22da   :  { %5015 = vadd.xlane.f32.xlu1 %v5014_v19 }
0x22db   :  { %v5011_v21 = vsel %vm90_vm0, %v5005_v20, 0.0 }
0x22dc   :  { %5012 = vadd.xlane.f32.xlu0 %v5011_v21 }
0x2363   :  { %v5016_v22 = vpop.xlane.xlu1 %5015 }
0x2364   :  { %v5018_v23 = vmul.f32 0.03125, %v5016_v22 }
0x2365   :  { %v5013_v34 = vpop.xlane.xlu0 %5012 }
0x2366   :  { %v5020_v31 = vsub.f32 %v5006_v18, %v5018_v23  ;;  %v5017_v26 = vmul.f32 0.03125, %v5013_v34 }
0x2368   :  { %v5019_v27 = vsub.f32 %v5005_v20, %v5017_v26  ;;  %v5022_v29 = vmul.f32 %v5020_v31, %v5020_v31  ;;  %v5203_v26 = vld [vmem:[%s7716_s24 + $0x20] sm:$0xff] }
0x236a   :  { %v5026_v30 = vsel %vm90_vm0, %v5022_v29, 0.0  ;;  %v5021_v36 = vmul.f32 %v5019_v27, %v5019_v27  ;;  %v5201_v29 = vld [vmem:[%s7716_s24 + $0x10] sm:$0xff] }
0x236b   :  { %5027 = vadd.xlane.f32.xlu1 %v5026_v30  ;;  %v5200_v30 = vld [vmem:[%s7716_s24 + $0x8] sm:$0xff] }
0x236c   :  { %v5023_v37 = vsel %vm90_vm0, %v5021_v36, 0.0  ;;  %v5199_v36 = vld [vmem:[%s7716_s24] sm:$0xff] }
0x236d   :  { %5024 = vadd.xlane.f32.xlu0 %v5023_v37 }
0x23f4   :  { %v5028_v40 = vpop.xlane.xlu1 %5027 }
0x23f5   :  { %v5030_v41 = vmul.f32 0.03125, %v5028_v40 }
0x23f6   :  { %v5025_v42 = vpop.xlane.xlu0 %5024 }
0x23f7   :  { %v5032_v43 = vadd.f32 1e-12, %v5030_v41  ;;  %v5029_v46 = vmul.f32 0.03125, %v5025_v42  ;;  %v5663_v42 = vld [vmem:[%s7714_s22] ss:$0 sm:$0xff]  ;;  %s6621_s22 = smov [#allocation2]  }
0x23f8   :  { %s5358_s26 = sshll.u32 %s6621_s22, 4  ;;  %s5359_s26 = int_to_ptr.vmem [resolvable:$true] %s5358_s26 }
0x23f9   :  { %6585 = vrsqrt.f32 %v5032_v43  ;;  %v5031_v24 = vadd.f32 1e-12, %v5029_v46  ;;  %p6604_p1 = scmp.lt.s32.totalorder %s5359_s26, %s5359_s26 }
0x23fb   :  { %6587 = vrsqrt.f32 %v5031_v24 }
0x2406   :  { %v6586_v25 = vpop.eup %6585 }
0x2407   :  { %v5036_v48 = vmul.f32 %v6586_v25, %v5020_v31  ;;  %v5204_v31 = vld [vmem:[%s7716_s24 + $0x28] sm:$0xff] }
0x2408   :  { %v6588_v49 = vpop.eup %6587 }
0x2409   :  { %v5035_v50 = vmul.f32 %v6588_v49, %v5019_v27  ;;  %v5044_v51 = vmul.f32 %v5658_v32, %v5036_v48  ;;  %v5202_v27 = vld [vmem:[%s7716_s24 + $0x18] sm:$0xff] }
0x240b   :  { %v5043_v53 = vmul.f32 %v5658_v32, %v5035_v50  ;;  %v5052_v55 = vadd.f32 %v5659_v52, %v5044_v51  ;;  %v5664_v32 = vld [vmem:[%s7715_s23] ss:$0 sm:$0xff]  ;;  %s6599_s23 = scalar_lea.vmem %s5359_s26, 256 }
0x240c   :  { %v5665_v51 = vld [vmem:[%s7717_s25] ss:$0 sm:$0xff]  ;;  %p6600_p0 = scmp.ne.s32.totalorder %s5359_s26, %s6599_s23  ;;  %p6605_p2 = scmp.lt.s32.totalorder %s6599_s23, %s6599_s23 }
0x240d   :  { %v5051_v54 = vadd.f32 %v5659_v52, %v5043_v53 }
0x240e   :  { %p6606_p3 = por %p6605_p2, %p6604_p1 }
0x240f   :  { %6456 = vmatprep.mubr.msk.f32.mxu0 %vm90_vm0, %v5051_v54 }
0x2410   :  { %6457 = vmatmul.mubr.msk.f32.vlgmr.msra.gmra.mxu0 %vm90_vm0, %v5052_v55  ;;  %p6607_p4 = pnand %p6606_p3, %p6600_p0 }
0x2411   :  { %6460 = vmatpush3.xpose.msk.msra.mxu0 %vm90_vm0, %v5214_v1 }
0x2412   :  { %6461 = vmatprep.subr.msk.mxu0 %vm90_vm0, %v5213_v2 }
0x2415   :  { %6462 = vmatpush3.xpose.msk.msra.mxu0 %vm90_vm0, %v5213_v2 }
0x2416   :  { %6463 = vmatprep.subr.msk.mxu0 %vm90_vm0, %v5212_v3 }
0x2419   :  { %6464 = vmatpush3.xpose.msk.msra.mxu0 %vm90_vm0, %v5212_v3 }
0x241a   :  { %6465 = vmatprep.subr.msk.mxu0 %vm90_vm0, %v5211_v4 }
0x241d   :  { %6466 = vmatpush3.xpose.msk.msra.mxu0 %vm90_vm0, %v5211_v4 }
0x241e   :  { %6467 = vmatprep.subr.msk.mxu0 %vm90_vm0, %v5210_v8 }
0x2421   :  { %6468 = vmatpush3.xpose.msk.msra.mxu0 %vm90_vm0, %v5210_v8 }
0x2422   :  { %6469 = vmatprep.subr.msk.mxu0 %vm90_vm0, %v5209_v9 }
0x2425   :  { %6470 = vmatpush3.xpose.msk.msra.mxu0 %vm90_vm0, %v5209_v9 }
0x2426   :  { %6471 = vmatprep.subr.msk.mxu0 %vm90_vm0, %v5208_v11 }
0x2429   :  { %6472 = vmatpush3.xpose.msk.msra.mxu0 %vm90_vm0, %v5208_v11 }
0x242a   :  { %6473 = vmatprep.subr.msk.mxu0 %vm90_vm0, %v5207_v12 }
0x242d   :  { %6474 = vmatpush3.xpose.msk.msra.mxu0 %vm90_vm0, %v5207_v12 }
0x242e   :  { %6475 = vmatprep.subr.msk.mxu0 %vm90_vm0, %v5206_v13 }
0x2431   :  { %6476 = vmatpush3.xpose.msk.msra.mxu0 %vm90_vm0, %v5206_v13 }
0x2432   :  { %6477 = vmatprep.subr.msk.mxu0 %vm90_vm0, %v5205_v14 }
0x2435   :  { %6478 = vmatpush3.xpose.msk.msra.mxu0 %vm90_vm0, %v5205_v14 }
0x2436   :  { %6479 = vmatprep.subr.msk.mxu0 %vm90_vm0, %v5204_v31 }
0x2439   :  { %6480 = vmatpush3.xpose.msk.msra.mxu0 %vm90_vm0, %v5204_v31 }
0x243a   :  { %6481 = vmatprep.subr.msk.mxu0 %vm90_vm0, %v5203_v26 }
0x243d   :  { %6482 = vmatpush3.xpose.msk.msra.mxu0 %vm90_vm0, %v5203_v26 }
0x243e   :  { %6483 = vmatprep.subr.msk.mxu0 %vm90_vm0, %v5202_v27 }
0x2441   :  { %6484 = vmatpush3.xpose.msk.msra.mxu0 %vm90_vm0, %v5202_v27 }
0x2442   :  { %6485 = vmatprep.subr.msk.mxu0 %vm90_vm0, %v5201_v29 }
0x2445   :  { %6486 = vmatpush3.xpose.msk.msra.mxu0 %vm90_vm0, %v5201_v29 }
0x2446   :  { %6487 = vmatprep.subr.msk.mxu0 %vm90_vm0, %v5200_v30 }
0x2449   :  { %6488 = vmatpush3.xpose.msk.msra.mxu0 %vm90_vm0, %v5200_v30 }
0x244a   :  { %6489 = vmatprep.subr.msk.mxu0 %vm90_vm0, %v5199_v36 }
0x244d   :  { %6490 = vmatpush3.xpose.msk.msra.mxu0 %vm90_vm0, %v5199_v36 }
0x24d0   :  { %v6458_v35 = vpop.f32.mrf.mxu0 }
0x24d1   :  { %v5142_v44 = vadd.f32 %v6458_v35, %v5660_v28 }
0x24d2   :  { %v5136_v45 = vpop.f32.mrf.mxu0 }
0x24d3   :  { %v5148_v5 = vmul.f32 0.70710677, %v5142_v44  ;;  %v5137_v56 = vadd.f32 %v5660_v28, %v5136_v45  ;;  %v5146_v58 = vmul.f32 0.5, %v5142_v44 }
0x24d5   :  { %6589 = verf.f32 %v5148_v5  ;;  %v5147_v7 = vmul.f32 0.70710677, %v5137_v56  ;;  %v5145_v61 = vmul.f32 0.5, %v5137_v56 }
0x24d7   :  { %6591 = verf.f32 %v5147_v7 }
0x24e2   :  { %v6590_v57 = vpop.eup %6589 }
0x24e3   :  { %v5152_v59 = vadd.f32 1.0, %v6590_v57 }
0x24e4   :  { %v6592_v60 = vpop.eup %6591 }
0x24e5   :  { %v5154_v62 = vmul.f32 %v5152_v59, %v5146_v58  ;;  %v5151_v6 = vadd.f32 1.0, %v6592_v60 }
0x24e7   :  { %v5160_v63 = vsel %vm90_vm0, %v5154_v62, 0.0  ;;  %v5153_v10 = vmul.f32 %v5151_v6, %v5145_v61 }
0x24e8   :  { %5161 = vadd.xlane.f32.xlu1 %v5160_v63 }
0x24e9   :  { %v5157_v0 = vsel %vm90_vm0, %v5153_v10, 0.0 }
0x24ea   :  { %5158 = vadd.xlane.f32.xlu0 %v5157_v0 }
0x2571   :  { %v5162_v15 = vpop.xlane.xlu1 %5161 }
0x2572   :  { %v5164_v16 = vmul.f32 0.03125, %v5162_v15 }
0x2573   :  { %v5159_v17 = vpop.xlane.xlu0 %5158 }
0x2574   :  { %v5166_v18 = vsub.f32 %v5154_v62, %v5164_v16  ;;  %v5163_v19 = vmul.f32 0.03125, %v5159_v17 }
0x2576   :  { %v5165_v20 = vsub.f32 %v5153_v10, %v5163_v19  ;;  %v5168_v21 = vmul.f32 %v5166_v18, %v5166_v18 }
0x2578   :  { %v5172_v22 = vsel %vm90_vm0, %v5168_v21, 0.0  ;;  %v5167_v23 = vmul.f32 %v5165_v20, %v5165_v20 }
0x2579   :  { %5173 = vadd.xlane.f32.xlu1 %v5172_v22 }
0x257a   :  { %v5169_v34 = vsel %vm90_vm0, %v5167_v23, 0.0 }
0x257b   :  { %5170 = vadd.xlane.f32.xlu0 %v5169_v34 }
0x2602   :  { %v5174_v37 = vpop.xlane.xlu1 %5173 }
0x2603   :  { %v5176_v38 = vmul.f32 0.03125, %v5174_v37 }
0x2604   :  { %v5171_v47 = vpop.xlane.xlu0 %5170 }
0x2605   :  { %v5178_v33 = vadd.f32 1e-12, %v5176_v38  ;;  %v5175_v39 = vmul.f32 0.03125, %v5171_v47 }
0x2607   :  { %6593 = vrsqrt.f32 %v5178_v33  ;;  %v5177_v40 = vadd.f32 1e-12, %v5175_v39 }
0x2609   :  { %6595 = vrsqrt.f32 %v5177_v40 }
0x2614   :  { %v6594_v41 = vpop.eup %6593 }
0x2615   :  { %v5182_v43 = vmul.f32 %v6594_v41, %v5166_v18 }
0x2616   :  { %v6596_v46 = vpop.eup %6595 }
0x2617   :  { %v5181_v24 = vmul.f32 %v6596_v46, %v5165_v20  ;;  %v5190_v25 = vmul.f32 %v5663_v42, %v5182_v43 }
0x2619   :  { %v5189_v48 = vmul.f32 %v5663_v42, %v5181_v24  ;;  %v5198_v50 = vadd.f32 %v5664_v32, %v5190_v25 }
0x261b   :  { %v5197_v49 = vadd.f32 %v5664_v32, %v5189_v48 }
0x261d   :  { %6491 = vmatprep.mubr.msk.f32.mxu0 %vm90_vm0, %v5197_v49 }
0x261e   :  { %6492 = vmatmul.mubr.msk.f32.vlgmr.msra.gmra.mxu0 %vm90_vm0, %v5198_v50 }
0x26de   :  { %v6493_v52 = vpop.f32.mrf.mxu0 }
0x26df   :  { %v5348_v53 = vadd.f32 %v6493_v52, %v5665_v51 }
0x26e0   :  { %v5342_v54 = vpop.f32.mrf.mxu0 }
0x26e1   :  { %5352 = vst [vmem:[#allocation2 + $0x8] sm:$0xff] %v5348_v53  ;;  %v5343_v55 = vadd.f32 %v5665_v51, %v5342_v54 }
0x26e3   :  { %5351 = vst [vmem:[#allocation2] sm:$0xff] %v5343_v55 }
0x26e4   :  { %6610 = shalt.err (!%p6607_p4)
}
0x26e5   :  { %s6622_s15 = smov 128   ;;  %s6623_s16 = smov 8  }
0x26e6   :  { %s7751_s14 = sld [smem:[#allocation16_spill]] }
0x26ec   :  { %5364 = dma.vmem_to_hbm [thread:$0]  %s5359_s26, 256, %s7751_s14, [#allocation3], %s6622_s15, %s6622_s15, %s6623_s16  }
0x26ed   :  { %6619 = dma.done.wait [#allocation3], 256  }
0x26ee   :  { %6620 = vsyncadd [#allocation3], 4294967040 }
0x26ef   :  { %5368 = vsyncpa [#allocation3], 1 }

</bundles_post_ra>
